<compile_context>
chip_gen: v5e
topology: v5e:2x2
jax: 0.10.0
libtpu: 0.0.40
codegen_flags: <defaults>
</compile_context>

<pallas_src>
import functools
import math

import jax
import jax.numpy as jnp
from jax.experimental import pallas as pl
from jax.experimental.pallas import tpu as pltpu


def meta_weight_kernel(sq_ref, w1sq_ref, consts_ref, w_ref, meta_ref, *, order):
    """One grid step processes bt = rows // order (query, session) pairs.

    sq_ref     : [rows, 2H] f32   rows = bt*order; columns = [session | query-repeated]
    w1sq_ref   : [2H, D1]   bf16  layer-1 weight for the [s | q] blocks, transposed
    consts_ref : [8, 2H]    f32   packed static rows (see prepare_params)
    w_ref      : [bt, order, 1] f32  per-pair softmax weights
    meta_ref   : [bt, 1, 1]     f32  per-pair meta loss
    """
    sq = sq_ref[...]
    rows, two_h = sq.shape
    h = two_h // 2
    bt = rows // order
    d1 = w1sq_ref.shape[1]

    consts = consts_ref[...]
    c1 = consts[0:1, :d1]        # column sums of the layer-1 loss-repeat block
    b1 = consts[1:2, :d1]        # layer-1 bias
    w2 = consts[2:3, :d1]        # sqrt(3H) * SSL_layer2.weight
    w3 = consts[3:4, :two_h]     # SSL_layer3.weight
    b2 = consts[4:5, 0:1]        # sqrt(3H) * SSL_layer2.bias
    b3 = consts[5:6, 0:1]        # SSL_layer3.bias

    s = sq[:, :h]
    q = sq[:, h:]
    diff = q - s
    losses = jnp.sum(diff * diff, axis=1, keepdims=True)            # [rows, 1] f32

    # SSL_layer1 on [loss_rep | s | q_rep]: loss block collapsed to losses*c1 (VPU),
    # s/q blocks fused into ONE K=2H MXU push with bf16 operands, f32 accumulation.
    h1 = (losses * c1 + b1
          + jnp.dot(sq.astype(jnp.bfloat16), w1sq_ref[...],
                    preferred_element_type=jnp.float32))            # [rows, D1]
    # dropout(p=0.8): identity in eval mode.
    # TODO(synk): training-mode dropout (pltpu PRNG stochastic masking) not implemented.

    # SSL_layer2 (sqrt(3H) folded into w2/b2): N=1 matvec as VPU multiply + lane reduce.
    out2 = jnp.sum(h1 * w2, axis=1, keepdims=True) + b2             # [rows, 1]

    # SSL_layer3: losses * ([s | q] @ W3^T) + b3, also VPU multiply + lane reduce.
    out3 = losses * jnp.sum(sq * w3, axis=1, keepdims=True) + b3    # [rows, 1]

    g = 0.5 * (jax.nn.sigmoid(out2) + jax.nn.sigmoid(out3))         # [rows, 1]

    # Per-pair softmax over the `order` sessions + meta = losses^T @ w.
    # Split the row axis into (bt, order): a leading-dim split (pure relabeling when
    # order matches the sublane granularity), then grouped reduces over axis=1.
    g3 = g.reshape(bt, order, 1)
    l3 = losses.reshape(bt, order, 1)
    g3 = g3 - jnp.max(g3, axis=1, keepdims=True)
    e = jnp.exp(g3)
    w = e / jnp.sum(e, axis=1, keepdims=True)                       # exact division
    w_ref[...] = w
    meta_ref[...] = jnp.sum(l3 * w, axis=1, keepdims=True)


def prepare_params(params, hidden_dim):
    """One-time preprocessing of the PyTorch-layout weights (hoisted out of the hot
    path): slice the concat blocks, transpose to [in, out], collapse the rank-1
    loss-repeat block to a column sum, fold sqrt(3H) into layer 2, and pack every
    small static row/scalar into a single resident f32 slab."""
    h = hidden_dim
    d1 = (3 * h) // 2
    w1 = jnp.asarray(params["SSL_layer1.weight"], jnp.float32)      # [D1, 3H]
    b1 = jnp.asarray(params["SSL_layer1.bias"], jnp.float32)        # [D1]
    w2 = jnp.asarray(params["SSL_layer2.weight"], jnp.float32)      # [1, D1]
    b2 = jnp.asarray(params["SSL_layer2.bias"], jnp.float32)        # [1]
    w3 = jnp.asarray(params["SSL_layer3.weight"], jnp.float32)      # [1, 2H]
    b3 = jnp.asarray(params["SSL_layer3.bias"], jnp.float32)        # [1]

    scale = jnp.float32(math.sqrt(3.0 * h))                         # sqrt(SSL_input2.shape[1])

    w1_loss = jnp.transpose(w1[:, 0:h])                             # [H, D1]
    w1_sess = jnp.transpose(w1[:, h:2 * h])                         # [H, D1]
    w1_query = jnp.transpose(w1[:, 2 * h:3 * h])                    # [H, D1]
    # MXU operand for the fused [s | q] blocks, cast once to bf16 (native MXU pass).
    w1sq = jnp.concatenate([w1_sess, w1_query], axis=0).astype(jnp.bfloat16)   # [2H, D1]

    cw = 2 * h                                                      # 2H >= D1 = 1.5H
    consts = jnp.zeros((8, cw), jnp.float32)
    consts = consts.at[0, :d1].set(jnp.sum(w1_loss, axis=0))        # losses*c1 == loss_rep @ w1_loss
    consts = consts.at[1, :d1].set(b1)
    consts = consts.at[2, :d1].set(scale * w2[0])                   # sqrt(3H) folded in
    consts = consts.at[3, :2 * h].set(w3[0])
    consts = consts.at[4, 0].set(scale * b2[0])
    consts = consts.at[5, 0].set(b3[0])
    return {"w1sq": w1sq, "consts": consts}


def _choose_block_pairs(batch, order):
    """Pairs per grid step: target ~256 rows per step (fills the MXU M dimension and
    amortizes the ~0.35us per-step overhead); kept a multiple of 8 so rows stay
    sublane-aligned for the in-kernel (rows,1)->(bt,order,1) split.  VMEM is not a
    constraint at these sizes on any generation (v7x's 64 MiB included)."""
    target_rows = 256
    bt = max(8, (max(1, target_rows // max(order, 1)) // 8) * 8)
    b_padded = ((batch + 7) // 8) * 8
    return max(8, min(bt, b_padded))


@functools.partial(jax.jit, static_argnames=("block_pairs",))
def meta_weight_net_batched(q_batch, s_batch, prepped, block_pairs=None):
    """Batched forward: q_batch [B, H], s_batch [B, order, H] ->
    (meta [B, 1, 1], weights [B, order, 1])."""
    bsz, order, h = s_batch.shape
    w1sq, consts = prepped["w1sq"], prepped["consts"]
    d1 = w1sq.shape[1]
    cw = consts.shape[1]

    bt = _choose_block_pairs(bsz, order) if block_pairs is None else block_pairs
    b_pad = ((bsz + bt - 1) // bt) * bt
    pad = b_pad - bsz
    q_f = jnp.pad(q_batch.astype(jnp.float32), ((0, pad), (0, 0)))
    s_f = jnp.pad(s_batch.astype(jnp.float32), ((0, pad), (0, 0), (0, 0)))

    # Fused layer-1 operand built in the wrapper as pure layout:
    # row r = pair*order + o holds [ session_embedding[pair, o] | query_embedding[pair] ].
    q_rep = jnp.broadcast_to(q_f[:, None, :], (b_pad, order, h))
    sq = jnp.concatenate([s_f, q_rep], axis=-1).reshape(b_pad * order, 2 * h)

    rows = bt * order
    weights, meta = pl.pallas_call(
        functools.partial(meta_weight_kernel, order=order),
        grid=(b_pad // bt,),
        in_specs=[
            pl.BlockSpec((rows, 2 * h), lambda t: (t, 0)),     # streamed pair rows
            pl.BlockSpec((2 * h, d1), lambda t: (0, 0)),       # resident bf16 weight
            pl.BlockSpec((8, cw), lambda t: (0, 0)),           # resident packed constants
        ],
        out_specs=(
            pl.BlockSpec((bt, order, 1), lambda t: (t, 0, 0)),
            pl.BlockSpec((bt, 1, 1), lambda t: (t, 0, 0)),
        ),
        out_shape=(
            jax.ShapeDtypeStruct((b_pad, order, 1), jnp.float32),
            jax.ShapeDtypeStruct((b_pad, 1, 1), jnp.float32),
        ),
        compiler_params=pltpu.CompilerParams(
            dimension_semantics=("parallel",)),                # batch tiles shard across TCs
    )(sq, w1sq, consts)
    return meta[:bsz], weights[:bsz]


def meta_weight_net(query_embedding, session_embedding, prepped):
    """Single-pair API matching the PyTorch module: q [1, H], s [order, H] ->
    (meta_infoNCELoss [1, 1], session_con_loss_weights [order, 1])."""
    meta, weights = meta_weight_net_batched(query_embedding, session_embedding[None],
                                            prepped)
    return meta[0], weights[0]


def init_params(key, hidden_dim):
    """Deterministic PyTorch-default-style init (uniform +-1/sqrt(fan_in))."""
    h = hidden_dim
    keys = jax.random.split(key, 6)

    def lin(kw, kb, fan_in, fan_out):
        bound = 1.0 / math.sqrt(fan_in)
        w = jax.random.uniform(kw, (fan_out, fan_in), jnp.float32, -bound, bound)
        b = jax.random.uniform(kb, (fan_out,), jnp.float32, -bound, bound)
        return w, b

    w1, b1 = lin(keys[0], keys[1], 3 * h, (3 * h) // 2)
    w2, b2 = lin(keys[2], keys[3], (3 * h) // 2, 1)
    w3, b3 = lin(keys[4], keys[5], 2 * h, 1)
    return {
        "SSL_layer1.weight": w1, "SSL_layer1.bias": b1,
        "SSL_layer2.weight": w2, "SSL_layer2.bias": b2,
        "SSL_layer3.weight": w3, "SSL_layer3.bias": b3,
    }


def reference_forward(q, s, params, order, h):
    """Pure-JAX reference mirroring the PyTorch forward (eval-mode dropout)."""
    q_rep = jnp.broadcast_to(q, (order, h))
    losses = jnp.sum((q_rep - s) ** 2, axis=1)                       # [order]
    ssl_in2 = jnp.concatenate(
        [jnp.broadcast_to(losses[:, None], (order, h)), s, q_rep], axis=1)
    ssl_in3 = losses[:, None] * jnp.concatenate([s, q_rep], axis=1)
    h1 = ssl_in2 @ params["SSL_layer1.weight"].T + params["SSL_layer1.bias"]
    out2 = math.sqrt(3 * h) * (h1 @ params["SSL_layer2.weight"].T
                               + params["SSL_layer2.bias"])
    out3 = ssl_in3 @ params["SSL_layer3.weight"].T + params["SSL_layer3.bias"]
    w = jax.nn.softmax((jax.nn.sigmoid(out2) + jax.nn.sigmoid(out3)) / 2.0, axis=0)
    meta = losses[None, :] @ w
    return meta, w


if __name__ == "__main__":
    ORDER, HIDDEN, BATCH = 8, 32, 64

    key = jax.random.PRNGKey(0)
    k_q, k_s, k_p = jax.random.split(key, 3)
    # Embedding-scale inputs; keeps the sqrt(3H)-amplified logits in a regime where
    # the bf16-MXU layer-1 path stays within the validation tolerances below.
    q_batch = 0.5 * jax.random.normal(k_q, (BATCH, HIDDEN), jnp.float32)
    s_batch = 0.5 * jax.random.normal(k_s, (BATCH, ORDER, HIDDEN), jnp.float32)
    params = init_params(k_p, HIDDEN)
    prepped = prepare_params(params, HIDDEN)       # one-time static preprocessing

    # Batched path: BT = 32 pairs (256 rows) per grid step, grid = (2,).
    meta_b, weights_b = meta_weight_net_batched(q_batch, s_batch, prepped)
    jax.block_until_ready((meta_b, weights_b))
    assert meta_b.shape == (BATCH, 1, 1) and weights_b.shape == (BATCH, ORDER, 1)

    # Softmax weights must sum to 1 per pair (f32 epilogue, exact division).
    wsum = jnp.sum(weights_b[:, :, 0], axis=1)
    assert jnp.allclose(wsum, jnp.ones_like(wsum), atol=1e-5)

    # Module-faithful f32 reference.  The kernel's layer-1 matmul uses bf16 operands
    # (f32 accumulation); the sqrt(3H) gain plus sigmoid/softmax amplify that to
    # O(1e-2) on weights near sigmoid midpoints and O(1%) on meta -> tolerances below.
    ref_meta, ref_w = jax.vmap(
        lambda q, s: reference_forward(q, s, params, ORDER, HIDDEN))(q_batch, s_batch)
    assert ref_meta.shape == (BATCH, 1, 1) and ref_w.shape == (BATCH, ORDER, 1)
    assert jnp.allclose(weights_b, ref_w, atol=2.5e-2)
    assert jnp.allclose(meta_b, ref_meta, atol=1e-1, rtol=2.5e-2)

    # Single-pair path (module-equivalent shapes); also exercises the padding path.
    meta1, w1 = meta_weight_net(q_batch[0:1], s_batch[0], prepped)
    jax.block_until_ready((meta1, w1))
    assert meta1.shape == (1, 1) and w1.shape == (ORDER, 1)
    assert jnp.allclose(w1, ref_w[0], atol=2.5e-2)
    assert jnp.allclose(meta1, ref_meta[0], atol=1e-1, rtol=2.5e-2)

    print("KERNEL_OK")
</pallas_src>

<mosaic_0001>
module attributes {stable_mosaic.version = 11 : i64} {
  func.func @meta_weight_kernel(%arg0: i32, %arg1: memref<256x64xf32, #tpu.memory_space<vmem>>, %arg2: memref<64x48xbf16, #tpu.memory_space<vmem>>, %arg3: memref<8x64xf32, #tpu.memory_space<vmem>>, %arg4: memref<32x8x1xf32, #tpu.memory_space<vmem>>, %arg5: memref<32x1x1xf32, #tpu.memory_space<vmem>>) attributes {dimension_semantics = [#tpu.dimension_semantics<parallel>], iteration_bounds = array<i64: 2>, scalar_prefetch = 0 : i64, scratch_operands = 0 : i64, tpu.core_type = #tpu.core_type<tc>, window_params = [{transform_indices = @transform_0, window_bounds = array<i64: 256, 64>}, {pipeline_mode = #tpu.pipeline_mode<synchronous>, transform_indices = @transform_1, window_bounds = array<i64: 64, 48>}, {pipeline_mode = #tpu.pipeline_mode<synchronous>, transform_indices = @transform_2, window_bounds = array<i64: 8, 64>}, {transform_indices = @transform_3, window_bounds = array<i64: 32, 8, 1>}, {transform_indices = @transform_4, window_bounds = array<i64: 32, 1, 1>}]} {
    %c0 = arith.constant 0 : index
    %c0_0 = arith.constant 0 : index
    %0 = vector.load %arg1[%c0, %c0_0] : memref<256x64xf32, #tpu.memory_space<vmem>>, vector<256x64xf32>
    %c0_1 = arith.constant 0 : index
    %c0_2 = arith.constant 0 : index
    %1 = vector.load %arg3[%c0_1, %c0_2] : memref<8x64xf32, #tpu.memory_space<vmem>>, vector<8x64xf32>
    %2 = vector.extract_strided_slice %1 {offsets = [0, 0], sizes = [1, 48], strides = [1, 1]} : vector<8x64xf32> to vector<1x48xf32>
    %3 = vector.extract_strided_slice %1 {offsets = [1, 0], sizes = [1, 48], strides = [1, 1]} : vector<8x64xf32> to vector<1x48xf32>
    %4 = vector.extract_strided_slice %1 {offsets = [2, 0], sizes = [1, 48], strides = [1, 1]} : vector<8x64xf32> to vector<1x48xf32>
    %5 = vector.extract_strided_slice %1 {offsets = [3, 0], sizes = [1, 64], strides = [1, 1]} : vector<8x64xf32> to vector<1x64xf32>
    %6 = vector.extract_strided_slice %1 {offsets = [4, 0], sizes = [1, 1], strides = [1, 1]} : vector<8x64xf32> to vector<1x1xf32>
    %7 = vector.extract_strided_slice %1 {offsets = [5, 0], sizes = [1, 1], strides = [1, 1]} : vector<8x64xf32> to vector<1x1xf32>
    %8 = vector.extract_strided_slice %0 {offsets = [0, 0], sizes = [256, 32], strides = [1, 1]} : vector<256x64xf32> to vector<256x32xf32>
    %9 = vector.extract_strided_slice %0 {offsets = [0, 32], sizes = [256, 32], strides = [1, 1]} : vector<256x64xf32> to vector<256x32xf32>
    %10 = arith.subf %9, %8 : vector<256x32xf32>
    %11 = arith.mulf %10, %10 : vector<256x32xf32>
    %cst = arith.constant dense<0.000000e+00> : vector<256xf32>
    %12 = vector.multi_reduction <add>, %11, %cst [1] : vector<256x32xf32> to vector<256xf32>
    %13 = vector.shape_cast %12 : vector<256xf32> to vector<256x1xf32>
    %14 = vector.broadcast %13 : vector<256x1xf32> to vector<256x48xf32>
    %15 = vector.broadcast %2 : vector<1x48xf32> to vector<256x48xf32>
    %16 = arith.mulf %14, %15 : vector<256x48xf32>
    %17 = vector.broadcast %3 : vector<1x48xf32> to vector<256x48xf32>
    %18 = arith.addf %16, %17 : vector<256x48xf32>
    %19 = arith.truncf %0 : vector<256x64xf32> to vector<256x64xbf16>
    %c0_3 = arith.constant 0 : index
    %c0_4 = arith.constant 0 : index
    %20 = vector.load %arg2[%c0_3, %c0_4] : memref<64x48xbf16, #tpu.memory_space<vmem>>, vector<64x48xbf16>
    %cst_5 = arith.constant dense<0.000000e+00> : vector<256x48xf32>
    %21 = tpu.matmul %19, %20, %cst_5 {dimension_numbers = #tpu.dot_dimension_numbers<[1], [0], [0], [1], [0, 0, 1, 1], [], []>} : vector<256x64xbf16>, vector<64x48xbf16>, vector<256x48xf32> -> vector<256x48xf32>
    %22 = arith.addf %18, %21 : vector<256x48xf32>
    %23 = vector.broadcast %4 : vector<1x48xf32> to vector<256x48xf32>
    %24 = arith.mulf %22, %23 : vector<256x48xf32>
    %cst_6 = arith.constant dense<0.000000e+00> : vector<256xf32>
    %25 = vector.multi_reduction <add>, %24, %cst_6 [1] : vector<256x48xf32> to vector<256xf32>
    %26 = vector.shape_cast %25 : vector<256xf32> to vector<256x1xf32>
    %27 = vector.broadcast %6 : vector<1x1xf32> to vector<256x1xf32>
    %28 = arith.addf %26, %27 : vector<256x1xf32>
    %29 = vector.broadcast %5 : vector<1x64xf32> to vector<256x64xf32>
    %30 = arith.mulf %0, %29 : vector<256x64xf32>
    %cst_7 = arith.constant dense<0.000000e+00> : vector<256xf32>
    %31 = vector.multi_reduction <add>, %30, %cst_7 [1] : vector<256x64xf32> to vector<256xf32>
    %32 = vector.shape_cast %31 : vector<256xf32> to vector<256x1xf32>
    %33 = arith.mulf %13, %32 : vector<256x1xf32>
    %34 = vector.broadcast %7 : vector<1x1xf32> to vector<256x1xf32>
    %35 = arith.addf %33, %34 : vector<256x1xf32>
    %36 = arith.negf %28 : vector<256x1xf32>
    %37 = math.exp %36 : vector<256x1xf32>
    %cst_8 = arith.constant 1.000000e+00 : f32
    %38 = vector.broadcast %cst_8 : f32 to vector<256x1xf32>
    %39 = arith.addf %38, %37 : vector<256x1xf32>
    %40 = arith.divf %38, %39 : vector<256x1xf32>
    %41 = arith.negf %35 : vector<256x1xf32>
    %42 = math.exp %41 : vector<256x1xf32>
    %cst_9 = arith.constant 1.000000e+00 : f32
    %43 = vector.broadcast %cst_9 : f32 to vector<256x1xf32>
    %44 = arith.addf %43, %42 : vector<256x1xf32>
    %45 = arith.divf %43, %44 : vector<256x1xf32>
    %46 = arith.addf %40, %45 : vector<256x1xf32>
    %cst_10 = arith.constant 5.000000e-01 : f32
    %47 = vector.broadcast %cst_10 : f32 to vector<256x1xf32>
    %48 = arith.mulf %47, %46 : vector<256x1xf32>
    %49 = vector.shape_cast %48 : vector<256x1xf32> to vector<32x8x1xf32>
    %50 = vector.shape_cast %13 : vector<256x1xf32> to vector<32x8x1xf32>
    %cst_11 = arith.constant dense<0xFF800000> : vector<32x1xf32>
    %51 = vector.multi_reduction <maximumf>, %49, %cst_11 [1] : vector<32x8x1xf32> to vector<32x1xf32>
    %52 = vector.shape_cast %51 : vector<32x1xf32> to vector<32x1x1xf32>
    %53 = vector.broadcast %52 : vector<32x1x1xf32> to vector<32x8x1xf32>
    %54 = arith.subf %49, %53 : vector<32x8x1xf32>
    %55 = math.exp %54 : vector<32x8x1xf32>
    %cst_12 = arith.constant dense<0.000000e+00> : vector<32x1xf32>
    %56 = vector.multi_reduction <add>, %55, %cst_12 [1] : vector<32x8x1xf32> to vector<32x1xf32>
    %57 = vector.shape_cast %56 : vector<32x1xf32> to vector<32x1x1xf32>
    %58 = vector.broadcast %57 : vector<32x1x1xf32> to vector<32x8x1xf32>
    %59 = arith.divf %55, %58 : vector<32x8x1xf32>
    %c0_13 = arith.constant 0 : index
    %c0_14 = arith.constant 0 : index
    %c0_15 = arith.constant 0 : index
    %60 = vector.load %arg4[%c0_13, %c0_14, %c0_15] : memref<32x8x1xf32, #tpu.memory_space<vmem>>, vector<32x8x1xf32>
    tpu.vector_store %arg4[%c0_13, %c0_14, %c0_15], %59 {strides = array<i32>} : memref<32x8x1xf32, #tpu.memory_space<vmem>>, vector<32x8x1xf32>,
    %61 = arith.mulf %50, %59 : vector<32x8x1xf32>
    %cst_16 = arith.constant dense<0.000000e+00> : vector<32x1xf32>
    %62 = vector.multi_reduction <add>, %61, %cst_16 [1] : vector<32x8x1xf32> to vector<32x1xf32>
    %63 = vector.shape_cast %62 : vector<32x1xf32> to vector<32x1x1xf32>
    %c0_17 = arith.constant 0 : index
    %c0_18 = arith.constant 0 : index
    %c0_19 = arith.constant 0 : index
    %64 = vector.load %arg5[%c0_17, %c0_18, %c0_19] : memref<32x1x1xf32, #tpu.memory_space<vmem>>, vector<32x1x1xf32>
    tpu.vector_store %arg5[%c0_17, %c0_18, %c0_19], %63 {strides = array<i32>} : memref<32x1x1xf32, #tpu.memory_space<vmem>>, vector<32x1x1xf32>,
    return
  }
  func.func @transform_0(%arg0: i32) -> (i32, i32) {
    %c0_i32 = arith.constant 0 : i32
    %c0_i32_0 = arith.constant 0 : i32
    return %arg0, %c0_i32 : i32, i32
  }
  func.func @transform_1(%arg0: i32) -> (i32, i32) {
    %c0_i32 = arith.constant 0 : i32
    %c0_i32_0 = arith.constant 0 : i32
    %c0_i32_1 = arith.constant 0 : i32
    return %c0_i32, %c0_i32_0 : i32, i32
  }
  func.func @transform_2(%arg0: i32) -> (i32, i32) {
    %c0_i32 = arith.constant 0 : i32
    %c0_i32_0 = arith.constant 0 : i32
    %c0_i32_1 = arith.constant 0 : i32
    return %c0_i32, %c0_i32_0 : i32, i32
  }
  func.func @transform_3(%arg0: i32) -> (i32, i32, i32) {
    %c0_i32 = arith.constant 0 : i32
    %c0_i32_0 = arith.constant 0 : i32
    %c0_i32_1 = arith.constant 0 : i32
    return %arg0, %c0_i32, %c0_i32_0 : i32, i32, i32
  }
  func.func @transform_4(%arg0: i32) -> (i32, i32, i32) {
    %c0_i32 = arith.constant 0 : i32
    %c0_i32_0 = arith.constant 0 : i32
    %c0_i32_1 = arith.constant 0 : i32
    return %arg0, %c0_i32, %c0_i32_0 : i32, i32, i32
  }
}

</mosaic_0001>

<bundles_post_ra>
// kernel: meta_weight_net_batched.1
= control target key start
LH: loop header
LB: loop body
LE: loop exit
PB: predicated region body
PF: predicated region fallthrough
CT: control target
= control target key end

     0   :  { %s4575_s15 = smov 0   ;;  %s8384_s0 = inlined_call_operand.vmem [shape: f32[512,64], index: 0, kind: input, shape index: {}]   ;;  %s8385_s1 = inlined_call_operand.vmem [shape: bf16[64,48], index: 1, kind: input, shape index: {}]   ;;  %s8386_s2 = inlined_call_operand.vmem [shape: f32[8,64], index: 2, kind: input, shape index: {}]   ;;  %s8387_s3 = inlined_call_operand.vmem [shape: f32[64,8,1], index: 3, kind: output, shape index: {0}]   ;;  %s8388_s4 = inlined_call_operand.vmem [shape: f32[64,1,1], index: 4, kind: output, shape index: {1}]  }
   0x1 LB: > { %s4015_s16 = sadd.s32 4294967295, %s4546_s15   ;;  %p4019_p0 = scmp.ge.s32.totalorder %s4546_s15, 1  ;;  %s4546_s15 = sphi %s4575_s15, %s15_s15  }
   0x2   : > { %p166_p1 = scmp.lt.s32.totalorder %s4546_s15, 3 }
   0x4   : > { %p167_p2 = pnand %p4019_p0, %p166_p1 }
   0x6   : > { %170 = sbr.rel (%p167_p2) target bundleno = 1146 (0x47a), region = 32 }
   0xb   : > { %s4020_s17 = sshll.u32 %s4015_s16, 5  ;;  %s4548_s22 = smov 32   ;;  %vm778_vm0 = vcmask 523264   ;;  %vm567_vm1 = vcmask 261120   ;;  %vm981_vm2 = vcmask 392192  }
   0xc   : > { %p197_p3 = scmp.lt.s32.totalorder %s4020_s17, 63  ;;  %s4549_s23 = smov 96  }
   0xe   : > { %s9056_s17 = smov (!%p197_p3, %s4020_s17), 63 }
   0xf   : > { %s4021_s18 = sshll.u32 %s9056_s17, 3  ;;  %s6175_s16 = scalar_lea.vmem %s8388_s4, %s9056_s17 }
  0x10   : > { %s4591_s21 = scalar_lea.vmem %s8384_s0, %s4021_s18  ;;  %s6117_s12 = scalar_lea.vmem %s8387_s3, %s4021_s18 }
  0x11   : > { %v4594_v0 = vld [vmem:[%s4591_s21 + $0x10] sm:$0xff]  ;;  %v4597_v1 = vld [vmem:[%s4591_s21] sm:$0xff]  ;;  %v4609_v3 = vld [vmem:[%s4591_s21 + $0x8] sm:$0xff] }
  0x12   : > { %283 = vrot.lane.b32.xlu1 %v4594_v0, %s4548_s22  ;;  %279 = vrot.lane.b32.xlu0 %v4597_v1, %s4548_s22  ;;  %v4604_v2 = vld [vmem:[%s4591_s21 + $0x20] sm:$0xff]  ;;  %v4612_v4 = vld [vmem:[%s4591_s21 + $0x18] sm:$0xff] }
  0x13   : > { %287 = vrot.lane.b32.xlu2 %v4604_v2, %s4548_s22  ;;  %v4615_v5 = vld [vmem:[%s4591_s21 + $0x28] sm:$0xff]  ;;  %v4624_v6 = vld [vmem:[%s4591_s21 + $0x30] sm:$0xff]  ;;  %v4627_v7 = vld [vmem:[%s4591_s21 + $0x38] sm:$0xff] }
  0x14   : > { %v4630_v8 = vld [vmem:[%s4591_s21 + $0x40] sm:$0xff]  ;;  %v4639_v9 = vld [vmem:[%s4591_s21 + $0x48] sm:$0xff]  ;;  %v4642_v10 = vld [vmem:[%s4591_s21 + $0x50] sm:$0xff] }
  0x15   : > { %v4645_v11 = vld [vmem:[%s4591_s21 + $0x58] sm:$0xff]  ;;  %v4654_v12 = vld [vmem:[%s4591_s21 + $0x60] sm:$0xff]  ;;  %v4657_v13 = vld [vmem:[%s4591_s21 + $0x68] sm:$0xff] }
  0x16   : > { %v4660_v14 = vld [vmem:[%s4591_s21 + $0x70] sm:$0xff]  ;;  %v4669_v15 = vld [vmem:[%s4591_s21 + $0x78] sm:$0xff]  ;;  %v4672_v16 = vld [vmem:[%s4591_s21 + $0x80] sm:$0xff] }
  0x17   : > { %v4675_v17 = vld [vmem:[%s4591_s21 + $0x88] sm:$0xff]  ;;  %v4684_v18 = vld [vmem:[%s4591_s21 + $0x90] sm:$0xff]  ;;  %v4687_v19 = vld [vmem:[%s4591_s21 + $0x98] sm:$0xff] }
  0x18   : > { %v4690_v20 = vld [vmem:[%s4591_s21 + $0xa0] sm:$0xff]  ;;  %v4699_v21 = vld [vmem:[%s4591_s21 + $0xa8] sm:$0xff]  ;;  %v4702_v22 = vld [vmem:[%s4591_s21 + $0xb0] sm:$0xff] }
  0x19   : > { %v4705_v23 = vld [vmem:[%s4591_s21 + $0xb8] sm:$0xff]  ;;  %v4714_v24 = vld [vmem:[%s4591_s21 + $0xc0] sm:$0xff]  ;;  %v4717_v25 = vld [vmem:[%s4591_s21 + $0xc8] sm:$0xff] }
  0x1a   : > { %281 = vrot.lane.b32.xlu0 %v4609_v3, %s4548_s22  ;;  %285 = vrot.lane.b32.xlu1 %v4612_v4, %s4548_s22  ;;  %v4720_v26 = vld [vmem:[%s4591_s21 + $0xd0] sm:$0xff]  ;;  %v4729_v27 = vld [vmem:[%s4591_s21 + $0xd8] sm:$0xff] }
  0x1b   : > { %289 = vrot.lane.b32.xlu2 %v4615_v5, %s4548_s22  ;;  %v4732_v28 = vld [vmem:[%s4591_s21 + $0xe0] sm:$0xff]  ;;  %v4735_v29 = vld [vmem:[%s4591_s21 + $0xe8] sm:$0xff]  ;;  %v4744_v30 = vld [vmem:[%s4591_s21 + $0xf0] sm:$0xff] }
  0x1c   : > { %v4747_v31 = vld [vmem:[%s4591_s21 + $0xf8] sm:$0xff] }
  0x22   : > { %291 = vrot.lane.b32.xlu0 %v4624_v6, %s4548_s22  ;;  %293 = vrot.lane.b32.xlu1 %v4627_v7, %s4548_s22 }
  0x23   : > { %295 = vrot.lane.b32.xlu2 %v4630_v8, %s4548_s22 }
  0x2a   : > { %297 = vrot.lane.b32.xlu0 %v4639_v9, %s4548_s22  ;;  %299 = vrot.lane.b32.xlu1 %v4642_v10, %s4548_s22 }
  0x2b   : > { %301 = vrot.lane.b32.xlu2 %v4645_v11, %s4548_s22 }
  0x32   : > { %303 = vrot.lane.b32.xlu0 %v4654_v12, %s4548_s22  ;;  %305 = vrot.lane.b32.xlu1 %v4657_v13, %s4548_s22 }
  0x33   : > { %307 = vrot.lane.b32.xlu2 %v4660_v14, %s4548_s22 }
  0x3a   : > { %309 = vrot.lane.b32.xlu0 %v4669_v15, %s4548_s22  ;;  %311 = vrot.lane.b32.xlu1 %v4672_v16, %s4548_s22 }
  0x3b   : > { %313 = vrot.lane.b32.xlu2 %v4675_v17, %s4548_s22 }
  0x42   : > { %315 = vrot.lane.b32.xlu0 %v4684_v18, %s4548_s22  ;;  %317 = vrot.lane.b32.xlu1 %v4687_v19, %s4548_s22 }
  0x43   : > { %319 = vrot.lane.b32.xlu2 %v4690_v20, %s4548_s22 }
  0x4a   : > { %321 = vrot.lane.b32.xlu0 %v4699_v21, %s4548_s22  ;;  %323 = vrot.lane.b32.xlu1 %v4702_v22, %s4548_s22 }
  0x4b   : > { %325 = vrot.lane.b32.xlu2 %v4705_v23, %s4548_s22 }
  0x52   : > { %327 = vrot.lane.b32.xlu0 %v4714_v24, %s4548_s22  ;;  %329 = vrot.lane.b32.xlu1 %v4717_v25, %s4548_s22 }
  0x53   : > { %331 = vrot.lane.b32.xlu2 %v4720_v26, %s4548_s22 }
  0x5a   : > { %333 = vrot.lane.b32.xlu0 %v4729_v27, %s4548_s22  ;;  %335 = vrot.lane.b32.xlu1 %v4732_v28, %s4548_s22 }
  0x5b   : > { %337 = vrot.lane.b32.xlu2 %v4735_v29, %s4548_s22 }
  0x62   : > { %339 = vrot.lane.b32.xlu0 %v4744_v30, %s4548_s22  ;;  %341 = vrot.lane.b32.xlu1 %v4747_v31, %s4548_s22 }
  0x6d   : > { %v288_v32 = vpop.permute.xlu2 %287 }
  0x6e   : > { %v379_v51 = vsub.f32 %v4604_v2, %v288_v32 }
  0x70   : > { %v411_v57 = vmul.f32 %v379_v51, %v379_v51 }
  0x75   : > { %v290_v33 = vpop.permute.xlu2 %289 }
  0x76   : > { %v380_v41 = vsub.f32 %v4615_v5, %v290_v33 }
  0x78   : > { %v412_v45 = vmul.f32 %v380_v41, %v380_v41 }
  0x7d   : > { %v296_v34 = vpop.permute.xlu2 %295 }
  0x7e   : > { %v383_v50 = vsub.f32 %v4630_v8, %v296_v34 }
  0x80   : > { %v415_v55 = vmul.f32 %v383_v50, %v383_v50 }
  0x84   : > { %v284_v35 = vpop.permute.xlu1 %283  ;;  %v280_v36 = vpop.permute.xlu0 %279 }
  0x85   : > { %v377_v37 = vsub.f32 %v4594_v0, %v284_v35  ;;  %v375_v38 = vsub.f32 %v4597_v1, %v280_v36  ;;  %v302_v42 = vpop.permute.xlu2 %301 }
  0x86   : > { %v386_v59 = vsub.f32 %v4645_v11, %v302_v42 }
  0x87   : > { %v409_v39 = vmul.f32 %v377_v37, %v377_v37  ;;  %v407_v40 = vmul.f32 %v375_v38, %v375_v38 }
  0x88   : > { %v418_v63 = vmul.f32 %v386_v59, %v386_v59  ;;  %v4123_v59 = vld [vmem:[%s8385_s1] sm:$0xff] }
  0x89   : > { %475 = vrot.lane.b32.xlu1 %v409_v39, %s4549_s23  ;;  %471 = vrot.lane.b32.xlu2 %v407_v40, %s4549_s23 }
  0x8c   : > { %v282_v43 = vpop.permute.xlu0 %281  ;;  %v286_v44 = vpop.permute.xlu1 %285 }
  0x8d   : > { %v376_v46 = vsub.f32 %v4609_v3, %v282_v43  ;;  %v378_v47 = vsub.f32 %v4612_v4, %v286_v44  ;;  %v308_v52 = vpop.permute.xlu2 %307 }
  0x8e   : > { %v389_v36 = vsub.f32 %v4660_v14, %v308_v52 }
  0x8f   : > { %v408_v48 = vmul.f32 %v376_v46, %v376_v46  ;;  %v410_v49 = vmul.f32 %v378_v47, %v378_v47 }
  0x90   : > { %v421_v40 = vmul.f32 %v389_v36, %v389_v36 }
  0x91   : > { %481 = vrot.lane.b32.xlu1 %v412_v45, %s4549_s23  ;;  %473 = vrot.lane.b32.xlu0 %v408_v48, %s4549_s23  ;;  %v4126_v45 = vld [vmem:[%s8385_s1 + $0x18] sm:$0xff]  ;;  %v4125_v48 = vld [vmem:[%s8385_s1 + $0x10] sm:$0xff] }
  0x92   : > { %477 = vrot.lane.b32.xlu2 %v410_v49, %s4549_s23  ;;  %831 = vmatpush.bf16.msra.mxu0 %v4126_v45 }
  0x93   : > { %4127 = vmatpush.bf16.msra.mxu1 %v4126_v45  ;;  %4128 = vmatpush.bf16.msra.mxu2 %v4126_v45 }
  0x94   : > { %v292_v53 = vpop.permute.xlu0 %291  ;;  %v294_v54 = vpop.permute.xlu1 %293  ;;  %4129 = vmatpush.bf16.msra.mxu3 %v4126_v45 }
  0x95   : > { %v381_v56 = vsub.f32 %v4624_v6, %v292_v53  ;;  %v382_v60 = vsub.f32 %v4627_v7, %v294_v54  ;;  %v314_v34 = vpop.permute.xlu2 %313 }
  0x96   : > { %v392_v46 = vsub.f32 %v4675_v17, %v314_v34  ;;  %832 = vmatpush.bf16.msra.mxu0 %v4125_v48 }
  0x97   : > { %v413_v58 = vmul.f32 %v381_v56, %v381_v56  ;;  %v414_v32 = vmul.f32 %v382_v60, %v382_v60  ;;  %4130 = vmatpush.bf16.msra.mxu1 %v4125_v48  ;;  %4131 = vmatpush.bf16.msra.mxu2 %v4125_v48 }
  0x98   : > { %v424_v51 = vmul.f32 %v392_v46, %v392_v46  ;;  %4132 = vmatpush.bf16.msra.mxu3 %v4125_v48  ;;  %v734_v46 = vpack.c.bf16 %v4639_v9, %v4630_v8 }
  0x99   : > { %487 = vrot.lane.b32.xlu1 %v415_v55, %s4549_s23  ;;  %479 = vrot.lane.b32.xlu0 %v411_v57, %s4549_s23  ;;  %v4124_v55 = vld [vmem:[%s8385_s1 + $0x8] sm:$0xff] }
  0x9a   : > { %483 = vrot.lane.b32.xlu2 %v413_v58, %s4549_s23  ;;  %833 = vmatpush.bf16.msra.mxu0 %v4124_v55 }
  0x9b   : > { %4133 = vmatpush.bf16.msra.mxu1 %v4124_v55  ;;  %4134 = vmatpush.bf16.msra.mxu2 %v4124_v55 }
  0x9c   : > { %v298_v61 = vpop.permute.xlu0 %297  ;;  %v300_v62 = vpop.permute.xlu1 %299  ;;  %4135 = vmatpush.bf16.msra.mxu3 %v4124_v55 }
  0x9d   : > { %v384_v33 = vsub.f32 %v4639_v9, %v298_v61  ;;  %v385_v37 = vsub.f32 %v4642_v10, %v300_v62  ;;  %v320_v44 = vpop.permute.xlu2 %319 }
  0x9e   : > { %v395_v56 = vsub.f32 %v4690_v20, %v320_v44  ;;  %834 = vmatpush.bf16.msra.mxu0 %v4123_v59 }
  0x9f   : > { %v416_v35 = vmul.f32 %v384_v33, %v384_v33  ;;  %v417_v41 = vmul.f32 %v385_v37, %v385_v37  ;;  %v730_v33 = vpack.c.bf16 %v4609_v3, %v4597_v1  ;;  %4136 = vmatpush.bf16.msra.mxu1 %v4123_v59  ;;  %4137 = vmatpush.bf16.msra.mxu2 %v4123_v59 }
  0xa0   : > { %v427_v62 = vmul.f32 %v395_v56, %v395_v56  ;;  %4138 = vmatpush.bf16.msra.mxu3 %v4123_v59 }
  0xa1   : > { %493 = vrot.lane.b32.xlu1 %v418_v63, %s4549_s23  ;;  %485 = vrot.lane.b32.xlu0 %v414_v32, %s4549_s23 }
  0xa2   : > { %489 = vrot.lane.b32.xlu2 %v416_v35, %s4549_s23  ;;  %4041 = vmatmul.msk.bf16.vlgmr.msra.gmra.mxu0 %vm778_vm0, %v730_v33 }
  0xa3   : > { %4045 = vmatmul.msk.bf16.vlgmr.msra.gmra.mxu1 %vm778_vm0, %v734_v46  ;;  %v742_v46 = vpack.c.bf16 %v4717_v25, %v4714_v24 }
  0xa4   : > { %v304_v38 = vpop.permute.xlu0 %303  ;;  %v306_v39 = vpop.permute.xlu1 %305 }
  0xa5   : > { %v387_v42 = vsub.f32 %v4654_v12, %v304_v38  ;;  %v388_v47 = vsub.f32 %v4657_v13, %v306_v39  ;;  %v326_v58 = vpop.permute.xlu2 %325  ;;  %4053 = vmatmul.msk.bf16.vlgmr.msra.gmra.mxu3 %vm778_vm0, %v742_v46 }
  0xa6   : > { %v398_v35 = vsub.f32 %v4705_v23, %v326_v58 }
  0xa7   : > { %v419_v43 = vmul.f32 %v387_v42, %v387_v42  ;;  %v420_v52 = vmul.f32 %v388_v47, %v388_v47 }
  0xa9   : > { %499 = vrot.lane.b32.xlu1 %v421_v40, %s4549_s23  ;;  %491 = vrot.lane.b32.xlu0 %v417_v41, %s4549_s23  ;;  %v430_v40 = vmul.f32 %v398_v35, %v398_v35 }
  0xaa   : > { %495 = vrot.lane.b32.xlu2 %v419_v43, %s4549_s23 }
  0xac   : > { %v310_v49 = vpop.permute.xlu0 %309  ;;  %v312_v50 = vpop.permute.xlu1 %311 }
  0xad   : > { %v390_v53 = vsub.f32 %v4669_v15, %v310_v49  ;;  %v391_v57 = vsub.f32 %v4672_v16, %v312_v50  ;;  %v332_v37 = vpop.permute.xlu2 %331 }
  0xae   : > { %v401_v44 = vsub.f32 %v4720_v26, %v332_v37 }
  0xaf   : > { %v422_v54 = vmul.f32 %v390_v53, %v390_v53  ;;  %v423_v63 = vmul.f32 %v391_v57, %v391_v57  ;;  %v731_v53 = vpack.c.bf16 %v4612_v4, %v4594_v0 }
  0xb0   : > { %v433_v49 = vmul.f32 %v401_v44, %v401_v44 }
  0xb1   : > { %505 = vrot.lane.b32.xlu1 %v424_v51, %s4549_s23  ;;  %497 = vrot.lane.b32.xlu0 %v420_v52, %s4549_s23 }
  0xb2   : > { %501 = vrot.lane.b32.xlu2 %v422_v54, %s4549_s23  ;;  %4042 = vmatmul.msk.bf16.gmra.mxu0 %vm778_vm0, %v731_v53 }
  0xb4   : > { %v316_v60 = vpop.permute.xlu0 %315  ;;  %v318_v61 = vpop.permute.xlu1 %317 }
  0xb5   : > { %v393_v32 = vsub.f32 %v4684_v18, %v316_v60  ;;  %v394_v36 = vsub.f32 %v4687_v19, %v318_v61  ;;  %v338_v52 = vpop.permute.xlu2 %337 }
  0xb6   : > { %v404_v55 = vsub.f32 %v4735_v29, %v338_v52 }
  0xb7   : > { %v425_v34 = vmul.f32 %v393_v32, %v393_v32  ;;  %v426_v41 = vmul.f32 %v394_v36, %v394_v36  ;;  %v732_v36 = vpack.c.bf16 %v4615_v5, %v4604_v2 }
  0xb8   : > { %v436_v59 = vmul.f32 %v404_v55, %v404_v55 }
  0xb9   : > { %511 = vrot.lane.b32.xlu1 %v427_v62, %s4549_s23  ;;  %503 = vrot.lane.b32.xlu0 %v423_v63, %s4549_s23 }
  0xba   : > { %507 = vrot.lane.b32.xlu2 %v425_v34, %s4549_s23 }
  0xbc   : > { %v322_v38 = vpop.permute.xlu0 %321  ;;  %v324_v39 = vpop.permute.xlu1 %323 }
  0xbd   : > { %v396_v42 = vsub.f32 %v4699_v21, %v322_v38  ;;  %v397_v45 = vsub.f32 %v4702_v22, %v324_v39  ;;  %v735_v39 = vpack.c.bf16 %v4645_v11, %v4642_v10 }
  0xbf   : > { %v428_v43 = vmul.f32 %v396_v42, %v396_v42  ;;  %v429_v50 = vmul.f32 %v397_v45, %v397_v45  ;;  %4046 = vmatmul.msk.bf16.gmra.mxu1 %vm778_vm0, %v735_v39  ;;  %v733_v42 = vpack.c.bf16 %v4627_v7, %v4624_v6  ;;  %v739_v45 = vpack.c.bf16 %v4687_v19, %v4684_v18 }
  0xc1   : > { %517 = vrot.lane.b32.xlu1 %v430_v40, %s4549_s23  ;;  %509 = vrot.lane.b32.xlu0 %v426_v41, %s4549_s23  ;;  %v738_v40 = vpack.c.bf16 %v4675_v17, %v4672_v16 }
  0xc2   : > { %513 = vrot.lane.b32.xlu2 %v428_v43, %s4549_s23  ;;  %4043 = vmatmul.msk.bf16.gmra.mxu0 %vm778_vm0, %v732_v36  ;;  %v736_v43 = vpack.c.bf16 %v4657_v13, %v4654_v12 }
  0xc3   : > { %4049 = vmatmul.msk.bf16.vlgmr.msra.gmra.mxu2 %vm778_vm0, %v738_v40 }
  0xc4   : > { %v328_v47 = vpop.permute.xlu0 %327  ;;  %v330_v48 = vpop.permute.xlu1 %329 }
  0xc5   : > { %v399_v51 = vsub.f32 %v4714_v24, %v328_v47  ;;  %v400_v56 = vsub.f32 %v4717_v25, %v330_v48 }
  0xc7   : > { %v431_v54 = vmul.f32 %v399_v51, %v399_v51  ;;  %v432_v60 = vmul.f32 %v400_v56, %v400_v56  ;;  %v740_v51 = vpack.c.bf16 %v4699_v21, %v4690_v20  ;;  %v743_v56 = vpack.c.bf16 %v4729_v27, %v4720_v26 }
  0xc9   : > { %523 = vrot.lane.b32.xlu1 %v433_v49, %s4549_s23  ;;  %515 = vrot.lane.b32.xlu0 %v429_v50, %s4549_s23  ;;  %v737_v50 = vpack.c.bf16 %v4669_v15, %v4660_v14 }
  0xca   : > { %519 = vrot.lane.b32.xlu2 %v431_v54, %s4549_s23  ;;  %4054 = vmatmul.msk.bf16.gmra.mxu3 %vm778_vm0, %v743_v56 }
  0xcc   : > { %v334_v57 = vpop.permute.xlu0 %333  ;;  %v336_v58 = vpop.permute.xlu1 %335 }
  0xcd   : > { %v402_v61 = vsub.f32 %v4729_v27, %v334_v57  ;;  %v403_v63 = vsub.f32 %v4732_v28, %v336_v58 }
  0xcf   : > { %v434_v62 = vmul.f32 %v402_v61, %v402_v61  ;;  %v435_v33 = vmul.f32 %v403_v63, %v403_v63  ;;  %4047 = vmatmul.msk.bf16.gmra.mxu1 %vm778_vm0, %v736_v43  ;;  %v741_v63 = vpack.c.bf16 %v4705_v23, %v4702_v22 }
  0xd1   : > { %529 = vrot.lane.b32.xlu1 %v436_v59, %s4549_s23  ;;  %521 = vrot.lane.b32.xlu0 %v432_v60, %s4549_s23 }
  0xd2   : > { %525 = vrot.lane.b32.xlu2 %v434_v62, %s4549_s23  ;;  %4044 = vmatmul.msk.bf16.gmra.mxu0 %vm778_vm0, %v733_v42 }
  0xd3   : > { %4050 = vmatmul.msk.bf16.gmra.mxu2 %vm778_vm0, %v739_v45  ;;  %v745_v45 = vpack.c.bf16 %v4747_v31, %v4744_v30 }
  0xd4   : > { %v340_v32 = vpop.permute.xlu0 %339  ;;  %v342_v35 = vpop.permute.xlu1 %341 }
  0xd5   : > { %v405_v34 = vsub.f32 %v4744_v30, %v340_v32  ;;  %v406_v38 = vsub.f32 %v4747_v31, %v342_v35  ;;  %v744_v35 = vpack.c.bf16 %v4735_v29, %v4732_v28 }
  0xd7   : > { %v437_v37 = vmul.f32 %v405_v34, %v405_v34  ;;  %v438_v41 = vmul.f32 %v406_v38, %v406_v38 }
  0xd9   : > { %527 = vrot.lane.b32.xlu0 %v435_v33, %s4549_s23 }
  0xda   : > { %531 = vrot.lane.b32.xlu2 %v437_v37, %s4549_s23  ;;  %4055 = vmatmul.msk.bf16.gmra.mxu3 %vm778_vm0, %v744_v35 }
  0xdf   : > { %4048 = vmatmul.msk.bf16.gmra.mxu1 %vm778_vm0, %v737_v50 }
  0xe1   : > { %533 = vrot.lane.b32.xlu0 %v438_v41, %s4549_s23 }
  0xe3   : > { %v472_v44 = vpop.permute.xlu2 %471  ;;  %4051 = vmatmul.msk.bf16.gmra.mxu2 %vm778_vm0, %v740_v51 }
  0xe4   : > { %v568_v48 = vsel %vm567_vm1, %v472_v44, 0.0 }
  0xea   : > { %4056 = vmatmul.msk.bf16.gmra.mxu3 %vm778_vm0, %v745_v45 }
  0xec   : > { %v478_v47 = vpop.permute.xlu2 %477 }
  0xed   : > { %v577_v61 = vsel %vm567_vm1, %v478_v47, 0.0 }
  0xf3   : > { %4052 = vmatmul.msk.bf16.gmra.mxu2 %vm778_vm0, %v741_v63 }
  0xf4   : > { %v484_v52 = vpop.permute.xlu2 %483 }
  0xf5   : > { %v586_v26 = vsel %vm567_vm1, %v484_v52, 0.0 }
  0xfb   : > { %569 = vadd.xlane.f32.xlu1 %v568_v48  ;;  %v476_v49 = vpop.permute.xlu1 %475 }
  0xfc   : > { %v490_v57 = vpop.permute.xlu2 %489  ;;  %v574_v58 = vsel %vm567_vm1, %v476_v49, 0.0 }
  0xfd   : > { %v595_v37 = vsel %vm567_vm1, %v490_v57, 0.0 }
 0x103   : > { %v474_v53 = vpop.permute.xlu0 %473  ;;  %v482_v54 = vpop.permute.xlu1 %481 }
 0x104   : > { %v571_v55 = vsel %vm567_vm1, %v474_v53, 0.0  ;;  %v496_v27 = vpop.permute.xlu2 %495  ;;  %v583_v33 = vsel %vm567_vm1, %v482_v54, 0.0 }
 0x105   : > { %572 = vadd.xlane.f32.xlu2 %v571_v55  ;;  %v604_v43 = vsel %vm567_vm1, %v496_v27, 0.0 }
 0x10b   : > { %575 = vadd.xlane.f32.xlu0 %v574_v58  ;;  %v480_v59 = vpop.permute.xlu0 %479  ;;  %v488_v60 = vpop.permute.xlu1 %487 }
 0x10c   : > { %v580_v62 = vsel %vm567_vm1, %v480_v59, 0.0  ;;  %v592_v39 = vsel %vm567_vm1, %v488_v60, 0.0  ;;  %v502_v41 = vpop.permute.xlu2 %501 }
 0x10d   : > { %578 = vadd.xlane.f32.xlu2 %v577_v61  ;;  %581 = vadd.xlane.f32.xlu1 %v580_v62  ;;  %v613_v48 = vsel %vm567_vm1, %v502_v41, 0.0 }
 0x113   : > { %587 = vadd.xlane.f32.xlu0 %v586_v26  ;;  %v486_v32 = vpop.permute.xlu0 %485  ;;  %v494_v36 = vpop.permute.xlu1 %493 }
 0x114   : > { %v589_v34 = vsel %vm567_vm1, %v486_v32, 0.0  ;;  %v601_v29 = vsel %vm567_vm1, %v494_v36, 0.0  ;;  %v508_v46 = vpop.permute.xlu2 %507 }
 0x115   : > { %584 = vadd.xlane.f32.xlu2 %v583_v33  ;;  %590 = vadd.xlane.f32.xlu1 %v589_v34  ;;  %v622_v53 = vsel %vm567_vm1, %v508_v46, 0.0 }
 0x11b   : > { %596 = vadd.xlane.f32.xlu0 %v595_v37  ;;  %v492_v38 = vpop.permute.xlu0 %491  ;;  %v500_v42 = vpop.permute.xlu1 %499 }
 0x11c   : > { %v598_v40 = vsel %vm567_vm1, %v492_v38, 0.0  ;;  %v610_v50 = vsel %vm567_vm1, %v500_v42, 0.0  ;;  %v514_v52 = vpop.permute.xlu2 %513 }
 0x11d   : > { %593 = vadd.xlane.f32.xlu2 %v592_v39  ;;  %599 = vadd.xlane.f32.xlu1 %v598_v40  ;;  %v631_v56 = vsel %vm567_vm1, %v514_v52, 0.0  ;;  %v4911_v39 = vld [vmem:[%s8386_s2] sm:$0xff] }
 0x11e   : > { %v4916_v42 = vperm.slane %v4911_v39, 3 }
 0x11f   : > { %v4901_v26 = vpop.f32.mrf.mxu0 }
 0x120   : > { %v1113_v46 = vmul.f32 %v4916_v42, %v4609_v3  ;;  %v1116_v3 = vmul.f32 %v4916_v42, %v4604_v2  ;;  %v1119_v2 = vmul.f32 %v4916_v42, %v4627_v7  ;;  %v1122_v7 = vmul.f32 %v4916_v42, %v4642_v10 }
 0x123   : > { %605 = vadd.xlane.f32.xlu0 %v604_v43  ;;  %v498_v28 = vpop.permute.xlu0 %497  ;;  %v506_v47 = vpop.permute.xlu1 %505 }
 0x124   : > { %v607_v44 = vsel %vm567_vm1, %v498_v28, 0.0  ;;  %v619_v54 = vsel %vm567_vm1, %v506_v47, 0.0  ;;  %v520_v57 = vpop.permute.xlu2 %519  ;;  %v1114_v47 = vmul.f32 %v4916_v42, %v4594_v0  ;;  %v1117_v0 = vmul.f32 %v4916_v42, %v4615_v5 }
 0x125   : > { %602 = vadd.xlane.f32.xlu2 %v601_v29  ;;  %608 = vadd.xlane.f32.xlu1 %v607_v44  ;;  %v640_v62 = vsel %vm567_vm1, %v520_v57, 0.0  ;;  %v1120_v5 = vmul.f32 %v4916_v42, %v4630_v8  ;;  %v1123_v8 = vmul.f32 %v4916_v42, %v4645_v11  ;;  %v1125_v11 = vmul.f32 %v4916_v42, %v4657_v13 }
 0x127   : > { %v4913_v40 = vpop.f32.mrf.mxu0  ;;  %v1168_v57 = vsel %vm778_vm0, %v1120_v5, 0.0 }
 0x12b   : > { %614 = vadd.xlane.f32.xlu0 %v613_v48  ;;  %v504_v49 = vpop.permute.xlu0 %503  ;;  %v512_v31 = vpop.permute.xlu1 %511  ;;  %v1112_v48 = vmul.f32 %v4916_v42, %v4597_v1  ;;  %v1115_v1 = vmul.f32 %v4916_v42, %v4612_v4  ;;  %v1118_v4 = vmul.f32 %v4916_v42, %v4624_v6  ;;  %v1121_v6 = vmul.f32 %v4916_v42, %v4639_v9 }
 0x12c   : > { %v616_v51 = vsel %vm567_vm1, %v504_v49, 0.0  ;;  %v628_v59 = vsel %vm567_vm1, %v512_v31, 0.0  ;;  %v526_v33 = vpop.permute.xlu2 %525  ;;  %v1159_v31 = vsel %vm778_vm0, %v1117_v0, 0.0 }
 0x12d   : > { %611 = vadd.xlane.f32.xlu2 %v610_v50  ;;  %617 = vadd.xlane.f32.xlu1 %v616_v51  ;;  %v649_v35 = vsel %vm567_vm1, %v526_v33, 0.0  ;;  %v1147_v50 = vsel %vm778_vm0, %v1113_v46, 0.0  ;;  %v1150_v51 = vsel %vm778_vm0, %v1114_v47, 0.0  ;;  %v1144_v52 = vsel %vm778_vm0, %v1112_v48, 0.0 }
 0x12e   : > { %v1171_v10 = vsel %vm778_vm0, %v1121_v6, 0.0 }
 0x12f   : > { %v4927_v49 = vpop.f32.mrf.mxu0 }
 0x133   : > { %623 = vadd.xlane.f32.xlu0 %v622_v53  ;;  %v510_v30 = vpop.permute.xlu0 %509  ;;  %v518_v61 = vpop.permute.xlu1 %517  ;;  %v1156_v53 = vsel %vm778_vm0, %v1116_v3, 0.0 }
 0x134   : > { %v625_v55 = vsel %vm567_vm1, %v510_v30, 0.0  ;;  %v637_v27 = vsel %vm567_vm1, %v518_v61, 0.0  ;;  %v532_v41 = vpop.permute.xlu2 %531  ;;  %v1174_v61 = vsel %vm778_vm0, %v1122_v7, 0.0 }
 0x135   : > { %620 = vadd.xlane.f32.xlu2 %v619_v54  ;;  %626 = vadd.xlane.f32.xlu1 %v625_v55  ;;  %v658_v28 = vsel %vm567_vm1, %v532_v41, 0.0  ;;  %v1153_v54 = vsel %vm778_vm0, %v1115_v1, 0.0  ;;  %v4949_v55 = vpop.f32.mrf.mxu1 }
 0x137   : > { %v4939_v30 = vpop.f32.mrf.mxu0 }
 0x13b   : > { %632 = vadd.xlane.f32.xlu0 %v631_v56  ;;  %v516_v58 = vpop.permute.xlu0 %515  ;;  %v524_v34 = vpop.permute.xlu1 %523  ;;  %v1165_v56 = vsel %vm778_vm0, %v1119_v2, 0.0 }
 0x13c   : > { %v634_v60 = vsel %vm567_vm1, %v516_v58, 0.0  ;;  %v646_v37 = vsel %vm567_vm1, %v524_v34, 0.0  ;;  %v1162_v58 = vsel %vm778_vm0, %v1118_v4, 0.0  ;;  %v1126_v34 = vmul.f32 %v4916_v42, %v4660_v14 }
 0x13d   : > { %629 = vadd.xlane.f32.xlu2 %v628_v59  ;;  %635 = vadd.xlane.f32.xlu1 %v634_v60  ;;  %v4961_v60 = vperm.slane %v4911_v39, 0 }
 0x13e   : > { %v1186_v13 = vsel %vm778_vm0, %v1126_v34, 0.0 }
 0x13f   : > { %v846_v59 = vpop.f32.mrf.mxu0 }
 0x143   : > { %641 = vadd.xlane.f32.xlu0 %v640_v62  ;;  %v522_v63 = vpop.permute.xlu0 %521  ;;  %v530_v43 = vpop.permute.xlu1 %529 }
 0x144   : > { %v643_v32 = vsel %vm567_vm1, %v522_v63, 0.0  ;;  %v655_v44 = vsel %vm567_vm1, %v530_v43, 0.0  ;;  %v4966_v63 = vpop.f32.mrf.mxu1 }
 0x145   : > { %638 = vadd.xlane.f32.xlu2 %v637_v27  ;;  %644 = vadd.xlane.f32.xlu1 %v643_v32  ;;  %v1177_v27 = vsel %vm778_vm0, %v1123_v8, 0.0  ;;  %v4971_v32 = vperm.slane %v4911_v39, 1 }
 0x147   : > { %v848_v33 = vpop.f32.mrf.mxu0 }
 0x14b   : > { %650 = vadd.xlane.f32.xlu0 %v649_v35  ;;  %v528_v36 = vpop.permute.xlu0 %527  ;;  %v1124_v35 = vmul.f32 %v4916_v42, %v4654_v12  ;;  %v4993_v12 = vperm.slane %v4911_v39, 2 }
 0x14c   : > { %v652_v38 = vsel %vm567_vm1, %v528_v36, 0.0 }
 0x14d   : > { %647 = vadd.xlane.f32.xlu2 %v646_v37  ;;  %653 = vadd.xlane.f32.xlu1 %v652_v38  ;;  %v1183_v38 = vsel %vm778_vm0, %v1125_v11, 0.0  ;;  %v1180_v43 = vsel %vm778_vm0, %v1124_v35, 0.0 }
 0x14f   : > { %v851_v48 = vpop.f32.mrf.mxu0 }
 0x153   : > { %659 = vadd.xlane.f32.xlu0 %v658_v28  ;;  %v534_v29 = vpop.permute.xlu0 %533 }
 0x154   : > { %v661_v45 = vsel %vm567_vm1, %v534_v29, 0.0  ;;  %v4990_v29 = vpop.f32.mrf.mxu1 }
 0x155   : > { %656 = vadd.xlane.f32.xlu2 %v655_v44  ;;  %662 = vadd.xlane.f32.xlu1 %v661_v45 }
 0x15b   : > { %1148 = vadd.xlane.f32.xlu0 %v1147_v50 }
 0x15c   : > { %v5017_v2 = vpop.f32.mrf.mxu1 }
 0x15d   : > { %1151 = vadd.xlane.f32.xlu1 %v1150_v51  ;;  %1145 = vadd.xlane.f32.xlu2 %v1144_v52 }
 0x163   : > { %1157 = vadd.xlane.f32.xlu0 %v1156_v53 }
 0x165   : > { %1160 = vadd.xlane.f32.xlu1 %v1159_v31  ;;  %1154 = vadd.xlane.f32.xlu2 %v1153_v54 }
 0x16b   : > { %1166 = vadd.xlane.f32.xlu0 %v1165_v56 }
 0x16d   : > { %1169 = vadd.xlane.f32.xlu1 %v1168_v57  ;;  %1163 = vadd.xlane.f32.xlu2 %v1162_v58 }
 0x16e   : > { %v4964_v62 = vpop.xlane.xlu1 %569 }
 0x16f   : > { %v665_v9 = vmul.f32 %v4961_v60, %v4964_v62 }
 0x171   : > { %v698_v36 = vadd.f32 %v4971_v32, %v665_v9  ;;  %v853_v9 = vpop.f32.mrf.mxu0 }
 0x173   : > { %1175 = vadd.xlane.f32.xlu0 %v1174_v61  ;;  %v916_v14 = vadd.f32 %v4901_v26, %v698_v36 }
 0x175   : > { %1178 = vadd.xlane.f32.xlu1 %v1177_v27  ;;  %1172 = vadd.xlane.f32.xlu2 %v1171_v10  ;;  %v949_v52 = vmul.f32 %v4993_v12, %v916_v14 }
 0x177   : > { %v982_v54 = vsel %vm981_vm2, %v949_v52, 0.0 }
 0x178   : > { %v4982_v37 = vpop.xlane.xlu2 %572 }
 0x179   : > { %v666_v41 = vmul.f32 %v4961_v60, %v4982_v37 }
 0x17b   : > { %v699_v28 = vadd.f32 %v4971_v32, %v666_v41  ;;  %1184 = vadd.xlane.f32.xlu0 %v1183_v38 }
 0x17d   : > { %1187 = vadd.xlane.f32.xlu1 %v1186_v13  ;;  %1181 = vadd.xlane.f32.xlu2 %v1180_v43  ;;  %v917_v44 = vadd.f32 %v4913_v40, %v699_v28  ;;  %v866_v43 = vpop.f32.mrf.mxu1 }
 0x17e   : > { %v4997_v45 = vpop.xlane.xlu0 %575 }
 0x17f   : > { %8475 = vst [vmem:[#allocation2_spill] sm:$0xff] %v4997_v45  ;;  %v667_v46 = vmul.f32 %v4961_v60, %v4997_v45  ;;  %v950_v47 = vmul.f32 %v4993_v12, %v917_v44 }
 0x180   : > { %v5002_v50 = vpop.xlane.xlu2 %578  ;;  %v5004_v51 = vpop.xlane.xlu1 %581 }
 0x181   : > { %8476 = vst [vmem:[#allocation3_spill] sm:$0xff] %v5002_v50  ;;  %v700_v26 = vadd.f32 %v4971_v32, %v667_v46  ;;  %v668_v40 = vmul.f32 %v4961_v60, %v5002_v50  ;;  %v669_v3 = vmul.f32 %v4961_v60, %v5004_v51  ;;  %v985_v0 = vsel %vm981_vm2, %v950_v47, 0.0 }
 0x182   : > { %8477 = vst [vmem:[#allocation4_spill] sm:$0xff] %v5004_v51 }
 0x183   : > { %v701_v1 = vadd.f32 %v4971_v32, %v668_v40  ;;  %v702_v53 = vadd.f32 %v4971_v32, %v669_v3  ;;  %986 = vadd.xlane.f32.xlu0 %v985_v0  ;;  %v918_v31 = vadd.f32 %v4927_v49, %v700_v26 }
 0x185   : > { %983 = vadd.xlane.f32.xlu2 %v982_v54  ;;  %v951_v5 = vmul.f32 %v4993_v12, %v918_v31  ;;  %v920_v4 = vadd.f32 %v846_v59, %v702_v53  ;;  %v919_v56 = vadd.f32 %v4939_v30, %v701_v1 }
 0x186   : > { %v5021_v57 = vpop.xlane.xlu0 %587 }
 0x187   : > { %8478 = vst [vmem:[#allocation5_spill] sm:$0xff] %v5021_v57  ;;  %v671_v58 = vmul.f32 %v4961_v60, %v5021_v57  ;;  %v988_v7 = vsel %vm981_vm2, %v951_v5, 0.0  ;;  %v953_v8 = vmul.f32 %v4993_v12, %v920_v4  ;;  %v952_v61 = vmul.f32 %v4993_v12, %v919_v56 }
 0x188   : > { %v5027_v49 = vpop.xlane.xlu2 %584  ;;  %v5029_v6 = vpop.xlane.xlu1 %590  ;;  %989 = vadd.xlane.f32.xlu1 %v988_v7 }
 0x189   : > { %8479 = vst [vmem:[#allocation6_spill] sm:$0xff] %v5027_v49  ;;  %v704_v59 = vadd.f32 %v4971_v32, %v671_v58  ;;  %v670_v30 = vmul.f32 %v4961_v60, %v5027_v49  ;;  %v672_v27 = vmul.f32 %v4961_v60, %v5029_v6  ;;  %v994_v10 = vsel %vm981_vm2, %v953_v8, 0.0 }
 0x18a   : > { %8480 = vst [vmem:[#allocation7_spill] sm:$0xff] %v5029_v6  ;;  %v991_v35 = vsel %vm981_vm2, %v952_v61, 0.0 }
 0x18b   : > { %v703_v11 = vadd.f32 %v4971_v32, %v670_v30  ;;  %995 = vadd.xlane.f32.xlu0 %v994_v10  ;;  %v705_v34 = vadd.f32 %v4971_v32, %v672_v27  ;;  %v922_v36 = vadd.f32 %v851_v48, %v704_v59  ;;  %v5076_v59 = vpop.f32.mrf.mxu2  ;;  %v868_v10 = vpop.f32.mrf.mxu1 }
 0x18d   : > { %992 = vadd.xlane.f32.xlu2 %v991_v35  ;;  %v923_v38 = vadd.f32 %v853_v9, %v705_v34  ;;  %v921_v41 = vadd.f32 %v848_v33, %v703_v11  ;;  %v955_v52 = vmul.f32 %v4993_v12, %v922_v36 }
 0x18e   : > { %v5041_v13 = vpop.xlane.xlu0 %596 }
 0x18f   : > { %8481 = vst [vmem:[#allocation8_spill] sm:$0xff] %v5041_v13  ;;  %v674_v28 = vmul.f32 %v4961_v60, %v5041_v13  ;;  %v954_v14 = vmul.f32 %v4993_v12, %v921_v41  ;;  %v956_v44 = vmul.f32 %v4993_v12, %v923_v38  ;;  %v1000_v53 = vsel %vm981_vm2, %v955_v52, 0.0 }
 0x190   : > { %v5047_v46 = vpop.xlane.xlu2 %593  ;;  %v5049_v47 = vpop.xlane.xlu1 %599 }
 0x191   : > { %8482 = vst [vmem:[#allocation9_spill] sm:$0xff] %v5047_v46  ;;  %v707_v48 = vadd.f32 %v4971_v32, %v674_v28  ;;  %v673_v33 = vmul.f32 %v4961_v60, %v5047_v46  ;;  %v675_v26 = vmul.f32 %v4961_v60, %v5049_v47  ;;  %v997_v40 = vsel %vm981_vm2, %v954_v14, 0.0 }
 0x192   : > { %8483 = vst [vmem:[#allocation10_spill] sm:$0xff] %v5049_v47  ;;  %998 = vadd.xlane.f32.xlu1 %v997_v40  ;;  %v1003_v3 = vsel %vm981_vm2, %v956_v44, 0.0 }
 0x193   : > { %v706_v0 = vadd.f32 %v4971_v32, %v673_v33  ;;  %v708_v1 = vadd.f32 %v4971_v32, %v675_v26  ;;  %1004 = vadd.xlane.f32.xlu0 %v1003_v3  ;;  %v925_v31 = vadd.f32 %v4966_v63, %v707_v48  ;;  %v5102_v40 = vpop.f32.mrf.mxu2  ;;  %v5104_v3 = vpop.f32.mrf.mxu3 }
 0x195   : > { %1001 = vadd.xlane.f32.xlu2 %v1000_v53  ;;  %v924_v54 = vadd.f32 %v4949_v55, %v706_v0  ;;  %v926_v5 = vadd.f32 %v4990_v29, %v708_v1  ;;  %v958_v63 = vmul.f32 %v4993_v12, %v925_v31  ;;  %v871_v1 = vpop.f32.mrf.mxu1  ;;  %v1128_v31 = vmul.f32 %v4916_v42, %v4672_v16 }
 0x196   : > { %v5065_v4 = vpop.xlane.xlu0 %605 }
 0x197   : > { %8484 = vst [vmem:[#allocation11_spill] sm:$0xff] %v5065_v4  ;;  %v677_v56 = vmul.f32 %v4961_v60, %v5065_v4  ;;  %v957_v58 = vmul.f32 %v4993_v12, %v924_v54  ;;  %v959_v7 = vmul.f32 %v4993_v12, %v926_v5  ;;  %v1009_v35 = vsel %vm981_vm2, %v958_v63, 0.0 }
 0x198   : > { %v5071_v8 = vpop.xlane.xlu2 %602  ;;  %v5073_v61 = vpop.xlane.xlu1 %608 }
 0x199   : > { %8485 = vst [vmem:[#allocation12_spill] sm:$0xff] %v5071_v8  ;;  %v710_v55 = vadd.f32 %v4971_v32, %v677_v56  ;;  %v676_v29 = vmul.f32 %v4961_v60, %v5071_v8  ;;  %v678_v30 = vmul.f32 %v4961_v60, %v5073_v61  ;;  %v1006_v27 = vsel %vm981_vm2, %v957_v58, 0.0 }
 0x19a   : > { %8486 = vst [vmem:[#allocation13_spill] sm:$0xff] %v5073_v61  ;;  %1007 = vadd.xlane.f32.xlu1 %v1006_v27  ;;  %v1012_v9 = vsel %vm981_vm2, %v959_v7, 0.0  ;;  %v1127_v56 = vmul.f32 %v4916_v42, %v4669_v15  ;;  %v1131_v15 = vmul.f32 %v4916_v42, %v4687_v19 }
 0x19b   : > { %v709_v11 = vadd.f32 %v4971_v32, %v676_v29  ;;  %v711_v34 = vadd.f32 %v4971_v32, %v678_v30  ;;  %1013 = vadd.xlane.f32.xlu0 %v1012_v9  ;;  %v928_v36 = vadd.f32 %v866_v43, %v710_v55  ;;  %v1192_v55 = vsel %vm778_vm0, %v1128_v31, 0.0  ;;  %v5126_v27 = vpop.f32.mrf.mxu2 }
 0x19c   : > { %v1189_v16 = vsel %vm778_vm0, %v1127_v56, 0.0  ;;  %v1129_v30 = vmul.f32 %v4916_v42, %v4675_v17  ;;  %v1201_v17 = vsel %vm778_vm0, %v1131_v15, 0.0 }
 0x19d   : > { %1010 = vadd.xlane.f32.xlu2 %v1009_v35  ;;  %v927_v38 = vadd.f32 %v5017_v2, %v709_v11  ;;  %v929_v41 = vadd.f32 %v868_v10, %v711_v34  ;;  %v961_v33 = vmul.f32 %v4993_v12, %v928_v36  ;;  %v5128_v10 = vpop.f32.mrf.mxu3  ;;  %v1130_v11 = vmul.f32 %v4916_v42, %v4684_v18 }
 0x19e   : > { %v5089_v28 = vpop.xlane.xlu0 %614  ;;  %v1195_v34 = vsel %vm778_vm0, %v1129_v30, 0.0 }
 0x19f   : > { %8487 = vst [vmem:[#allocation14_spill] sm:$0xff] %v5089_v28  ;;  %v960_v14 = vmul.f32 %v4993_v12, %v927_v38  ;;  %v962_v44 = vmul.f32 %v4993_v12, %v929_v41  ;;  %v1018_v53 = vsel %vm981_vm2, %v961_v33, 0.0  ;;  %v1198_v19 = vsel %vm778_vm0, %v1130_v11, 0.0  ;;  %v4535_v11 = vld [vmem:[%s4591_s21 + $0xd8] sm:$0xff] }
 0x1a0   : > { %v5093_v52 = vpop.xlane.xlu2 %611  ;;  %v5095_v48 = vpop.xlane.xlu1 %617  ;;  %v1132_v38 = vmul.f32 %v4916_v42, %v4690_v20  ;;  %v1134_v41 = vmul.f32 %v4916_v42, %v4702_v22 }
 0x1a1   : > { %8488 = vst [vmem:[#allocation15_spill] sm:$0xff] %v5093_v52  ;;  %v679_v26 = vmul.f32 %v4961_v60, %v5093_v52  ;;  %v1015_v43 = vsel %vm981_vm2, %v960_v14, 0.0  ;;  %v1021_v2 = vsel %vm981_vm2, %v962_v44, 0.0  ;;  %v1133_v14 = vmul.f32 %v4916_v42, %v4699_v21 }
 0x1a2   : > { %8489 = vst [vmem:[#allocation16_spill] sm:$0xff] %v5095_v48  ;;  %1016 = vadd.xlane.f32.xlu1 %v1015_v43  ;;  %v1210_v20 = vsel %vm778_vm0, %v1134_v41, 0.0  ;;  %v1135_v21 = vmul.f32 %v4916_v42, %v4705_v23 }
 0x1a3   : > { %v712_v0 = vadd.f32 %v4971_v32, %v679_v26  ;;  %1022 = vadd.xlane.f32.xlu0 %v1021_v2  ;;  %v5149_v44 = vpop.f32.mrf.mxu2  ;;  %v1204_v26 = vsel %vm778_vm0, %v1132_v38, 0.0  ;;  %v1207_v22 = vsel %vm778_vm0, %v1133_v14, 0.0  ;;  %v680_v14 = vmul.f32 %v4961_v60, %v5089_v28 }
 0x1a4   : > { %v1213_v31 = vsel %vm778_vm0, %v1135_v21, 0.0  ;;  %v4536_v21 = vld [vmem:[%s4591_s21 + $0xe8] sm:$0xff] }
 0x1a5   : > { %1019 = vadd.xlane.f32.xlu2 %v1018_v53  ;;  %v930_v54 = vadd.f32 %v871_v1, %v712_v0  ;;  %v5151_v33 = vpop.f32.mrf.mxu3  ;;  %v1137_v0 = vmul.f32 %v4916_v42, %v4717_v25  ;;  %v1136_v53 = vmul.f32 %v4916_v42, %v4714_v24 }
 0x1a6   : > { %v5110_v5 = vpop.xlane.xlu0 %623 }
 0x1a7   : > { %8490 = vst [vmem:[#allocation17_spill] sm:$0xff] %v5110_v5  ;;  %v963_v58 = vmul.f32 %v4993_v12, %v930_v54  ;;  %v1216_v25 = vsel %vm778_vm0, %v1136_v53, 0.0  ;;  %v681_v53 = vmul.f32 %v4961_v60, %v5095_v48 }
 0x1a8   : > { %v5115_v7 = vpop.xlane.xlu2 %620  ;;  %v5117_v63 = vpop.xlane.xlu1 %626 }
 0x1a9   : > { %8491 = vst [vmem:[#allocation18_spill] sm:$0xff] %v5115_v7  ;;  %v1024_v29 = vsel %vm981_vm2, %v963_v58, 0.0  ;;  %v1219_v58 = vsel %vm778_vm0, %v1137_v0, 0.0  ;;  %v1141_v0 = vmul.f32 %v4536_v21, %v4916_v42 }
 0x1aa   : > { %8492 = vst [vmem:[#allocation19_spill] sm:$0xff] %v5117_v63  ;;  %1025 = vadd.xlane.f32.xlu1 %v1024_v29  ;;  %v4533_v29 = vld [vmem:[%s4591_s21 + $0xd0] sm:$0xff] }
 0x1ab   : > { %1193 = vadd.xlane.f32.xlu0 %v1192_v55  ;;  %v5174_v23 = vpop.f32.mrf.mxu2  ;;  %v1138_v24 = vmul.f32 %v4533_v29, %v4916_v42  ;;  %v713_v29 = vadd.f32 %v4971_v32, %v680_v14  ;;  %v1231_v21 = vsel %vm778_vm0, %v1141_v0, 0.0  ;;  %v5219_v14 = vperm.slane %v4911_v39, 5 }
 0x1ad   : > { %1190 = vadd.xlane.f32.xlu2 %v1189_v16  ;;  %v5176_v55 = vpop.f32.mrf.mxu3  ;;  %v4534_v16 = vld [vmem:[%s4591_s21 + $0xe0] sm:$0xff]  ;;  %8505 = vst [vmem:[#allocation32_spill] sm:$0xff] %v5219_v14 }
 0x1ae   : > { %v5130_v9 = vpop.xlane.xlu0 %632  ;;  %v1140_v30 = vmul.f32 %v4534_v16, %v4916_v42  ;;  %v873_v16 = vpop.f32.mrf.mxu1 }
 0x1af   : > { %8493 = vst [vmem:[#allocation20_spill] sm:$0xff] %v5130_v9  ;;  %v931_v28 = vadd.f32 %v873_v16, %v713_v29 }
 0x1b0   : > { %v5135_v35 = vpop.xlane.xlu2 %629  ;;  %v5137_v36 = vpop.xlane.xlu1 %635  ;;  %v1228_v41 = vsel %vm778_vm0, %v1140_v30, 0.0 }
 0x1b1   : > { %8494 = vst [vmem:[#allocation21_spill] sm:$0xff] %v5135_v35 }
 0x1b2   : > { %8495 = vst [vmem:[#allocation22_spill] sm:$0xff] %v5137_v36  ;;  %1196 = vadd.xlane.f32.xlu1 %v1195_v34  ;;  %v1139_v34 = vmul.f32 %v4535_v11, %v4916_v42  ;;  %v684_v11 = vmul.f32 %v4961_v60, %v5117_v63 }
 0x1b3   : > { %1202 = vadd.xlane.f32.xlu0 %v1201_v17  ;;  %v1222_v17 = vsel %vm778_vm0, %v1138_v24, 0.0  ;;  %v683_v24 = vmul.f32 %v4961_v60, %v5110_v5 }
 0x1b4   : > { %v717_v48 = vadd.f32 %v4971_v32, %v684_v11 }
 0x1b5   : > { %1199 = vadd.xlane.f32.xlu2 %v1198_v19  ;;  %v716_v63 = vadd.f32 %v4971_v32, %v683_v24  ;;  %v964_v24 = vmul.f32 %v4993_v12, %v931_v28 }
 0x1b6   : > { %v5145_v18 = vpop.xlane.xlu0 %641 }
 0x1b7   : > { %8496 = vst [vmem:[#allocation23_spill] sm:$0xff] %v5145_v18  ;;  %v934_v16 = vadd.f32 %v5126_v27, %v716_v63 }
 0x1b8   : > { %v5154_v43 = vpop.xlane.xlu2 %638  ;;  %v5156_v2 = vpop.xlane.xlu1 %644 }
 0x1b9   : > { %8497 = vst [vmem:[#allocation24_spill] sm:$0xff] %v5154_v43 }
 0x1ba   : > { %8498 = vst [vmem:[#allocation25_spill] sm:$0xff] %v5156_v2  ;;  %1205 = vadd.xlane.f32.xlu1 %v1204_v26  ;;  %v682_v26 = vmul.f32 %v4961_v60, %v5115_v7 }
 0x1bb   : > { %1211 = vadd.xlane.f32.xlu0 %v1210_v20  ;;  %v1225_v20 = vsel %vm778_vm0, %v1139_v34, 0.0 }
 0x1bc   : > { %v715_v30 = vadd.f32 %v4971_v32, %v682_v26 }
 0x1bd   : > { %1208 = vadd.xlane.f32.xlu2 %v1207_v22  ;;  %v5198_v22 = vpop.f32.mrf.mxu2 }
 0x1be   : > { %v5164_v1 = vpop.xlane.xlu0 %650  ;;  %v933_v39 = vadd.f32 %v5102_v40, %v715_v30  ;;  %v935_v30 = vadd.f32 %v5149_v44, %v717_v48  ;;  %v1027_v48 = vsel %vm981_vm2, %v964_v24, 0.0  ;;  %v967_v44 = vmul.f32 %v4993_v12, %v934_v16 }
 0x1bf   : > { %8499 = vst [vmem:[#allocation26_spill] sm:$0xff] %v5164_v1 }
 0x1c0   : > { %v5169_v54 = vpop.xlane.xlu2 %647  ;;  %v5171_v56 = vpop.xlane.xlu1 %653  ;;  %v966_v40 = vmul.f32 %v4993_v12, %v933_v39 }
 0x1c1   : > { %8500 = vst [vmem:[#allocation27_spill] sm:$0xff] %v5169_v54 }
 0x1c2   : > { %8501 = vst [vmem:[#allocation28_spill] sm:$0xff] %v5171_v56  ;;  %1214 = vadd.xlane.f32.xlu1 %v1213_v31  ;;  %v5204_v31 = vpop.f32.mrf.mxu3 }
 0x1c3   : > { %1220 = vadd.xlane.f32.xlu0 %v1219_v58  ;;  %v4537_v58 = vld [vmem:[%s4591_s21 + $0xf8] sm:$0xff] }
 0x1c5   : > { %1217 = vadd.xlane.f32.xlu2 %v1216_v25  ;;  %v1143_v25 = vmul.f32 %v4537_v58, %v4916_v42  ;;  %v714_v58 = vadd.f32 %v4971_v32, %v681_v53  ;;  %v891_v29 = vpop.f32.mrf.mxu2 }
 0x1c6   : > { %v5183_v15 = vpop.xlane.xlu0 %659 }
 0x1c7   : > { %8502 = vst [vmem:[#allocation29_spill] sm:$0xff] %v5183_v15  ;;  %v1237_v26 = vsel %vm778_vm0, %v1143_v25, 0.0  ;;  %v932_v25 = vadd.f32 %v5076_v59, %v714_v58 }
 0x1c8   : > { %v5188_v19 = vpop.xlane.xlu2 %656  ;;  %v5190_v38 = vpop.xlane.xlu1 %662 }
 0x1c9   : > { %8503 = vst [vmem:[#allocation30_spill] sm:$0xff] %v5188_v19 }
 0x1ca   : > { %8504 = vst [vmem:[#allocation31_spill] sm:$0xff] %v5190_v38  ;;  %1223 = vadd.xlane.f32.xlu1 %v1222_v17  ;;  %v4538_v17 = vld [vmem:[%s4591_s21 + $0xf0] sm:$0xff] }
 0x1cb   : > { %1229 = vadd.xlane.f32.xlu0 %v1228_v41  ;;  %v1142_v41 = vmul.f32 %v4538_v17, %v4916_v42  ;;  %v685_v42 = vmul.f32 %v4961_v60, %v5135_v35  ;;  %v5235_v17 = vpop.f32.mrf.mxu3 }
 0x1cd   : > { %1226 = vadd.xlane.f32.xlu2 %v1225_v20  ;;  %v1234_v0 = vsel %vm778_vm0, %v1142_v41, 0.0  ;;  %v718_v11 = vadd.f32 %v4971_v32, %v685_v42 }
 0x1ce   : > { %v1149_v34 = vpop.xlane.xlu0 %1148 }
 0x1cf   : > { %v1241_v5 = vmul.f32 %v1149_v34, %v4982_v37  ;;  %v936_v39 = vadd.f32 %v5174_v23, %v718_v11  ;;  %v689_v23 = vmul.f32 %v4961_v60, %v5145_v18 }
 0x1d0   : > { %v1152_v20 = vpop.xlane.xlu1 %1151  ;;  %v1146_v7 = vpop.xlane.xlu2 %1145 }
 0x1d1   : > { %v1274_v53 = vadd.f32 %v5219_v14, %v1241_v5  ;;  %v1242_v34 = vmul.f32 %v1152_v20, %v4997_v45  ;;  %v686_v5 = vmul.f32 %v4961_v60, %v5130_v9  ;;  %v1240_v59 = vmul.f32 %v1146_v7, %v4964_v62 }
 0x1d2   : > { %1232 = vadd.xlane.f32.xlu1 %v1231_v21  ;;  %v965_v20 = vmul.f32 %v4993_v12, %v932_v25  ;;  %v688_v7 = vmul.f32 %v4961_v60, %v5154_v43 }
 0x1d3   : > { %1238 = vadd.xlane.f32.xlu0 %v1237_v26  ;;  %v4090_v21 = vmul.f32 -1.442695, %v1274_v53  ;;  %v1275_v58 = vadd.f32 %v5219_v14, %v1242_v34  ;;  %v687_v26 = vmul.f32 %v4961_v60, %v5137_v36  ;;  %v968_v53 = vmul.f32 %v4993_v12, %v935_v30 }
 0x1d4   : > { %v719_v34 = vadd.f32 %v4971_v32, %v686_v5  ;;  %v1273_v25 = vadd.f32 %v5219_v14, %v1240_v59  ;;  %v1036_v5 = vsel %vm981_vm2, %v967_v44, 0.0  ;;  %v969_v59 = vmul.f32 %v4993_v12, %v936_v39 }
 0x1d5   : > { %1235 = vadd.xlane.f32.xlu2 %v1234_v0  ;;  %v1033_v0 = vsel %vm981_vm2, %v966_v40, 0.0  ;;  %4149 = vpow2.f32 %v4090_v21  ;;  %v4091_v24 = vmul.f32 -1.442695, %v1275_v58  ;;  %v721_v40 = vadd.f32 %v4971_v32, %v688_v7  ;;  %v893_v58 = vpop.f32.mrf.mxu2 }
 0x1d6   : > { %v1158_v41 = vpop.xlane.xlu0 %1157  ;;  %v1039_v21 = vsel %vm981_vm2, %v968_v53, 0.0  ;;  %v692_v7 = vmul.f32 %v4961_v60, %v5164_v1  ;;  %v722_v53 = vadd.f32 %v4971_v32, %v689_v23  ;;  %v1042_v1 = vsel %vm981_vm2, %v969_v59, 0.0 }
 0x1d7   : > { %v1244_v28 = vmul.f32 %v1158_v41, %v5004_v51  ;;  %4151 = vpow2.f32 %v4091_v24  ;;  %v696_v59 = vmul.f32 %v4961_v60, %v5190_v38 }
 0x1d8   : > { %v1161_v63 = vpop.xlane.xlu1 %1160  ;;  %v1155_v27 = vpop.xlane.xlu2 %1154  ;;  %v725_v23 = vadd.f32 %v4971_v32, %v692_v7 }
 0x1d9   : > { %v1245_v42 = vmul.f32 %v1161_v63, %v5027_v49  ;;  %v1243_v41 = vmul.f32 %v1155_v27, %v5002_v50  ;;  %v1277_v16 = vadd.f32 %v5219_v14, %v1244_v28  ;;  %v1030_v63 = vsel %vm981_vm2, %v965_v20, 0.0 }
 0x1da   : > { %1028 = vadd.xlane.f32.xlu1 %v1027_v48  ;;  %v720_v48 = vadd.f32 %v4971_v32, %v687_v26  ;;  %v4089_v28 = vmul.f32 -1.442695, %v1273_v25  ;;  %v937_v26 = vadd.f32 %v5198_v22, %v719_v34  ;;  %v691_v25 = vmul.f32 %v4961_v60, %v5169_v54 }
 0x1db   : > { %1034 = vadd.xlane.f32.xlu0 %v1033_v0  ;;  %v1278_v11 = vadd.f32 %v5219_v14, %v1245_v42  ;;  %v1276_v27 = vadd.f32 %v5219_v14, %v1243_v41  ;;  %v690_v42 = vmul.f32 %v4961_v60, %v5156_v2  ;;  %v911_v0 = vpop.f32.mrf.mxu3  ;;  %v4093_v44 = vmul.f32 -1.442695, %v1277_v16 }
 0x1dc   : > { %v938_v39 = vadd.f32 %v891_v29, %v720_v48  ;;  %v693_v22 = vmul.f32 %v4961_v60, %v5171_v56  ;;  %v695_v34 = vmul.f32 %v4961_v60, %v5183_v15  ;;  %v694_v29 = vmul.f32 %v4961_v60, %v5188_v19 }
 0x1dd   : > { %1031 = vadd.xlane.f32.xlu2 %v1030_v63  ;;  %v4094_v41 = vmul.f32 -1.442695, %v1278_v11  ;;  %v4150_v63 = vpop.eup %4149  ;;  %4153 = vpow2.f32 %v4089_v28  ;;  %v4092_v24 = vmul.f32 -1.442695, %v1276_v27  ;;  %v723_v48 = vadd.f32 %v4971_v32, %v690_v42 }
 0x1de   : > { %v1167_v30 = vpop.xlane.xlu0 %1166  ;;  %4155 = vpow2.f32 %v4093_v44  ;;  %v4152_v28 = vpop.eup %4151  ;;  %v726_v27 = vadd.f32 %v4971_v32, %v693_v22  ;;  %v727_v7 = vadd.f32 %v4971_v32, %v694_v29  ;;  %v940_v44 = vadd.f32 %v5104_v3, %v722_v53 }
 0x1df   : > { %v1247_v20 = vmul.f32 %v1167_v30, %v5029_v6  ;;  %v939_v30 = vadd.f32 %v893_v58, %v721_v40  ;;  %v970_v40 = vmul.f32 %v4993_v12, %v937_v26  ;;  %v5292_v58 = vadd.f32 1.0, %v4150_v63 }
 0x1e0   : > { %v1170_v11 = vpop.xlane.xlu1 %1169  ;;  %4157 = vpow2.f32 %v4094_v41  ;;  %v971_v60 = vmul.f32 %v4993_v12, %v938_v39  ;;  %v941_v41 = vadd.f32 %v5128_v10, %v723_v48  ;;  %v943_v63 = vadd.f32 %v5176_v55, %v725_v23 }
 0x1e1   : > { %v1280_v16 = vadd.f32 %v5219_v14, %v1247_v20  ;;  %v728_v20 = vadd.f32 %v4971_v32, %v695_v34  ;;  %4159 = vpow2.f32 %v4092_v24  ;;  %v1248_v26 = vmul.f32 %v1170_v11, %v5047_v46 }
 0x1e2   : > { %1037 = vadd.xlane.f32.xlu1 %v1036_v5  ;;  %v724_v5 = vadd.f32 %v4971_v32, %v691_v25  ;;  %v1164_v25 = vpop.xlane.xlu2 %1163  ;;  %4161 = vrcp.f32 %v5292_v58  ;;  %v5305_v22 = vadd.f32 1.0, %v4152_v28  ;;  %v729_v34 = vadd.f32 %v4971_v32, %v696_v59 }
 0x1e3   : > { %1043 = vadd.xlane.f32.xlu0 %v1042_v1  ;;  %v972_v1 = vmul.f32 %v4993_v12, %v939_v30  ;;  %v4096_v42 = vmul.f32 -1.442695, %v1280_v16  ;;  %v4154_v30 = vpop.eup %4153  ;;  %v946_v3 = vadd.f32 %v911_v0, %v728_v20  ;;  %v913_v53 = vpop.f32.mrf.mxu3  ;;  %v944_v10 = vadd.f32 %v5204_v31, %v726_v27 }
 0x1e4   : > { %v942_v29 = vadd.f32 %v5151_v33, %v724_v5  ;;  %v4156_v24 = vpop.eup %4155  ;;  %v1281_v55 = vadd.f32 %v5219_v14, %v1248_v26  ;;  %v1246_v48 = vmul.f32 %v1164_v25, %v5021_v57  ;;  %v973_v23 = vmul.f32 %v4993_v12, %v940_v44 }
 0x1e5   : > { %1040 = vadd.xlane.f32.xlu2 %v1039_v21  ;;  %v1045_v21 = vsel %vm981_vm2, %v970_v40, 0.0  ;;  %4163 = vpow2.f32 %v4096_v42  ;;  %v1051_v39 = vsel %vm981_vm2, %v972_v1, 0.0  ;;  %v945_v32 = vadd.f32 %v5235_v17, %v727_v7 }
 0x1e6   : > { %v4158_v16 = vpop.eup %4157  ;;  %v5315_v33 = vadd.f32 1.0, %v4154_v30  ;;  %v1048_v0 = vsel %vm981_vm2, %v971_v60, 0.0  ;;  %v974_v11 = vmul.f32 %v4993_v12, %v941_v41  ;;  %v976_v40 = vmul.f32 %v4993_v12, %v943_v63  ;;  %v1176_v28 = vpop.xlane.xlu0 %1175 }
 0x1e7   : > { %v4160_v5 = vpop.eup %4159  ;;  %4165 = vrcp.f32 %v5305_v22  ;;  %v947_v31 = vadd.f32 %v913_v53, %v729_v34  ;;  %v5321_v59 = vadd.f32 1.0, %v4156_v24  ;;  %v975_v1 = vmul.f32 %v4993_v12, %v942_v29 }
 0x1e8   : > { %v979_v17 = vmul.f32 %v4993_v12, %v946_v3  ;;  %v5325_v27 = vadd.f32 1.0, %v4158_v16  ;;  %v1179_v20 = vpop.xlane.xlu1 %1178  ;;  %v977_v42 = vmul.f32 %v4993_v12, %v944_v10  ;;  %v5328_v7 = vpop.eup %4161  ;;  %v4097_v26 = vmul.f32 -1.442695, %v1281_v55 }
 0x1e9   : > { %v1279_v44 = vadd.f32 %v5219_v14, %v1246_v48  ;;  %v1054_v60 = vsel %vm981_vm2, %v973_v23, 0.0  ;;  %v978_v25 = vmul.f32 %v4993_v12, %v945_v32  ;;  %4167 = vrcp.f32 %v5315_v33 }
 0x1ea   : > { %1046 = vadd.xlane.f32.xlu1 %v1045_v21  ;;  %v5334_v41 = vadd.f32 1.0, %v4160_v5  ;;  %v1057_v63 = vsel %vm981_vm2, %v974_v11, 0.0  ;;  %v1063_v30 = vsel %vm981_vm2, %v976_v40, 0.0  ;;  %v2067_v34 = vand.u32 2147483648, %v5292_v58  ;;  %v1173_v55 = vpop.xlane.xlu2 %1172 }
 0x1eb   : > { %1052 = vadd.xlane.f32.xlu0 %v1051_v39  ;;  %v4164_v21 = vpop.eup %4163  ;;  %v980_v29 = vmul.f32 %v4993_v12, %v947_v31  ;;  %4169 = vrcp.f32 %v5321_v59  ;;  %v1060_v24 = vsel %vm981_vm2, %v975_v1, 0.0  ;;  %v2057_v3 = vmul.f32 %v5328_v7, %v5292_v58 }
 0x1ec   : > { %4171 = vrcp.f32 %v5325_v27  ;;  %v1066_v53 = vsel %vm981_vm2, %v977_v42, 0.0  ;;  %v5347_v39 = vsel %vm981_vm2, %v979_v17, 0.0  ;;  %v5351_v16 = vadd.f32 1.0, %v4164_v21 }
 0x1ed   : > { %1049 = vadd.xlane.f32.xlu2 %v1048_v0  ;;  %v5349_v10 = vpop.eup %4165  ;;  %4173 = vpow2.f32 %v4097_v26  ;;  %v4095_v12 = vmul.f32 -1.442695, %v1279_v44  ;;  %v1069_v48 = vsel %vm981_vm2, %v978_v25, 0.0  ;;  %v2082_v23 = vand.u32 2147483648, %v5305_v22 }
 0x1ee   : > { %v2052_v32 = vand.u32 2147483648, %v5315_v33  ;;  %4175 = vrcp.f32 %v5334_v41  ;;  %v1250_v0 = vmul.f32 %v1176_v28, %v5049_v47  ;;  %v5359_v40 = vor.u32 1.1754944e-38, %v2067_v34 }
 0x1ef   : > { %4177 = vpow2.f32 %v4095_v12  ;;  %v1251_v5 = vmul.f32 %v1179_v20, %v5071_v8  ;;  %v5362_v31 = vpop.eup %4167  ;;  %v2058_v1 = vsub.f32 1.0, %v2057_v3  ;;  %v2072_v17 = vmul.f32 %v5349_v10, %v5305_v22  ;;  %v1185_v20 = vpop.xlane.xlu0 %1184 }
 0x1f0   : > { %v1283_v42 = vadd.f32 %v5219_v14, %v1250_v0  ;;  %v1249_v26 = vmul.f32 %v1173_v55, %v5041_v13  ;;  %4179 = vrcp.f32 %v5351_v16  ;;  %v5374_v25 = vsel %vm981_vm2, %v980_v29, 0.0  ;;  %v1188_v3 = vpop.xlane.xlu1 %1187 }
 0x1f1   : > { %v5368_v44 = vpop.eup %4169  ;;  %vm2062_vm3 = vweird.f32 %v5328_v7  ;;  %vm2061_vm4 = vweird.f32 %v5292_v58  ;;  %v2112_v55 = vand.u32 2147483648, %v5321_v59  ;;  %v2059_v11 = vmul.f32 %v5328_v7, %v2058_v1 }
 0x1f2   : > { %1055 = vadd.xlane.f32.xlu1 %v1054_v60  ;;  %v1284_v60 = vadd.f32 %v5219_v14, %v1251_v5  ;;  %v5376_v21 = vpop.eup %4171  ;;  %v4099_v0 = vmul.f32 -1.442695, %v1283_v42  ;;  %v1282_v29 = vadd.f32 %v5219_v14, %v1249_v26  ;;  %v2042_v34 = vmul.f32 %v5362_v31, %v5315_v33  ;;  %vm5432_vm10 = vmor %vm2061_vm4, %vm2062_vm3 }
 0x1f3   : > { %1061 = vadd.xlane.f32.xlu0 %v1060_v24  ;;  %v5382_v24 = vor.u32 1.1754944e-38, %v2052_v32  ;;  %v4174_v12 = vpop.eup %4173  ;;  %v1253_v32 = vmul.f32 %v1185_v20, %v5073_v61  ;;  %v1254_v42 = vmul.f32 %v1188_v3, %v5093_v52  ;;  %vm2077_vm5 = vweird.f32 %v5349_v10  ;;  %v1182_v52 = vpop.xlane.xlu2 %1181 }
 0x1f4   : > { %v4100_v5 = vmul.f32 -1.442695, %v1284_v60  ;;  %v5387_v28 = vpop.eup %4175  ;;  %v5393_v38 = vadd.f32 1.0, %v4174_v12  ;;  %4181 = vpow2.f32 %v4099_v0  ;;  %v4098_v19 = vmul.f32 -1.442695, %v1282_v29 }
 0x1f5   : > { %1058 = vadd.xlane.f32.xlu2 %v1057_v63  ;;  %v5379_v63 = vor.u32 1.1754944e-38, %v2082_v23  ;;  %v2073_v23 = vsub.f32 1.0, %v2072_v17  ;;  %v4178_v15 = vpop.eup %4177  ;;  %v2102_v1 = vmul.f32 %v5368_v44, %v5321_v59  ;;  %v2117_v26 = vmul.f32 %v5376_v21, %v5325_v27 }
 0x1f6   : > { %8506 = vst [vmem:[#allocation33_spill] sm:$0xff] %v5393_v38  ;;  %v5402_v60 = vpop.eup %4179  ;;  %vm2076_vm6 = vweird.f32 %v5305_v22  ;;  %v2127_v20 = vand.u32 2147483648, %v5325_v27  ;;  %4183 = vpow2.f32 %v4100_v5  ;;  %v2043_v3 = vsub.f32 1.0, %v2042_v34 }
 0x1f7   : > { %v5410_v12 = vadd.f32 1.0, %v4178_v15  ;;  %4185 = vpow2.f32 %v4098_v19  ;;  %v1286_v0 = vadd.f32 %v5219_v14, %v1253_v32  ;;  %v5414_v29 = vadd.f32 %v5328_v7, %v2059_v11  ;;  %vm5470_vm14 = vmor %vm2076_vm6, %vm2077_vm5 }
 0x1f8   : > { %v2074_v17 = vmul.f32 %v5349_v10, %v2073_v23  ;;  %4187 = vrcp.f32 %v5393_v38  ;;  %vm2046_vm7 = vweird.f32 %v5315_v33  ;;  %vm2047_vm8 = vweird.f32 %v5362_v31 }
 0x1f9   : > { %v2118_v34 = vsub.f32 1.0, %v2117_v26  ;;  %v2147_v15 = vmul.f32 %v5402_v60, %v5351_v16  ;;  %vm2106_vm9 = vweird.f32 %v5321_v59  ;;  %v5425_v5 = vor.u32 1.1754944e-38, %v2127_v20  ;;  %vm5511_vm3 = vmor %vm2046_vm7, %vm2047_vm8 }
 0x1fa   : > { %1064 = vadd.xlane.f32.xlu1 %v1063_v30  ;;  %v5405_v30 = vor.u32 1.1754944e-38, %v2112_v55  ;;  %v1287_v55 = vadd.f32 %v5219_v14, %v1254_v42  ;;  %v4182_v19 = vpop.eup %4181  ;;  %vm2121_vm11 = vweird.f32 %v5325_v27  ;;  %4189 = vrcp.f32 %v5410_v12 }
 0x1fb   : > { %1070 = vadd.xlane.f32.xlu0 %v1069_v48  ;;  %v2087_v48 = vmul.f32 %v5387_v28, %v5334_v41  ;;  %v5439_v26 = vadd.f32 1.0, %v4182_v19  ;;  %v4102_v20 = vmul.f32 -1.442695, %v1286_v0  ;;  %v5447_v32 = vadd.f32 %v5349_v10, %v2074_v17  ;;  %v984_v46 = vpop.xlane.xlu2 %983 }
 0x1fc   : > { %vm2107_vm12 = vweird.f32 %v5368_v44  ;;  %vm2091_vm13 = vweird.f32 %v5334_v41  ;;  %v2097_v56 = vand.u32 2147483648, %v5334_v41  ;;  %v2148_v54 = vsub.f32 1.0, %v2147_v15 }
 0x1fd   : > { %1067 = vadd.xlane.f32.xlu2 %v1066_v53  ;;  %v2103_v53 = vsub.f32 1.0, %v2102_v1  ;;  %v2088_v23 = vsub.f32 1.0, %v2087_v48  ;;  %v2044_v1 = vmul.f32 %v5362_v31, %v2043_v3  ;;  %8509 = vst [vmem:[#allocation34_spill] sm:$0xff] %v5439_v26  ;;  %v4184_v48 = vpop.eup %4183  ;;  %v4103_v3 = vmul.f32 -1.442695, %v1287_v55  ;;  %v4539_v55 = vld [vmem:[%s8386_s2] sm:$0xff]  ;;  %vm5531_vm4 = vmor %vm2106_vm9, %vm2107_vm12 }
 0x1fe   : > { %v4186_v19 = vpop.eup %4185  ;;  %4191 = vrcp.f32 %v5439_v26  ;;  %v5458_v17 = vadd.f32 1.0, %v4184_v48  ;;  %v5463_v2 = vperm.slane %v4539_v55, 4  ;;  %v987_v48 = vpop.xlane.xlu0 %986  ;;  %v8513_v55 = vand.u32 2147483647, %v5292_v58 }
 0x1ff   : > { %v2104_v0 = vmul.f32 %v5368_v44, %v2103_v53  ;;  %v5454_v18 = vpop.eup %4187  ;;  %v2089_v11 = vmul.f32 %v5387_v28, %v2088_v23  ;;  %v5477_v15 = vadd.f32 1.0, %v4186_v19  ;;  %4193 = vpow2.f32 %v4102_v20 }
 0x200   : > { %8510 = vst [vmem:[#allocation35_spill] sm:$0xff] %v5454_v18  ;;  %v1252_v23 = vmul.f32 %v1182_v52, %v5065_v4  ;;  %vm5482_vm15 = vcmp.eq.f32.partialorder %v8513_v55, 8.507059e+37  ;;  %vm2122_vm0 = vweird.f32 %v5376_v21  ;;  %vm2092_vm1 = vweird.f32 %v5387_v28 }
 0x201   : > { %4195 = vpow2.f32 %v4103_v3  ;;  %v8516_v52 = vand.u32 2147483647, %v5315_v33  ;;  %v5501_v20 = vadd.f32 %v5368_v44, %v2104_v0  ;;  %v2149_v19 = vmul.f32 %v5402_v60, %v2148_v54  ;;  %vm5545_vm5 = vmor %vm2121_vm11, %vm2122_vm0 }
 0x202   : > { %1073 = vadd.xlane.f32.xlu1 %v5347_v39  ;;  %v2119_v39 = vmul.f32 %v5376_v21, %v2118_v34  ;;  %v5475_v34 = vadd.f32 %v5362_v31, %v2044_v1  ;;  %v5492_v1 = vpop.eup %4189  ;;  %v2162_v55 = vmul.f32 %v5454_v18, %v5393_v38  ;;  %4197 = vrcp.f32 %v5458_v17  ;;  %vm5562_vm7 = vmor %vm2091_vm13, %vm2092_vm1 }
 0x203   : > { %vm5496_vm2 = vcmp.eq.f32.partialorder %v8516_v52, 8.507059e+37  ;;  %v5519_v0 = vadd.f32 %v5387_v28, %v2089_v11  ;;  %v2157_v54 = vand.u32 2147483648, %v5351_v16  ;;  %v1080_v43 = vadd.f32 %v5463_v2, %v987_v48 }
 0x204   : > { %v5516_v52 = vadd.f32 %v5376_v21, %v2119_v39  ;;  %v2049_v9 = vsel %vm5511_vm3, %v5362_v31, %v5475_v34  ;;  %v5535_v39 = vor.u32 1.1754944e-38, %v2097_v56  ;;  %4199 = vrcp.f32 %v5477_v15  ;;  %v5539_v48 = vpop.eup %4191 }
 0x205   : > { %1076 = vadd.xlane.f32.xlu2 %v5374_v25  ;;  %v1285_v11 = vadd.f32 %v5219_v14, %v1252_v23  ;;  %vm2151_vm6 = vweird.f32 %v5351_v16  ;;  %v2172_v56 = vand.u32 2147483648, %v5393_v38  ;;  %v2132_v3 = vmul.f32 %v5492_v1, %v5410_v12  ;;  %v4194_v23 = vpop.eup %4193 }
 0x206   : > { %v5567_v34 = vadd.f32 %v5402_v60, %v2149_v19  ;;  %vm2152_vm8 = vweird.f32 %v5402_v60  ;;  %v2163_v4 = vsub.f32 1.0, %v2162_v55  ;;  %v5578_v13 = vor.u32 1.1754944e-38, %v2157_v54 }
 0x207   : > { %v4196_v61 = vpop.eup %4195  ;;  %v4058_v47 = vmul.f32 -1.442695, %v1080_v43  ;;  %vm2166_vm9 = vweird.f32 %v5393_v38  ;;  %v2192_v14 = vmul.f32 %v5539_v48, %v5439_v26  ;;  %v4101_v57 = vmul.f32 -1.442695, %v1285_v11  ;;  %vm5588_vm11 = vmor %vm2151_vm6, %vm2152_vm8 }
 0x208   : > { %v5580_v19 = vpop.eup %4197  ;;  %v5592_v54 = vor.u32 1.1754944e-38, %v2172_v56  ;;  %v2133_v43 = vsub.f32 1.0, %v2132_v3  ;;  %v2142_v8 = vand.u32 2147483648, %v5410_v12  ;;  %v5595_v6 = vadd.f32 1.0, %v4194_v23 }
 0x209   : > { %v2164_v55 = vmul.f32 %v5454_v18, %v2163_v4  ;;  %v8530_v56 = vsel %vm5432_vm10, %v5328_v7, %v5414_v29  ;;  %vm2136_vm12 = vweird.f32 %v5410_v12  ;;  %v2207_v23 = vmul.f32 %v5580_v19, %v5458_v17 }
 0x20a   : > { %8529 = vst [vmem:[#allocation36_spill] sm:$0xff] %v5592_v54  ;;  %v5597_v49 = vpop.eup %4199  ;;  %v5613_v3 = vsel %vm5482_vm15, %v5359_v40, %v8530_v56  ;;  %v5618_v11 = vadd.f32 1.0, %v4196_v61  ;;  %4201 = vpow2.f32 %v4058_v47  ;;  %v5623_v4 = vsel %vm5496_vm2, %v5382_v24, %v2049_v9  ;;  %v990_v47 = vpop.xlane.xlu1 %989 }
 0x20b   : > { %v2193_v42 = vsub.f32 1.0, %v2192_v14  ;;  %v2202_v7 = vand.u32 2147483648, %v5439_v26  ;;  %4203 = vpow2.f32 %v4101_v57  ;;  %v1079_v40 = vadd.f32 %v5463_v2, %v984_v46  ;;  %v996_v56 = vpop.xlane.xlu0 %995  ;;  %v993_v46 = vpop.xlane.xlu2 %992 }
 0x20c   : > { %8531 = vst [vmem:[#allocation37_spill] sm:$0xff] %v5618_v11  ;;  %v2134_v29 = vmul.f32 %v5492_v1, %v2133_v43  ;;  %v5628_v25 = vor.u32 1.1754944e-38, %v2142_v8  ;;  %v2177_v61 = vmul.f32 %v5597_v49, %v5477_v15  ;;  %4205 = vrcp.f32 %v5595_v6 }
 0x20d   : > { %v5634_v9 = vadd.f32 %v5454_v18, %v2164_v55  ;;  %vm2167_vm10 = vweird.f32 %v5454_v18  ;;  %vm2196_vm13 = vweird.f32 %v5439_v26  ;;  %v2217_v57 = vand.u32 2147483648, %v5458_v17 }
 0x20e   : > { %vm2137_vm15 = vweird.f32 %v5492_v1  ;;  %v2208_v8 = vsub.f32 1.0, %v2207_v23  ;;  %4207 = vrcp.f32 %v5618_v11  ;;  %v2194_v14 = vmul.f32 %v5539_v48, %v2193_v42  ;;  %vm5648_vm0 = vmor %vm2166_vm9, %vm2167_vm10 }
 0x20f   : > { %8532 = vst [vmem:[#allocation38_spill] sm:$0xff] %v5634_v9  ;;  %v5643_v24 = vor.u32 1.1754944e-38, %v2202_v7  ;;  %v2187_v58 = vand.u32 2147483648, %v5477_v15  ;;  %v4057_v55 = vmul.f32 -1.442695, %v1079_v40  ;;  %v8534_v50 = vmov 0  ;;  %vm5683_vm6 = vmor %vm2136_vm12, %vm2137_vm15 }
 0x210   : > { %v4202_v43 = vpop.eup %4201  ;;  %v8535_v50 = vsel %vm5648_vm0, 4294967295, %v8534_v50  ;;  %v5653_v54 = vadd.f32 %v5492_v1, %v2134_v29  ;;  %vm2211_vm1 = vweird.f32 %v5458_v17  ;;  %v2178_v42 = vsub.f32 1.0, %v2177_v61 }
 0x211   : > { %8533 = vst [vmem:[#allocation39_spill] sm:$0xff] %v5643_v24  ;;  %v4204_v24 = vpop.eup %4203  ;;  %v5662_v38 = vor.u32 1.1754944e-38, %v2217_v57  ;;  %v5664_v51 = vadd.f32 1.0, %v4202_v43  ;;  %4209 = vpow2.f32 %v4057_v55  ;;  %v2209_v45 = vmul.f32 %v5580_v19, %v2208_v8 }
 0x212   : > { %8536 = vst [vmem:[#allocation40_spill] sm:$0xff] %v8535_v50  ;;  %v5666_v29 = vpop.eup %4205  ;;  %v2247_v61 = vand.u32 2147483648, %v5595_v6  ;;  %v1081_v7 = vadd.f32 %v5463_v2, %v990_v47  ;;  %v1083_v23 = vadd.f32 %v5463_v2, %v996_v56  ;;  %v8538_v50 = vand.u32 2147483647, %v5305_v22  ;;  %v999_v40 = vpop.xlane.xlu1 %998 }
 0x213   : > { %8537 = vst [vmem:[#allocation41_spill] sm:$0xff] %v5662_v38  ;;  %v5688_v55 = vadd.f32 %v5539_v48, %v2194_v14  ;;  %vm2197_vm8 = vweird.f32 %v5539_v48  ;;  %v5691_v47 = vor.u32 1.1754944e-38, %v2187_v58  ;;  %4211 = vrcp.f32 %v5664_v51  ;;  %v1005_v18 = vpop.xlane.xlu0 %1004 }
 0x214   : > { %vm5675_vm3 = vcmp.eq.f32.partialorder %v8538_v50, 8.507059e+37  ;;  %v5694_v50 = vpop.eup %4207  ;;  %v8546_v22 = vand.u32 2147483647, %v5321_v59  ;;  %vm2212_vm12 = vweird.f32 %v5580_v19  ;;  %v2179_v58 = vmul.f32 %v5597_v49, %v2178_v42  ;;  %vm5717_vm10 = vmor %vm2196_vm13, %vm2197_vm8 }
 0x215   : > { %8543 = vst [vmem:[#allocation42_spill] sm:$0xff] %v5688_v55  ;;  %v5711_v38 = vmul.f32 %v5666_v29, %v5595_v6  ;;  %v5713_v59 = vadd.f32 1.0, %v4204_v24  ;;  %v5722_v14 = vadd.f32 %v5580_v19, %v2209_v45  ;;  %vm2182_vm15 = vweird.f32 %v5597_v49  ;;  %vm5758_vm8 = vmor %vm2211_vm1, %vm2212_vm12 }
 0x216   : > { %8544 = vst [vmem:[#allocation43_spill] sm:$0xff] %v5691_v47  ;;  %vm5698_vm9 = vcmp.eq.f32.partialorder %v8546_v22, 8.507059e+37  ;;  %v4059_v22 = vmul.f32 -1.442695, %v1081_v7  ;;  %v4061_v47 = vmul.f32 -1.442695, %v1083_v23  ;;  %v1082_v43 = vadd.f32 %v5463_v2, %v993_v46 }
 0x217   : > { %8545 = vst [vmem:[#allocation44_spill] sm:$0xff] %v5694_v50  ;;  %v5725_v42 = vor.u32 1.1754944e-38, %v2247_v61  ;;  %v4210_v24 = vpop.eup %4209  ;;  %v8553_v7 = vand.u32 2147483647, %v5334_v41  ;;  %v5740_v26 = vmul.f32 %v5694_v50, %v5618_v11  ;;  %v1084_v46 = vadd.f32 %v5463_v2, %v999_v40 }
 0x218   : > { %8551 = vst [vmem:[#allocation45_spill] sm:$0xff] %v5722_v14  ;;  %4213 = vpow2.f32 %v4059_v22  ;;  %v8557_v61 = vand.u32 2147483647, %v5325_v27  ;;  %v4060_v45 = vmul.f32 -1.442695, %v1082_v43  ;;  %v8560_v40 = vmov 0 }
 0x219   : > { %8552 = vst [vmem:[#allocation46_spill] sm:$0xff] %v5725_v42  ;;  %vm5730_vm2 = vcmp.eq.f32.partialorder %v8553_v7, 8.507059e+37  ;;  %v5750_v7 = vadd.f32 %v5597_v49, %v2179_v58  ;;  %v5752_v42 = vadd.f32 1.0, %v4210_v24  ;;  %4215 = vpow2.f32 %v4061_v47  ;;  %v4212_v55 = vpop.eup %4211 }
 0x21a   : > { %8556 = vst [vmem:[#allocation47_spill] sm:$0xff] %v5740_v26  ;;  %vm5745_vm13 = vcmp.eq.f32.partialorder %v8557_v61, 8.507059e+37  ;;  %v8561_v40 = vsel %vm5758_vm8, 4294967295, %v8560_v40  ;;  %4217 = vrcp.f32 %v5713_v59  ;;  %v4062_v22 = vmul.f32 -1.442695, %v1084_v46  ;;  %v1002_v61 = vpop.xlane.xlu2 %1001 }
 0x21b   : > { %v1086_v58 = vadd.f32 %v5463_v2, %v1005_v18  ;;  %v1449_v24 = vmul.f32 %v4212_v55, %v5664_v51  ;;  %4219 = vrcp.f32 %v5752_v42  ;;  %vm8562_vm1 = vweird.f32 %v5477_v15 }
 0x21c   : > { %vm5776_vm12 = vmor %vm8562_vm1, %vm2182_vm15  ;;  %v1457_v27 = vand.u32 2147483647, %v5664_v51  ;;  %v1459_v47 = vand.u32 2147483648, %v5664_v51  ;;  %4221 = vpow2.f32 %v4060_v45  ;;  %v8565_v50 = vsel %vm5470_vm14, %v5349_v10, %v5447_v32 }
 0x21d   : > { %v1450_v11 = vsub.f32 1.0, %v1449_v24  ;;  %v5795_v18 = vsel %vm5675_vm3, %v5379_v63, %v8565_v50  ;;  %v4064_v26 = vmul.f32 -1.442695, %v1086_v58  ;;  %vm8450_vm15 = vcmask 7168  }
 0x21e   : > { %v4214_v14 = vpop.eup %4213  ;;  %vm1453_vm1 = vweird.f32 %v5664_v51  ;;  %v8566_v45 = vsel %vm5531_vm4, %v5368_v44, %v5501_v20  ;;  %4223 = vpow2.f32 %v4062_v22  ;;  %v1085_v10 = vadd.f32 %v5463_v2, %v1002_v61 }
 0x21f   : > { %v5806_v53 = vsel %vm5698_vm9, %v5405_v30, %v8566_v45  ;;  %v4216_v63 = vpop.eup %4215  ;;  %v1451_v32 = vmul.f32 %v4212_v55, %v1450_v11  ;;  %vm1454_vm14 = vweird.f32 %v4212_v55  ;;  %v1442_v57 = vand.u32 2147483647, %v5752_v42 }
 0x220   : > { %v5810_v50 = vadd.f32 1.0, %v4214_v14  ;;  %v5812_v58 = vpop.eup %4217  ;;  %vm5814_vm3 = vcmp.eq.f32.partialorder %v1457_v27, 8.507059e+37  ;;  %v1460_v44 = vor.u32 1.1754944e-38, %v1459_v47  ;;  %v5818_v20 = vadd.f32 1.0, %v4216_v63  ;;  %vm1455_vm4 = vmor %vm1453_vm1, %vm1454_vm14 }
 0x221   : > { %4225 = vpow2.f32 %v4064_v26  ;;  %v4220_v30 = vpop.eup %4219  ;;  %v1452_v56 = vadd.f32 %v4212_v55, %v1451_v32  ;;  %v1444_v22 = vand.u32 2147483648, %v5752_v42  ;;  %v8569_v11 = vsel %vm5562_vm7, %v5387_v28, %v5519_v0 }
 0x222   : > { %4227 = vrcp.f32 %v5810_v50  ;;  %v5830_v14 = vsel %vm5730_vm2, %v5535_v39, %v8569_v11  ;;  %v4222_v27 = vpop.eup %4221  ;;  %v1434_v26 = vmul.f32 %v4220_v30, %v5752_v42  ;;  %v8570_v35 = vsel %vm5545_vm5, %v5376_v21, %v5516_v52 }
 0x223   : > { %4229 = vrcp.f32 %v5818_v20  ;;  %v5844_v28 = vsel %vm5745_vm13, %v5425_v5, %v8570_v35  ;;  %v4063_v0 = vmul.f32 -1.442695, %v1085_v10  ;;  %v1456_v39 = vsel %vm1455_vm4, %v4212_v55, %v1452_v56 }
 0x224   : > { %vm1438_vm7 = vweird.f32 %v5752_v42  ;;  %vm5847_vm2 = vcmp.eq.f32.partialorder %v1442_v57, 8.507059e+37  ;;  %v1472_v23 = vand.u32 2147483647, %v5810_v50  ;;  %v4224_v47 = vpop.eup %4223  ;;  %v1461_v31 = vsel %vm5814_vm3, %v1460_v44, %v1456_v39 }
 0x225   : > { %v1435_v21 = vsub.f32 1.0, %v1434_v26  ;;  %v1474_v52 = vand.u32 2147483648, %v5810_v50  ;;  %v1504_v5 = vand.u32 2147483648, %v5818_v20  ;;  %v2522_v41 = vadd.f32 %v5613_v3, %v1461_v31 }
 0x226   : > { %v1445_v55 = vor.u32 1.1754944e-38, %v1444_v22  ;;  %v1502_v24 = vand.u32 2147483647, %v5818_v20  ;;  %v5858_v61 = vadd.f32 1.0, %v4222_v27  ;;  %vm1439_vm5 = vweird.f32 %v4220_v30 }
 0x227   : > { %v4226_v45 = vpop.eup %4225  ;;  %v1436_v10 = vmul.f32 %v4220_v30, %v1435_v21  ;;  %vm1468_vm9 = vweird.f32 %v5810_v50  ;;  %4231 = vpow2.f32 %v4063_v0  ;;  %v5861_v32 = vmul.f32 0.5, %v2522_v41  ;;  %vm1440_vm14 = vmor %vm1438_vm7, %vm1439_vm5 }
 0x228   : > { %v4228_v63 = vpop.eup %4227  ;;  %vm1498_vm13 = vweird.f32 %v5818_v20  ;;  %4233 = vrcp.f32 %v5858_v61  ;;  %v5865_v57 = vadd.f32 1.0, %v4224_v47  ;;  %vm5868_vm1 = vcmp.eq.f32.partialorder %v1472_v23, 8.507059e+37 }
 0x229   : > { %v4230_v3 = vpop.eup %4229  ;;  %v1437_v33 = vadd.f32 %v4220_v30, %v1436_v10  ;;  %v1464_v44 = vmul.f32 %v4228_v63, %v5810_v50  ;;  %v1475_v22 = vor.u32 1.1754944e-38, %v1474_v52  ;;  %v1505_v11 = vor.u32 1.1754944e-38, %v1504_v5 }
 0x22a   : > { %v2593_v27 = vsel %vm8450_vm15, %v5861_v32, -inf  ;;  %v1494_v26 = vmul.f32 %v4230_v3, %v5818_v20  ;;  %vm5878_vm3 = vcmp.eq.f32.partialorder %v1502_v24, 8.507059e+37  ;;  %v1489_v0 = vand.u32 2147483648, %v5858_v61 }
 0x22b   : > { %v5883_v39 = vadd.f32 1.0, %v4226_v45  ;;  %v2594_v23 = vrot.slane %v2593_v27, 4  ;;  %v1441_v47 = vsel %vm1440_vm14, %v4220_v30, %v1437_v33  ;;  %v1465_v31 = vsub.f32 1.0, %v1464_v44 }
 0x22c   : > { %v1487_v21 = vand.u32 2147483647, %v5858_v61  ;;  %v1446_v52 = vsel %vm5847_vm2, %v1445_v55, %v1441_v47  ;;  %vm1469_vm4 = vweird.f32 %v4228_v63  ;;  %v1495_v42 = vsub.f32 1.0, %v1494_v26 }
 0x22d   : > { %4235 = vrcp.f32 %v5865_v57  ;;  %v5889_v5 = vpop.eup %4231  ;;  %v2595_v41 = vmax.f32 %v2593_v27, %v2594_v23  ;;  %v2521_v24 = vadd.f32 %v5623_v4, %v1446_v52  ;;  %v1466_v10 = vmul.f32 %v4228_v63, %v1465_v31  ;;  %vm1470_vm14 = vmor %vm1468_vm9, %vm1469_vm4 }
 0x22e   : > { %vm1499_vm7 = vweird.f32 %v4230_v3  ;;  %v4234_v30 = vpop.eup %4233  ;;  %v1496_v45 = vmul.f32 %v4230_v3, %v1495_v42  ;;  %v1490_v33 = vor.u32 1.1754944e-38, %v1489_v0  ;;  %v1519_v44 = vand.u32 2147483648, %v5865_v57 }
 0x22f   : > { %4237 = vrcp.f32 %v5883_v39  ;;  %v2596_v51 = vrot.slane %v2595_v41, 2  ;;  %v5895_v55 = vmul.f32 0.5, %v2521_v24  ;;  %v1467_v26 = vadd.f32 %v4228_v63, %v1466_v10  ;;  %vm1500_vm8 = vmor %vm1498_vm13, %vm1499_vm7 }
 0x230   : > { %v1479_v47 = vmul.f32 %v4234_v30, %v5858_v61  ;;  %vm5898_vm2 = vcmp.eq.f32.partialorder %v1487_v21, 8.507059e+37  ;;  %v1497_v4 = vadd.f32 %v4230_v3, %v1496_v45  ;;  %vm1484_vm5 = vweird.f32 %v4234_v30 }
 0x231   : > { %v1517_v0 = vand.u32 2147483647, %v5865_v57  ;;  %v5906_v23 = vor.u32 1.1754944e-38, %v1519_v44  ;;  %v2597_v31 = vmax.f32 %v2595_v41, %v2596_v51  ;;  %v2586_v52 = vsel %vm8450_vm15, %v5895_v55, -inf }
 0x232   : > { %v1471_v42 = vsel %vm1470_vm14, %v4228_v63, %v1467_v26  ;;  %v1480_v21 = vsub.f32 1.0, %v1479_v47  ;;  %v2587_v10 = vrot.slane %v2586_v52, 4  ;;  %v1501_v45 = vsel %vm1500_vm8, %v4230_v3, %v1497_v4 }
 0x233   : > { %v4236_v24 = vpop.eup %4235  ;;  %v1476_v50 = vsel %vm5868_vm1, %v1475_v22, %v1471_v42  ;;  %v1547_v43 = vand.u32 2147483647, %v5883_v39  ;;  %v2598_v44 = vrot.slane %v2597_v31, 1  ;;  %v1506_v51 = vsel %vm5878_vm3, %v1505_v11, %v1501_v45 }
 0x234   : > { %v2523_v41 = vadd.f32 %v5795_v18, %v1476_v50  ;;  %v1481_v63 = vmul.f32 %v4234_v30, %v1480_v21  ;;  %vm1513_vm9 = vweird.f32 %v5865_v57  ;;  %v2588_v26 = vmax.f32 %v2586_v52, %v2587_v10 }
 0x235   : > { %v5920_v20 = vpop.eup %4237  ;;  %v2525_v47 = vadd.f32 %v5806_v53, %v1506_v51  ;;  %v1509_v56 = vmul.f32 %v4236_v24, %v5865_v57  ;;  %vm1514_vm13 = vweird.f32 %v4236_v24  ;;  %v2599_v3 = vmax.f32 %v2597_v31, %v2598_v44 }
 0x236   : > { %v5924_v22 = vmul.f32 0.5, %v2523_v41  ;;  %v1482_v4 = vadd.f32 %v4234_v30, %v1481_v63  ;;  %vm5926_vm8 = vcmp.eq.f32.partialorder %v1517_v0, 8.507059e+37  ;;  %v1539_v11 = vmul.f32 %v5920_v20, %v5883_v39 }
 0x237   : > { %vm1543_vm1 = vweird.f32 %v5883_v39  ;;  %v2589_v35 = vrot.slane %v2588_v26, 2  ;;  %v5933_v52 = vmul.f32 0.5, %v2525_v47  ;;  %vm8581_vm3 = vweird.f32 %v5858_v61 }
 0x238   : > { %vm1485_vm4 = vmor %vm8581_vm3, %vm1484_vm5  ;;  %v1510_v53 = vsub.f32 1.0, %v1509_v56  ;;  %vm1544_vm7 = vweird.f32 %v5920_v20  ;;  %v2811_v0 = vsub.f32 %v5861_v32, %v2599_v3  ;;  %v2600_v31 = vsel %vm8450_vm15, %v5924_v22, -inf }
 0x239   : > { %v1486_v42 = vsel %vm1485_vm4, %v4234_v30, %v1482_v4  ;;  %v1540_v21 = vsub.f32 1.0, %v1539_v11  ;;  %v8582_v10 = vand.u32 2147483647, %v5351_v16  ;;  %v2590_v45 = vmax.f32 %v2588_v26, %v2589_v35 }
 0x23a   : > { %v2601_v44 = vrot.slane %v2600_v31, 4  ;;  %v2614_v61 = vsel %vm8450_vm15, %v5933_v52, -inf  ;;  %v1491_v41 = vsel %vm5898_vm2, %v1490_v33, %v1486_v42  ;;  %v2844_v32 = vmul.f32 1.442695, %v2811_v0  ;;  %vm1515_vm2 = vmor %vm1513_vm9, %vm1514_vm13 }
 0x23b   : > { %vm5944_vm14 = vcmp.eq.f32.partialorder %v8582_v10, 8.507059e+37  ;;  %v2615_v51 = vrot.slane %v2614_v61, 4  ;;  %v2524_v63 = vadd.f32 %v5830_v14, %v1491_v41  ;;  %v1511_v30 = vmul.f32 %v4236_v24, %v1510_v53  ;;  %vm1545_vm9 = vmor %vm1543_vm1, %vm1544_vm7 }
 0x23c   : > { %v2591_v47 = vrot.slane %v2590_v45, 1  ;;  %v2602_v56 = vmax.f32 %v2600_v31, %v2601_v44  ;;  %v1541_v16 = vmul.f32 %v5920_v20, %v1540_v21  ;;  %vm5954_vm5 = vcmp.eq.f32.partialorder %v1547_v43, 8.507059e+37 }
 0x23d   : > { %4239 = vpow2.f32 %v2844_v32  ;;  %v2616_v26 = vmax.f32 %v2614_v61, %v2615_v51  ;;  %v5958_v4 = vmul.f32 0.5, %v2524_v63  ;;  %v1512_v11 = vadd.f32 %v4236_v24, %v1511_v30 }
 0x23e   : > { %v2592_v27 = vmax.f32 %v2590_v45, %v2591_v47  ;;  %v2603_v33 = vrot.slane %v2602_v56, 2  ;;  %v1542_v14 = vadd.f32 %v5920_v20, %v1541_v16  ;;  %v1549_v35 = vand.u32 2147483648, %v5883_v39 }
 0x23f   : > { %v2617_v53 = vrot.slane %v2616_v26, 2  ;;  %v2607_v43 = vsel %vm8450_vm15, %v5958_v4, -inf  ;;  %v1516_v0 = vsel %vm1515_vm2, %v4236_v24, %v1512_v11  ;;  %v5968_v31 = vadd.f32 1.0, %v5889_v5 }
 0x240   : > { %v2810_v42 = vsub.f32 %v5895_v55, %v2592_v27  ;;  %v2604_v21 = vmax.f32 %v2602_v56, %v2603_v33  ;;  %v2608_v10 = vrot.slane %v2607_v43, 4  ;;  %v1521_v57 = vsel %vm5926_vm8, %v5906_v23, %v1516_v0 }
 0x241   : > { %v2618_v45 = vmax.f32 %v2616_v26, %v2617_v53  ;;  %v2526_v44 = vadd.f32 %v5844_v28, %v1521_v57  ;;  %v1546_v24 = vsel %vm1545_vm9, %v5920_v20, %v1542_v14  ;;  %v1550_v5 = vor.u32 1.1754944e-38, %v1549_v35 }
 0x242   : > { %v2842_v61 = vmul.f32 1.442695, %v2810_v42  ;;  %v2605_v41 = vrot.slane %v2604_v21, 1  ;;  %v2609_v55 = vmax.f32 %v2607_v43, %v2608_v10  ;;  %4241 = vrcp.f32 %v5968_v31 }
 0x243   : > { %v5981_v32 = vpop.eup %4239  ;;  %v2619_v18 = vrot.slane %v2618_v45, 1  ;;  %v5983_v23 = vmul.f32 0.5, %v2526_v44  ;;  %v8587_v39 = vsel %vm5588_vm11, %v5402_v60, %v5567_v34  ;;  %v1551_v20 = vsel %vm5954_vm5, %v1550_v5, %v1546_v24 }
 0x244   : > { %v2159_v28 = vsel %vm5944_vm14, %v5578_v13, %v8587_v39  ;;  %v2913_v51 = vsel %vm8450_vm15, %v5981_v32, 0.0  ;;  %4243 = vpow2.f32 %v2842_v61  ;;  %v2606_v63 = vmax.f32 %v2604_v21, %v2605_v41 }
 0x245   : > { %v2610_v30 = vrot.slane %v2609_v55, 2  ;;  %v2914_v47 = vrot.slane %v2913_v51, 4  ;;  %v2620_v56 = vmax.f32 %v2618_v45, %v2619_v18  ;;  %v2621_v36 = vsel %vm8450_vm15, %v5983_v23, -inf }
 0x246   : > { %v2528_v16 = vadd.f32 %v2159_v28, %v1551_v20  ;;  %v8588_v60 = vsub.f32 1.0, %v5711_v38  ;;  %v2812_v13 = vsub.f32 %v5924_v22, %v2606_v63  ;;  %v2622_v3 = vrot.slane %v2621_v36, 4 }
 0x247   : > { %v2611_v50 = vmax.f32 %v2609_v55, %v2610_v30  ;;  %v8589_v26 = vand.u32 2147483648, %v5713_v59  ;;  %v2915_v27 = vadd.f32 %v2914_v47, %v2913_v51  ;;  %v2814_v33 = vsub.f32 %v5933_v52, %v2620_v56 }
 0x248   : > { %v2239_v34 = vmul.f32 %v5666_v29, %v8588_v60  ;;  %v6008_v14 = vmul.f32 0.5, %v2528_v16  ;;  %v6010_v35 = vpop.eup %4241  ;;  %v2222_v38 = vmul.f32 %v5812_v58, %v5713_v59  ;;  %v2846_v53 = vmul.f32 1.442695, %v2812_v13 }
 0x249   : > { %v6005_v11 = vor.u32 1.1754944e-38, %v8589_v26  ;;  %v2612_v43 = vrot.slane %v2611_v50, 1  ;;  %v2623_v0 = vmax.f32 %v2621_v36, %v2622_v3  ;;  %v2916_v22 = vrot.slane %v2915_v27, 2 }
 0x24a   : > { %v2850_v42 = vmul.f32 1.442695, %v2814_v33  ;;  %v2635_v21 = vsel %vm8450_vm15, %v6008_v14, -inf  ;;  %v1524_v10 = vmul.f32 %v6010_v35, %v5968_v31  ;;  %v6018_v57 = vpop.eup %4243  ;;  %4245 = vpow2.f32 %v2846_v53  ;;  %v1008_v33 = vpop.xlane.xlu1 %1007 }
 0x24b   : > { %v2613_v52 = vmax.f32 %v2611_v50, %v2612_v43  ;;  %v2624_v45 = vrot.slane %v2623_v0, 2  ;;  %v2636_v44 = vrot.slane %v2635_v21, 4  ;;  %v2917_v24 = vadd.f32 %v2916_v22, %v2915_v27 }
 0x24c   : > { %v2906_v5 = vsel %vm8450_vm15, %v6018_v57, 0.0  ;;  %4247 = vpow2.f32 %v2850_v42  ;;  %v1525_v61 = vsub.f32 1.0, %v1524_v10  ;;  %v6024_v28 = vadd.f32 %v5666_v29, %v2239_v34 }
 0x24d   : > { %v2907_v41 = vrot.slane %v2906_v5, 4  ;;  %v2813_v55 = vsub.f32 %v5958_v4, %v2613_v52  ;;  %v2625_v18 = vmax.f32 %v2623_v0, %v2624_v45  ;;  %v2637_v39 = vmax.f32 %v2635_v21, %v2636_v44 }
 0x24e   : > { %v2223_v20 = vsub.f32 1.0, %v2222_v38  ;;  %v2918_v51 = vrot.slane %v2917_v24, 1  ;;  %v1526_v63 = vmul.f32 %v6010_v35, %v1525_v61  ;;  %v8590_v16 = vand.u32 2147483647, %v5410_v12 }
 0x24f   : > { %v2908_v30 = vadd.f32 %v2907_v41, %v2906_v5  ;;  %v2848_v47 = vmul.f32 1.442695, %v2813_v55  ;;  %v2626_v56 = vrot.slane %v2625_v18, 1  ;;  %v2638_v36 = vrot.slane %v2637_v39, 2 }
 0x250   : > { %vm6029_vm11 = vcmp.eq.f32.partialorder %v8590_v16, 8.507059e+37  ;;  %v6033_v4 = vadd.f32 %v2918_v51, %v2917_v24  ;;  %v1527_v13 = vadd.f32 %v6010_v35, %v1526_v63  ;;  %vm1529_vm13 = vweird.f32 %v6010_v35  ;;  %v6038_v50 = vpop.eup %4245 }
 0x251   : > { %v1534_v34 = vand.u32 2147483648, %v5968_v31  ;;  %v2909_v3 = vrot.slane %v2908_v30, 2  ;;  %4249 = vpow2.f32 %v2848_v47  ;;  %v2627_v26 = vmax.f32 %v2625_v18, %v2626_v56 }
 0x252   : > { %v2639_v27 = vmax.f32 %v2637_v39, %v2638_v36  ;;  %v6040_v12 = vpop.eup %4247  ;;  %v6043_v38 = vmul.f32 %v5812_v58, %v2223_v20  ;;  %4251 = vrcp.f32 %v6033_v4  ;;  %vm1528_vm8 = vweird.f32 %v5968_v31 }
 0x253   : > { %v1532_v53 = vand.u32 2147483647, %v5968_v31  ;;  %v2910_v43 = vadd.f32 %v2909_v3, %v2908_v30  ;;  %v2920_v0 = vsel %vm8450_vm15, %v6038_v50, 0.0  ;;  %v2934_v22 = vsel %vm8450_vm15, %v6040_v12, 0.0  ;;  %vm6055_vm1 = vmor %vm1528_vm8, %vm1529_vm13 }
 0x254   : > { %v2815_v42 = vsub.f32 %v5983_v23, %v2627_v26  ;;  %v2921_v21 = vrot.slane %v2920_v0, 4  ;;  %v2935_v10 = vrot.slane %v2934_v22, 4  ;;  %v1535_v45 = vor.u32 1.1754944e-38, %v1534_v34 }
 0x255   : > { %v1087_v31 = vadd.f32 %v5463_v2, %v1008_v33  ;;  %v2911_v44 = vrot.slane %v2910_v43, 1  ;;  %v2640_v5 = vrot.slane %v2639_v27, 1  ;;  %v1531_v61 = vsel %vm6055_vm1, %v6010_v35, %v1527_v13 }
 0x256   : > { %v2852_v24 = vmul.f32 1.442695, %v2815_v42  ;;  %v3154_v23 = vand.u32 2147483647, %v6033_v4  ;;  %v2922_v41 = vadd.f32 %v2921_v21, %v2920_v0  ;;  %v2936_v55 = vadd.f32 %v2935_v10, %v2934_v22 }
 0x257   : > { %vm1533_vm3 = vcmp.eq.f32.partialorder %v1532_v53, 8.507059e+37  ;;  %v6064_v18 = vpop.eup %4249  ;;  %v6066_v39 = vadd.f32 %v2911_v44, %v2910_v43  ;;  %v2641_v20 = vmax.f32 %v2639_v27, %v2640_v5  ;;  %v4065_v36 = vmul.f32 -1.442695, %v1087_v31 }
 0x258   : > { %4253 = vpow2.f32 %v2852_v24  ;;  %v1536_v51 = vsel %vm1533_vm3, %v1535_v45, %v1531_v61  ;;  %v4252_v63 = vpop.eup %4251  ;;  %v2923_v30 = vrot.slane %v2922_v41, 2  ;;  %v2937_v47 = vrot.slane %v2936_v55, 2 }
 0x259   : > { %v2927_v56 = vsel %vm8450_vm15, %v6064_v18, 0.0  ;;  %v3146_v35 = vmul.f32 %v4252_v63, %v6033_v4  ;;  %vm3150_vm4 = vweird.f32 %v6033_v4  ;;  %4255 = vrcp.f32 %v6066_v39 }
 0x25a   : > { %v8595_v16 = vsel %vm5683_vm6, %v5492_v1, %v5653_v54  ;;  %v3156_v34 = vand.u32 2147483648, %v6033_v4  ;;  %v2924_v3 = vadd.f32 %v2923_v30, %v2922_v41  ;;  %v2938_v26 = vadd.f32 %v2937_v47, %v2936_v55 }
 0x25b   : > { %v2144_v13 = vsel %vm6029_vm11, %v5628_v25, %v8595_v16  ;;  %v3147_v33 = vsub.f32 1.0, %v3146_v35  ;;  %vm6082_vm7 = vcmp.eq.f32.partialorder %v3154_v23, 8.507059e+37  ;;  %v2928_v43 = vrot.slane %v2927_v56, 4 }
 0x25c   : > { %v2527_v27 = vadd.f32 %v2144_v13, %v1536_v51  ;;  %v2817_v8 = vsub.f32 %v6008_v14, %v2641_v20  ;;  %vm3151_vm14 = vweird.f32 %v4252_v63  ;;  %v2925_v0 = vrot.slane %v2924_v3, 1 }
 0x25d   : > { %v2939_v1 = vrot.slane %v2938_v26, 1  ;;  %4257 = vpow2.f32 %v4065_v36  ;;  %v3148_v25 = vmul.f32 %v4252_v63, %v3147_v33  ;;  %v3139_v60 = vand.u32 2147483647, %v6066_v39  ;;  %vm3152_vm5 = vmor %vm3150_vm4, %vm3151_vm14 }
 0x25e   : > { %v6087_v54 = vpop.eup %4253  ;;  %v2929_v22 = vadd.f32 %v2928_v43, %v2927_v56  ;;  %v2856_v42 = vmul.f32 1.442695, %v2817_v8  ;;  %v6090_v21 = vadd.f32 %v2925_v0, %v2924_v3  ;;  %v6096_v45 = vmul.f32 0.5, %v2527_v27 }
 0x25f   : > { %v6092_v10 = vadd.f32 %v2939_v1, %v2938_v26  ;;  %v2941_v52 = vsel %vm8450_vm15, %v6087_v54, 0.0  ;;  %v4256_v14 = vpop.eup %4255  ;;  %v3149_v31 = vadd.f32 %v4252_v63, %v3148_v25  ;;  %v3157_v44 = vor.u32 1.1754944e-38, %v3156_v34 }
 0x260   : > { %vm3135_vm6 = vweird.f32 %v6066_v39  ;;  %4259 = vpow2.f32 %v2856_v42  ;;  %v3131_v24 = vmul.f32 %v4256_v14, %v6066_v39  ;;  %v2930_v5 = vrot.slane %v2929_v22, 2 }
 0x261   : > { %4261 = vrcp.f32 %v6090_v21  ;;  %v2942_v61 = vrot.slane %v2941_v52, 4  ;;  %v3153_v23 = vsel %vm3152_vm5, %v4252_v63, %v3149_v31  ;;  %vm6104_vm2 = vcmp.eq.f32.partialorder %v3139_v60, 8.507059e+37 }
 0x262   : > { %v3141_v55 = vand.u32 2147483648, %v6066_v39  ;;  %4263 = vrcp.f32 %v6092_v10  ;;  %v3158_v4 = vsel %vm6082_vm7, %v3157_v44, %v3153_v23  ;;  %v3132_v51 = vsub.f32 1.0, %v3131_v24 }
 0x263   : > { %v6110_v20 = vpop.eup %4257  ;;  %vm3136_vm9 = vweird.f32 %v4256_v14  ;;  %v2628_v63 = vsel %vm8450_vm15, %v6096_v45, -inf  ;;  %v3159_v30 = vmul.f32 %v5981_v32, %v3158_v4  ;;  %v3169_v47 = vand.u32 2147483647, %v6090_v21 }
 0x264   : > { %v3171_v56 = vand.u32 2147483648, %v6090_v21  ;;  %v3199_v36 = vand.u32 2147483647, %v6092_v10  ;;  %v3133_v35 = vmul.f32 %v4256_v14, %v3132_v51  ;;  %v3201_v16 = vand.u32 2147483648, %v6092_v10  ;;  %vm3137_vm8 = vmor %vm3135_vm6, %vm3136_vm9 }
 0x265   : > { %v2931_v13 = vadd.f32 %v2930_v5, %v2929_v22  ;;  %v2943_v34 = vadd.f32 %v2942_v61, %v2941_v52  ;;  %3611 = vst.msk [vmem:[%s6117_s12 + $0x8] sm:$0xff] %vm8450_vm15, %v3159_v30  ;;  %v3643_v26 = vmul.f32 %v3159_v30, %v4982_v37  ;;  %v3142_v27 = vor.u32 1.1754944e-38, %v3141_v55 }
 0x266   : > { %v6128_v3 = vpop.eup %4259  ;;  %vm3165_vm11 = vweird.f32 %v6090_v21  ;;  %v2629_v32 = vrot.slane %v2628_v63, 4  ;;  %v3134_v53 = vadd.f32 %v4256_v14, %v3133_v35  ;;  %vm3195_vm13 = vweird.f32 %v6092_v10 }
 0x267   : > { %v4262_v33 = vpop.eup %4261  ;;  %v2932_v43 = vrot.slane %v2931_v13, 1  ;;  %v2944_v8 = vrot.slane %v2943_v34, 2  ;;  %v2955_v0 = vsel %vm8450_vm15, %v6128_v3, 0.0  ;;  %v3681_v25 = vsel %vm8450_vm15, %v3643_v26, 0.0 }
 0x268   : > { %v4264_v1 = vpop.eup %4263  ;;  %v3161_v37 = vmul.f32 %v4262_v33, %v6090_v21  ;;  %vm6142_vm1 = vcmp.eq.f32.partialorder %v3169_v47, 8.507059e+37  ;;  %v3172_v22 = vor.u32 1.1754944e-38, %v3171_v56  ;;  %v2956_v42 = vrot.slane %v2955_v0, 4 }
 0x269   : > { %v3682_v52 = vrot.slane %v3681_v25, 4  ;;  %v3138_v31 = vsel %vm3137_vm8, %v4256_v14, %v3134_v53  ;;  %v3191_v44 = vmul.f32 %v4264_v1, %v6092_v10  ;;  %vm6147_vm3 = vcmp.eq.f32.partialorder %v3199_v36, 8.507059e+37 }
 0x26a   : > { %v3202_v5 = vor.u32 1.1754944e-38, %v3201_v16  ;;  %vm8455_vm4 = vcmask 0   ;;  %v3143_v39 = vsel %vm6104_vm2, %v3142_v27, %v3138_v31  ;;  %v3162_v61 = vsub.f32 1.0, %v3161_v37 }
 0x26b   : > { %v6153_v23 = vadd.f32 %v2932_v43, %v2931_v13  ;;  %v2945_v55 = vadd.f32 %v2944_v8, %v2943_v34  ;;  %v3683_v4 = vadd.f32 %v3682_v52, %v3681_v25  ;;  %v3144_v51 = vmul.f32 %v6018_v57, %v3143_v39  ;;  %v8604_v39 = vld [vmem:[#allocation2_spill] sm:$0xff] }
 0x26c   : > { %v3192_v14 = vsub.f32 1.0, %v3191_v44  ;;  %v2957_v30 = vadd.f32 %v2956_v42, %v2955_v0  ;;  %v3163_v47 = vmul.f32 %v4262_v33, %v3162_v61  ;;  %vm3166_vm7 = vweird.f32 %v4262_v33 }
 0x26d   : > { %4265 = vrcp.f32 %v6153_v23  ;;  %v2630_v56 = vmax.f32 %v2628_v63, %v2629_v32  ;;  %v3684_v36 = vrot.slane %v3683_v4, 2  ;;  %3610 = vst.msk [vmem:[%s6117_s12] sm:$0xff] %vm8450_vm15, %v3144_v51  ;;  %v3642_v41 = vmul.f32 %v3144_v51, %v4964_v62  ;;  %vm3167_vm6 = vmor %vm3165_vm11, %vm3166_vm7 }
 0x26e   : > { %v3193_v35 = vmul.f32 %v4264_v1, %v3192_v14  ;;  %vm3196_vm14 = vweird.f32 %v4264_v1  ;;  %v3164_v16 = vadd.f32 %v4262_v33, %v3163_v47  ;;  %v3184_v13 = vand.u32 2147483647, %v6153_v23 }
 0x26f   : > { %v2946_v34 = vrot.slane %v2945_v55, 1  ;;  %v2958_v26 = vrot.slane %v2957_v30, 2  ;;  %v3685_v57 = vadd.f32 %v3684_v36, %v3683_v4  ;;  %v3674_v27 = vsel %vm8450_vm15, %v3642_v41, 0.0  ;;  %vm3197_vm5 = vmor %vm3195_vm13, %vm3196_vm14 }
 0x270   : > { %v3194_v63 = vadd.f32 %v4264_v1, %v3193_v35  ;;  %v3186_v32 = vand.u32 2147483648, %v6153_v23  ;;  %v3675_v53 = vrot.slane %v3674_v27, 4  ;;  %v3168_v43 = vsel %vm3167_vm6, %v4262_v33, %v3164_v16 }
 0x271   : > { %v6167_v62 = vadd.f32 %v2946_v34, %v2945_v55  ;;  %v2959_v8 = vadd.f32 %v2958_v26, %v2957_v30  ;;  %v3686_v0 = vrot.slane %v3685_v57, 1  ;;  %v3173_v25 = vsel %vm6142_vm1, %v3172_v22, %v3168_v43 }
 0x272   : > { %v3198_v37 = vsel %vm3197_vm5, %v4264_v1, %v3194_v63  ;;  %v2631_v42 = vrot.slane %v2630_v56, 2  ;;  %v3676_v33 = vadd.f32 %v3675_v53, %v3674_v27  ;;  %v3174_v10 = vmul.f32 %v6038_v50, %v3173_v25 }
 0x273   : > { %v4266_v21 = vpop.eup %4265  ;;  %v3203_v52 = vsel %vm6147_vm3, %v3202_v5, %v3198_v37  ;;  %4267 = vrcp.f32 %v6167_v62  ;;  %v6183_v60 = vadd.f32 %v5812_v58, %v6043_v38  ;;  %v3687_v1 = vadd.f32 %v3686_v0, %v3685_v57  ;;  %v8605_v38 = vld [vmem:[#allocation4_spill] sm:$0xff] }
 0x274   : > { %v3204_v22 = vmul.f32 %v6040_v12, %v3203_v52  ;;  %v3176_v31 = vmul.f32 %v4266_v21, %v6153_v23  ;;  %v3677_v44 = vrot.slane %v3676_v33, 2  ;;  %3612 = vst.msk [vmem:[%s6117_s12 + $0x10] sm:$0xff] %vm8450_vm15, %v3174_v10  ;;  %v3644_v50 = vmul.f32 %v3174_v10, %v8604_v39 }
 0x275   : > { %vm3180_vm2 = vweird.f32 %v6153_v23  ;;  %v6192_v24 = vadd.f32 1.0, %v6110_v20  ;;  %3900 = vst.msk [vmem:[%s6175_s16 + $0x1] sm:$0x1] %vm8455_vm4, %v3687_v1  ;;  %vm6197_vm9 = vcmp.eq.f32.partialorder %v3184_v13, 8.507059e+37  ;;  %v2960_v12 = vrot.slane %v2959_v8, 1 }
 0x276   : > { %v3646_v5 = vmul.f32 %v3204_v22, %v8605_v38  ;;  %v3177_v61 = vsub.f32 1.0, %v3176_v31  ;;  %v3678_v4 = vadd.f32 %v3677_v44, %v3676_v33  ;;  %v3688_v51 = vsel %vm8450_vm15, %v3644_v50, 0.0  ;;  %3614 = vst.msk [vmem:[%s6117_s12 + $0x20] sm:$0xff] %vm8450_vm15, %v3204_v22  ;;  %v8610_v44 = vld [vmem:[#allocation3_spill] sm:$0xff]  ;;  %v1014_v38 = vpop.xlane.xlu0 %1013 }
 0x277   : > { %v3187_v14 = vor.u32 1.1754944e-38, %v3186_v32  ;;  %v2632_v30 = vmax.f32 %v2630_v56, %v2631_v42  ;;  %v3689_v47 = vrot.slane %v3688_v51, 4  ;;  %vm3181_vm11 = vweird.f32 %v4266_v21 }
 0x278   : > { %v3702_v20 = vsel %vm8450_vm15, %v3646_v5, 0.0  ;;  %v3178_v36 = vmul.f32 %v4266_v21, %v3177_v61  ;;  %v3679_v35 = vrot.slane %v3678_v4, 1  ;;  %v6205_v13 = vadd.f32 %v2960_v12, %v2959_v8  ;;  %vm3182_vm8 = vmor %vm3180_vm2, %vm3181_vm11 }
 0x279   : > { %v4268_v41 = vpop.eup %4267  ;;  %v3703_v16 = vrot.slane %v3702_v20, 4  ;;  %v2633_v34 = vrot.slane %v2632_v30, 1  ;;  %v3690_v26 = vadd.f32 %v3689_v47, %v3688_v51  ;;  %vm3210_vm13 = vweird.f32 %v6167_v62 }
 0x27a   : > { %v3179_v57 = vadd.f32 %v4266_v21, %v3178_v36  ;;  %v3206_v27 = vmul.f32 %v4268_v41, %v6167_v62  ;;  %v3680_v63 = vadd.f32 %v3679_v35, %v3678_v4  ;;  %v3214_v32 = vand.u32 2147483647, %v6167_v62 }
 0x27b   : > { %v3704_v56 = vadd.f32 %v3703_v16, %v3702_v20  ;;  %4269 = vrcp.f32 %v6205_v13  ;;  %v3691_v53 = vrot.slane %v3690_v26, 2  ;;  %v3216_v0 = vand.u32 2147483648, %v6167_v62 }
 0x27c   : > { %v3183_v43 = vsel %vm3182_vm8, %v4266_v21, %v3179_v57  ;;  %v3207_v8 = vsub.f32 1.0, %v3206_v27  ;;  %3899 = vst.msk [vmem:[%s6175_s16] sm:$0x1] %vm8455_vm4, %v3680_v63  ;;  %vm3211_vm1 = vweird.f32 %v4268_v41  ;;  %v2634_v42 = vmax.f32 %v2632_v30, %v2633_v34  ;;  %v1011_v34 = vpop.xlane.xlu2 %1010 }
 0x27d   : > { %v3705_v25 = vrot.slane %v3704_v56, 2  ;;  %v3188_v37 = vsel %vm6197_vm9, %v3187_v14, %v3183_v43  ;;  %v3692_v23 = vadd.f32 %v3691_v53, %v3690_v26  ;;  %v3244_v52 = vand.u32 2147483647, %v6205_v13  ;;  %vm3212_vm7 = vmor %vm3210_vm13, %vm3211_vm1  ;;  %v8617_v43 = vld [vmem:[#allocation6_spill] sm:$0xff] }
 0x27e   : > { %v3189_v33 = vmul.f32 %v6064_v18, %v3188_v37  ;;  %v3208_v10 = vmul.f32 %v4268_v41, %v3207_v8  ;;  %vm6220_vm3 = vcmp.eq.f32.partialorder %v3214_v32, 8.507059e+37  ;;  %v2816_v22 = vsub.f32 %v6096_v45, %v2634_v42  ;;  %v8613_v32 = vld [vmem:[#allocation33_spill] sm:$0xff] }
 0x27f   : > { %v3706_v1 = vadd.f32 %v3705_v25, %v3704_v56  ;;  %4271 = vrcp.f32 %v6192_v24  ;;  %v3693_v31 = vrot.slane %v3692_v23, 1  ;;  %v3246_v18 = vand.u32 2147483648, %v6205_v13  ;;  %v1017_v56 = vpop.xlane.xlu1 %1016 }
 0x280   : > { %3613 = vst.msk [vmem:[%s6117_s12 + $0x18] sm:$0xff] %vm8450_vm15, %v3189_v33  ;;  %v3645_v39 = vmul.f32 %v3189_v33, %v8610_v44  ;;  %v3209_v50 = vadd.f32 %v4268_v41, %v3208_v10  ;;  %v3217_v55 = vor.u32 1.1754944e-38, %v3216_v0  ;;  %vm3240_vm14 = vweird.f32 %v6205_v13 }
 0x281   : > { %v4270_v5 = vpop.eup %4269  ;;  %v3707_v61 = vrot.slane %v3706_v1, 1  ;;  %v2854_v45 = vmul.f32 1.442695, %v2816_v22  ;;  %v3694_v12 = vadd.f32 %v3693_v31, %v3692_v23  ;;  %vm6236_vm6 = vcmp.eq.f32.partialorder %v3244_v52, 8.507059e+37  ;;  %v8618_v22 = vld [vmem:[#allocation34_spill] sm:$0xff] }
 0x282   : > { %v3695_v4 = vsel %vm8450_vm15, %v3645_v39, 0.0  ;;  %v3213_v51 = vsel %vm3212_vm7, %v4268_v41, %v3209_v50  ;;  %v3236_v14 = vmul.f32 %v4270_v5, %v6205_v13  ;;  %v1564_v36 = vand.u32 2147483648, %v6192_v24 }
 0x283   : > { %v3708_v47 = vadd.f32 %v3707_v61, %v3706_v1  ;;  %v3696_v20 = vrot.slane %v3695_v4, 4  ;;  %v3218_v62 = vsel %vm6220_vm3, %v3217_v55, %v3213_v51  ;;  %vm2242_vm5 = vweird.f32 %v5666_v29  ;;  %3901 = vst.msk [vmem:[%s6175_s16 + $0x2] sm:$0x1] %vm8455_vm4, %v3694_v12  ;;  %v1023_v12 = vpop.xlane.xlu0 %1022 }
 0x284   : > { %v3219_v41 = vmul.f32 %v6087_v54, %v3218_v62  ;;  %v3237_v35 = vsub.f32 1.0, %v3236_v14  ;;  %v3247_v16 = vor.u32 1.1754944e-38, %v3246_v18  ;;  %4273 = vpow2.f32 %v2854_v45 }
 0x285   : > { %v6247_v26 = vpop.eup %4271  ;;  %vm2227_vm2 = vweird.f32 %v5812_v58  ;;  %3903 = vst.msk [vmem:[%s6175_s16 + $0x4] sm:$0x1] %vm8455_vm4, %v3708_v47  ;;  %v3697_v57 = vadd.f32 %v3696_v20, %v3695_v4  ;;  %vm1558_vm9 = vweird.f32 %v6192_v24  ;;  %v1562_v27 = vand.u32 2147483647, %v6192_v24 }
 0x286   : > { %v1089_v63 = vadd.f32 %v5463_v2, %v1014_v38  ;;  %v8614_v54 = vand.u32 2147483647, %v8613_v32  ;;  %vm2241_vm13 = vweird.f32 %v5595_v6  ;;  %3615 = vst.msk [vmem:[%s6117_s12 + $0x28] sm:$0xff] %vm8450_vm15, %v3219_v41  ;;  %v3647_v8 = vmul.f32 %v3219_v41, %v8617_v43 }
 0x287   : > { %v3238_v0 = vmul.f32 %v4270_v5, %v3237_v35  ;;  %vm3241_vm8 = vweird.f32 %v4270_v5  ;;  %v1554_v25 = vmul.f32 %v6247_v26, %v6192_v24  ;;  %v3698_v37 = vrot.slane %v3697_v57, 2 }
 0x288   : > { %vm6257_vm11 = vcmp.eq.f32.partialorder %v8614_v54, 8.507059e+37  ;;  %v1565_v42 = vor.u32 1.1754944e-38, %v1564_v36  ;;  %v4067_v23 = vmul.f32 -1.442695, %v1089_v63  ;;  %v1088_v33 = vadd.f32 %v5463_v2, %v1011_v34  ;;  %vm3242_vm7 = vmor %vm3240_vm14, %vm3241_vm8  ;;  %v1026_v54 = vpop.xlane.xlu1 %1025 }
 0x289   : > { %v3709_v10 = vsel %vm8450_vm15, %v3647_v8, 0.0  ;;  %v3239_v52 = vadd.f32 %v4270_v5, %v3238_v0  ;;  %v1555_v1 = vsub.f32 1.0, %v1554_v25  ;;  %v1090_v21 = vadd.f32 %v5463_v2, %v1017_v56  ;;  %v8641_v25 = vld [vmem:[#allocation38_spill] sm:$0xff] }
 0x28a   : > { %v8619_v31 = vand.u32 2147483647, %v8618_v22  ;;  %v3699_v39 = vadd.f32 %v3698_v37, %v3697_v57  ;;  %v3710_v50 = vrot.slane %v3709_v10, 4  ;;  %4275 = vpow2.f32 %v4067_v23  ;;  %v6279_v38 = vpop.eup %4273  ;;  %v8633_v57 = vld [vmem:[#allocation7_spill] sm:$0xff]  ;;  %v8643_v23 = vld [vmem:[#allocation36_spill] sm:$0xff] }
 0x28b   : > { %v4066_v18 = vmul.f32 -1.442695, %v1088_v33  ;;  %v3243_v61 = vsel %vm3242_vm7, %v4270_v5, %v3239_v52  ;;  %v1556_v55 = vmul.f32 %v6247_v26, %v1555_v1  ;;  %vm1559_vm1 = vweird.f32 %v6247_v26 }
 0x28c   : > { %vm6273_vm3 = vcmp.eq.f32.partialorder %v8619_v31, 8.507059e+37  ;;  %v4068_v45 = vmul.f32 -1.442695, %v1090_v21  ;;  %v3700_v4 = vrot.slane %v3699_v39, 1  ;;  %v3711_v51 = vadd.f32 %v3710_v50, %v3709_v10 }
 0x28d   : > { %v3248_v14 = vsel %vm6236_vm6, %v3247_v16, %v3243_v61  ;;  %v2948_v13 = vsel %vm8450_vm15, %v6279_v38, 0.0  ;;  %v8622_v47 = vand.u32 2147483647, %v5458_v17  ;;  %v8625_v5 = vand.u32 2147483647, %v5477_v15  ;;  %vm6305_vm6 = vmor %vm1558_vm9, %vm1559_vm1 }
 0x28e   : > { %v3249_v36 = vmul.f32 %v6128_v3, %v3248_v14  ;;  %v2949_v41 = vrot.slane %v2948_v13, 4  ;;  %v1557_v30 = vadd.f32 %v6247_v26, %v1556_v55  ;;  %4277 = vpow2.f32 %v4066_v18  ;;  %vm6326_vm1 = vmor %vm2241_vm13, %vm2242_vm5 }
 0x28f   : > { %vm6289_vm14 = vcmp.eq.f32.partialorder %v8622_v47, 8.507059e+37  ;;  %vm6295_vm8 = vcmp.eq.f32.partialorder %v8625_v5, 8.507059e+37  ;;  %v3701_v35 = vadd.f32 %v3700_v4, %v3699_v39  ;;  %v3712_v16 = vrot.slane %v3711_v51, 2  ;;  %v1020_v39 = vpop.xlane.xlu2 %1019  ;;  %v8650_v4 = vld [vmem:[#allocation39_spill] sm:$0xff] }
 0x290   : > { %4279 = vpow2.f32 %v4068_v45  ;;  %v1092_v15 = vadd.f32 %v5463_v2, %v1023_v12  ;;  %v8630_v3 = vand.u32 2147483647, %v5595_v6  ;;  %3617 = vst.msk [vmem:[%s6117_s12 + $0x38] sm:$0xff] %vm8450_vm15, %v3249_v36  ;;  %v3649_v63 = vmul.f32 %v3249_v36, %v8633_v57  ;;  %v4276_v32 = vpop.eup %4275  ;;  %v8648_v45 = vld [vmem:[#allocation42_spill] sm:$0xff]  ;;  %v8653_v36 = vld [vmem:[#allocation43_spill] sm:$0xff] }
 0x291   : > { %v2950_v56 = vadd.f32 %v2949_v41, %v2948_v13  ;;  %v1561_v24 = vsel %vm6305_vm6, %v6247_v26, %v1557_v30  ;;  %vm1563_vm9 = vcmp.eq.f32.partialorder %v1562_v27, 8.507059e+37  ;;  %v8636_v43 = vand.u32 2147483647, %v5713_v59  ;;  %3902 = vst.msk [vmem:[%s6175_s16 + $0x3] sm:$0x1] %vm8455_vm4, %v3701_v35  ;;  %v8640_v27 = vld [vmem:[#allocation35_spill] sm:$0xff] }
 0x292   : > { %vm6312_vm7 = vcmp.eq.f32.partialorder %v8630_v3, 8.507059e+37  ;;  %v3713_v0 = vadd.f32 %v3712_v16, %v3711_v51  ;;  %v8642_v37 = vsel %vm5648_vm0, %v8640_v27, %v8641_v25  ;;  %v1566_v33 = vsel %vm1563_vm9, %v1565_v42, %v1561_v24  ;;  %v8655_v30 = vld [vmem:[#allocation45_spill] sm:$0xff] }
 0x293   : > { %vm6332_vm15 = vcmp.eq.f32.partialorder %v8636_v43, 8.507059e+37  ;;  %v2174_v6 = vsel %vm6257_vm11, %v8643_v23, %v8642_v37  ;;  %v4070_v10 = vmul.f32 -1.442695, %v1092_v15  ;;  %vm8644_vm5 = vweird.f32 %v5713_v59  ;;  %v8657_v16 = vld [vmem:[#allocation41_spill] sm:$0xff] }
 0x294   : > { %vm6350_vm13 = vmor %vm8644_vm5, %vm2227_vm2  ;;  %vm8647_vm6 = vcmask 7168   ;;  %v2951_v21 = vrot.slane %v2950_v56, 2  ;;  %v2529_v22 = vadd.f32 %v2174_v6, %v1566_v33  ;;  %v6355_v31 = vadd.f32 1.0, %v4276_v32  ;;  %v4278_v18 = vpop.eup %4277 }
 0x295   : > { %v3723_v1 = vsel %vm8647_vm6, %v3649_v63, 0.0  ;;  %v2244_v53 = vsel %vm6326_vm1, %v5666_v29, %v6024_v28  ;;  %v2229_v59 = vsel %vm6350_vm13, %v5812_v58, %v6183_v60  ;;  %v3714_v42 = vrot.slane %v3713_v0, 1  ;;  %vm8651_vm0 = vmmov %vm8647_vm6 }
 0x296   : > { %v3724_v50 = vrot.slane %v3723_v1, 4  ;;  %v2952_v61 = vadd.f32 %v2951_v21, %v2950_v56  ;;  %v6365_v55 = vmul.f32 0.5, %v2529_v22  ;;  %v8649_v12 = vsel %vm5717_vm10, %v5539_v48, %v8648_v45  ;;  %v4280_v58 = vpop.eup %4279 }
 0x297   : > { %v6375_v29 = vsel %vm6273_vm3, %v8650_v4, %v8649_v12  ;;  %4281 = vrcp.f32 %v6355_v31  ;;  %v3715_v28 = vadd.f32 %v3714_v42, %v3713_v0  ;;  %v1091_v51 = vadd.f32 %v5463_v2, %v1020_v39 }
 0x298   : > { %v3725_v60 = vadd.f32 %v3724_v50, %v3723_v1  ;;  %4283 = vpow2.f32 %v4070_v10  ;;  %v2953_v14 = vrot.slane %v2952_v61, 1  ;;  %v2642_v9 = vsel %vm8651_vm0, %v6365_v55, -inf }
 0x299   : > { %v6381_v13 = vadd.f32 1.0, %v4278_v18  ;;  %v6383_v48 = vadd.f32 1.0, %v4280_v58  ;;  %3904 = vst.msk [vmem:[%s6175_s16 + $0x5] sm:$0x1] %vm8455_vm4, %v3715_v28  ;;  %v2643_v47 = vrot.slane %v2642_v9, 4  ;;  %v8652_v5 = vsel %vm5776_vm12, %v5597_v49, %v5750_v7 }
 0x29a   : > { %v3726_v44 = vrot.slane %v3725_v60, 2  ;;  %v6395_v41 = vsel %vm6295_vm8, %v8653_v36, %v8652_v5  ;;  %vm8654_vm10 = vnez %v8561_v40  ;;  %v6407_v15 = vadd.f32 %v2953_v14, %v2952_v61  ;;  %v8658_v40 = vld [vmem:[#allocation46_spill] sm:$0xff] }
 0x29b   : > { %v8656_v35 = vsel %vm8654_vm10, %v5580_v19, %v8655_v30  ;;  %v1592_v46 = vand.u32 2147483647, %v6355_v31  ;;  %v1594_v49 = vand.u32 2147483648, %v6355_v31  ;;  %4285 = vrcp.f32 %v6381_v13 }
 0x29c   : > { %v6405_v17 = vsel %vm6289_vm14, %v8657_v16, %v8656_v35  ;;  %v3727_v7 = vadd.f32 %v3726_v44, %v3725_v60  ;;  %v2644_v62 = vmax.f32 %v2642_v9, %v2643_v47  ;;  %4287 = vrcp.f32 %v6383_v48 }
 0x29d   : > { %v6416_v19 = vsel %vm6312_vm7, %v8658_v40, %v2244_v53  ;;  %v4282_v20 = vpop.eup %4281  ;;  %4289 = vrcp.f32 %v6407_v15  ;;  %vm1588_vm12 = vweird.f32 %v6355_v31  ;;  %v6423_v3 = vsel %vm6332_vm15, %v6005_v11, %v2229_v59 }
 0x29e   : > { %v4069_v57 = vmul.f32 -1.442695, %v1091_v51  ;;  %v4284_v63 = vpop.eup %4283  ;;  %v3728_v56 = vrot.slane %v3727_v7, 1  ;;  %v3231_v24 = vand.u32 2147483648, %v6407_v15  ;;  %v2645_v32 = vrot.slane %v2644_v62, 2 }
 0x29f   : > { %v1584_v34 = vmul.f32 %v4282_v20, %v6355_v31  ;;  %vm6427_vm2 = vcmp.eq.f32.partialorder %v1592_v46, 8.507059e+37  ;;  %v1595_v43 = vor.u32 1.1754944e-38, %v1594_v49  ;;  %v1577_v0 = vand.u32 2147483647, %v6381_v13 }
 0x2a0   : > { %v1579_v8 = vand.u32 2147483648, %v6381_v13  ;;  %v3729_v11 = vadd.f32 %v3728_v56, %v3727_v7  ;;  %v3229_v26 = vand.u32 2147483647, %v6407_v15  ;;  %v2646_v27 = vmax.f32 %v2644_v62, %v2645_v32 }
 0x2a1   : > { %v1585_v25 = vsub.f32 1.0, %v1584_v34  ;;  %v4286_v37 = vpop.eup %4285  ;;  %vm1589_vm15 = vweird.f32 %v4282_v20  ;;  %vm1573_vm11 = vweird.f32 %v6381_v13  ;;  %v6435_v23 = vadd.f32 1.0, %v4284_v63 }
 0x2a2   : > { %4291 = vpow2.f32 %v4069_v57  ;;  %v4288_v6 = vpop.eup %4287  ;;  %3906 = vst.msk [vmem:[%s6175_s16 + $0x7] sm:$0x1] %vm8455_vm4, %v3729_v11  ;;  %vm3225_vm3 = vweird.f32 %v6407_v15  ;;  %v3232_v33 = vor.u32 1.1754944e-38, %v3231_v24  ;;  %v2647_v10 = vrot.slane %v2646_v27, 1  ;;  %vm1590_vm9 = vmor %vm1588_vm12, %vm1589_vm15 }
 0x2a3   : > { %v1586_v52 = vmul.f32 %v4282_v20, %v1585_v25  ;;  %v1569_v1 = vmul.f32 %v4286_v37, %v6381_v13  ;;  %v4290_v21 = vpop.eup %4289  ;;  %vm6441_vm14 = vcmp.eq.f32.partialorder %v1577_v0, 8.507059e+37  ;;  %v1580_v39 = vor.u32 1.1754944e-38, %v1579_v8 }
 0x2a4   : > { %v1599_v53 = vmul.f32 %v4288_v6, %v6383_v48  ;;  %vm1603_vm8 = vweird.f32 %v6383_v48  ;;  %v1607_v59 = vand.u32 2147483647, %v6383_v48  ;;  %v3221_v42 = vmul.f32 %v4290_v21, %v6407_v15 }
 0x2a5   : > { %vm6449_vm7 = vcmp.eq.f32.partialorder %v3229_v26, 8.507059e+37  ;;  %v2648_v18 = vmax.f32 %v2646_v27, %v2647_v10  ;;  %v1587_v61 = vadd.f32 %v4282_v20, %v1586_v52  ;;  %v1609_v45 = vand.u32 2147483648, %v6383_v48 }
 0x2a6   : > { %v1570_v12 = vsub.f32 1.0, %v1569_v1  ;;  %vm1574_vm1 = vweird.f32 %v4286_v37  ;;  %v1600_v4 = vsub.f32 1.0, %v1599_v53  ;;  %4293 = vrcp.f32 %v6435_v23 }
 0x2a7   : > { %v3222_v58 = vsub.f32 1.0, %v3221_v42  ;;  %v2818_v28 = vsub.f32 %v6365_v55, %v2648_v18  ;;  %v1591_v60 = vsel %vm1590_vm9, %v4282_v20, %v1587_v61  ;;  %vm1604_vm5 = vweird.f32 %v4288_v6  ;;  %vm6469_vm0 = vmor %vm1573_vm11, %vm1574_vm1 }
 0x2a8   : > { %v4292_v51 = vpop.eup %4291  ;;  %v1596_v14 = vsel %vm6427_vm2, %v1595_v43, %v1591_v60  ;;  %v1571_v9 = vmul.f32 %v4286_v37, %v1570_v12  ;;  %v1601_v44 = vmul.f32 %v4288_v6, %v1600_v4  ;;  %vm6461_vm13 = vcmp.eq.f32.partialorder %v1607_v59, 8.507059e+37  ;;  %vm1605_vm10 = vmor %vm1603_vm8, %vm1604_vm5 }
 0x2a9   : > { %v3223_v31 = vmul.f32 %v4290_v21, %v3222_v58  ;;  %vm3226_vm6 = vweird.f32 %v4290_v21  ;;  %v2858_v5 = vmul.f32 1.442695, %v2818_v28  ;;  %v2531_v36 = vadd.f32 %v6375_v29, %v1596_v14 }
 0x2aa   : > { %v1572_v30 = vadd.f32 %v4286_v37, %v1571_v9  ;;  %v1602_v35 = vadd.f32 %v4288_v6, %v1601_v44  ;;  %v1610_v16 = vor.u32 1.1754944e-38, %v1609_v45  ;;  %v6473_v46 = vadd.f32 1.0, %v4292_v51  ;;  %vm3227_vm12 = vmor %vm3225_vm3, %vm3226_vm6 }
 0x2ab   : > { %v3224_v49 = vadd.f32 %v4290_v21, %v3223_v31  ;;  %4295 = vpow2.f32 %v2858_v5  ;;  %v6475_v7 = vmul.f32 0.5, %v2531_v36  ;;  %v1639_v29 = vand.u32 2147483648, %v6435_v23 }
 0x2ac   : > { %v6481_v62 = vpop.eup %4293  ;;  %v1576_v13 = vsel %vm6469_vm0, %v4286_v37, %v1572_v30  ;;  %v1606_v40 = vsel %vm1605_vm10, %v4288_v6, %v1602_v35  ;;  %v1637_v20 = vand.u32 2147483647, %v6435_v23  ;;  %4297 = vrcp.f32 %v6473_v46 }
 0x2ad   : > { %v3228_v57 = vsel %vm3227_vm12, %v4290_v21, %v3224_v49  ;;  %vm8669_vm2 = vcmask 7168   ;;  %v1581_v63 = vsel %vm6441_vm14, %v1580_v39, %v1576_v13  ;;  %v1611_v56 = vsel %vm6461_vm13, %v1610_v16, %v1606_v40 }
 0x2ae   : > { %v2656_v48 = vsel %vm8669_vm2, %v6475_v7, -inf  ;;  %v3233_v15 = vsel %vm6449_vm7, %v3232_v33, %v3228_v57  ;;  %v2530_v32 = vadd.f32 %v6395_v41, %v1581_v63  ;;  %v2532_v34 = vadd.f32 %v6405_v17, %v1611_v56  ;;  %vm8672_vm14 = vmmov %vm8669_vm2  ;;  %v8681_v41 = vld [vmem:[#allocation47_spill] sm:$0xff] }
 0x2af   : > { %v2657_v24 = vrot.slane %v2656_v48, 4  ;;  %vm1633_vm15 = vweird.f32 %v6435_v23  ;;  %v3234_v43 = vmul.f32 %v6279_v38, %v3233_v15  ;;  %v1629_v0 = vmul.f32 %v6481_v62, %v6435_v23  ;;  %v8673_v38 = vld [vmem:[#allocation5_spill] sm:$0xff]  ;;  %vm8674_vm8 = vmmov %vm8669_vm2 }
 0x2b0   : > { %vm1634_vm11 = vweird.f32 %v6481_v62  ;;  %v1640_v8 = vor.u32 1.1754944e-38, %v1639_v29  ;;  %v6504_v26 = vmul.f32 0.5, %v2530_v32  ;;  %v6506_v27 = vmul.f32 0.5, %v2532_v34  ;;  %vm8675_vm7 = vmmov %vm8669_vm2 }
 0x2b1   : > { %v2658_v11 = vmax.f32 %v2656_v48, %v2657_v24  ;;  %vm6508_vm3 = vcmp.eq.f32.partialorder %v1637_v20, 8.507059e+37  ;;  %v1622_v17 = vand.u32 2147483647, %v6473_v46  ;;  %v6513_v25 = vpop.eup %4295  ;;  %3616 = vst.msk [vmem:[%s6117_s12 + $0x30] sm:$0xff] %vm8672_vm14, %v3234_v43  ;;  %v3648_v37 = vmul.f32 %v3234_v43, %v8673_v38  ;;  %vm8676_vm9 = vmmov %vm8669_vm2 }
 0x2b2   : > { %v1630_v6 = vsub.f32 1.0, %v1629_v0  ;;  %v1624_v33 = vand.u32 2147483648, %v6473_v46  ;;  %v1093_v10 = vadd.f32 %v5463_v2, %v1026_v54  ;;  %v4298_v52 = vpop.eup %4297  ;;  %v2962_v1 = vsel %vm8674_vm8, %v6513_v25, 0.0  ;;  %vm8677_vm5 = vmmov %vm8669_vm2 }
 0x2b3   : > { %v2659_v21 = vrot.slane %v2658_v11, 2  ;;  %v2649_v22 = vsel %vm8675_vm7, %v6504_v26, -inf  ;;  %v2663_v39 = vsel %vm8676_vm9, %v6506_v27, -inf  ;;  %vm1618_vm1 = vweird.f32 %v6473_v46  ;;  %vm1635_vm0 = vmor %vm1633_vm15, %vm1634_vm11 }
 0x2b4   : > { %v3716_v53 = vsel %vm8677_vm5, %v3648_v37, 0.0  ;;  %v2963_v59 = vrot.slane %v2962_v1, 4  ;;  %v2650_v42 = vrot.slane %v2649_v22, 4  ;;  %v2664_v50 = vrot.slane %v2663_v39, 4  ;;  %vm8680_vm12 = vmmov %vm8669_vm2 }
 0x2b5   : > { %v3717_v18 = vrot.slane %v3716_v53, 4  ;;  %v2660_v61 = vmax.f32 %v2658_v11, %v2659_v21  ;;  %v1631_v45 = vmul.f32 %v6481_v62, %v1630_v6  ;;  %v1614_v12 = vmul.f32 %v4298_v52, %v6473_v46  ;;  %v8682_v21 = vld [vmem:[#allocation44_spill] sm:$0xff]  ;;  %vm8683_vm15 = vmmov %vm8669_vm2 }
 0x2b6   : > { %vm6530_vm13 = vcmp.eq.f32.partialorder %v1622_v17, 8.507059e+37  ;;  %v2964_v58 = vadd.f32 %v2963_v59, %v2962_v1  ;;  %v2651_v28 = vmax.f32 %v2649_v22, %v2650_v42  ;;  %v2665_v60 = vmax.f32 %v2663_v39, %v2664_v50  ;;  %vm8684_vm8 = vmmov %vm8669_vm2 }
 0x2b7   : > { %vm1619_vm6 = vweird.f32 %v4298_v52  ;;  %v3718_v51 = vadd.f32 %v3717_v18, %v3716_v53  ;;  %v2661_v14 = vrot.slane %v2660_v61, 1  ;;  %v1632_v9 = vadd.f32 %v6481_v62, %v1631_v45  ;;  %vm8686_vm7 = vmmov %vm8669_vm2 }
 0x2b8   : > { %v1615_v44 = vsub.f32 1.0, %v1614_v12  ;;  %v2965_v47 = vrot.slane %v2964_v58, 2  ;;  %v2652_v31 = vrot.slane %v2651_v28, 2  ;;  %v2666_v5 = vrot.slane %v2665_v60, 2  ;;  %vm1620_vm10 = vmor %vm1618_vm1, %vm1619_vm6 }
 0x2b9   : > { %v1625_v36 = vor.u32 1.1754944e-38, %v1624_v33  ;;  %v3719_v30 = vrot.slane %v3718_v51, 2  ;;  %v2662_v55 = vmax.f32 %v2660_v61, %v2661_v14  ;;  %v1636_v35 = vsel %vm1635_vm0, %v6481_v62, %v1632_v9  ;;  %v1194_v14 = vpop.xlane.xlu0 %1193  ;;  %vm8689_vm5 = vmmov %vm8669_vm2 }
 0x2ba   : > { %v1616_v16 = vmul.f32 %v4298_v52, %v1615_v44  ;;  %v2966_v49 = vadd.f32 %v2965_v47, %v2964_v58  ;;  %v2653_v29 = vmax.f32 %v2651_v28, %v2652_v31  ;;  %v2667_v13 = vmax.f32 %v2665_v60, %v2666_v5  ;;  %vm8693_vm0 = vmmov %vm8669_vm2 }
 0x2bb   : > { %v1641_v40 = vsel %vm6508_vm3, %v1640_v8, %v1636_v35  ;;  %v3720_v20 = vadd.f32 %v3719_v30, %v3718_v51  ;;  %v2820_v57 = vsub.f32 %v6475_v7, %v2662_v55  ;;  %v4071_v62 = vmul.f32 -1.442695, %v1093_v10 }
 0x2bc   : > { %v2534_v48 = vadd.f32 %v6416_v19, %v1641_v40  ;;  %v1617_v63 = vadd.f32 %v4298_v52, %v1616_v16  ;;  %v2967_v23 = vrot.slane %v2966_v49, 1  ;;  %v2654_v56 = vrot.slane %v2653_v29, 1 }
 0x2bd   : > { %v2668_v15 = vrot.slane %v2667_v13, 1  ;;  %v3721_v24 = vrot.slane %v3720_v20, 1  ;;  %v2862_v32 = vmul.f32 1.442695, %v2820_v57  ;;  %v2253_v17 = vsub.f32 1.0, %v8681_v41 }
 0x2be   : > { %v6547_v34 = vmul.f32 0.5, %v2534_v48  ;;  %v1621_v54 = vsel %vm1620_vm10, %v4298_v52, %v1617_v63  ;;  %v6549_v43 = vadd.f32 %v2967_v23, %v2966_v49  ;;  %v2655_v7 = vmax.f32 %v2653_v29, %v2654_v56  ;;  %v8685_v49 = vld [vmem:[#allocation16_spill] sm:$0xff] }
 0x2bf   : > { %v2669_v0 = vmax.f32 %v2667_v13, %v2668_v15  ;;  %v1626_v19 = vsel %vm6530_vm13, %v1625_v36, %v1621_v54  ;;  %v3722_v8 = vadd.f32 %v3721_v24, %v3720_v20  ;;  %4299 = vpow2.f32 %v2862_v32 }
 0x2c0   : > { %v2677_v46 = vsel %vm8680_vm12, %v6547_v34, -inf  ;;  %v2533_v11 = vadd.f32 %v6423_v3, %v1626_v19  ;;  %4301 = vrcp.f32 %v6549_v43  ;;  %v2819_v38 = vsub.f32 %v6504_v26, %v2655_v7  ;;  %vm8694_vm12 = vmmov %vm8693_vm0 }
 0x2c1   : > { %3905 = vst.msk [vmem:[%s6175_s16 + $0x6] sm:$0x1] %vm8455_vm4, %v3722_v8  ;;  %v2821_v37 = vsub.f32 %v6506_v27, %v2669_v0  ;;  %v2678_v6 = vrot.slane %v2677_v46, 4  ;;  %4303 = vpow2.f32 %v4071_v62  ;;  %v2254_v22 = vmul.f32 %v8682_v21, %v2253_v17 }
 0x2c2   : > { %v6562_v33 = vmul.f32 0.5, %v2533_v11  ;;  %v2860_v10 = vmul.f32 1.442695, %v2819_v38  ;;  %vm2257_vm11 = vweird.f32 %v8682_v21  ;;  %v3259_v9 = vand.u32 2147483647, %v6549_v43  ;;  %v8687_v11 = vld [vmem:[#allocation32_spill] sm:$0xff] }
 0x2c3   : > { %v2864_v52 = vmul.f32 1.442695, %v2821_v37  ;;  %v2679_v1 = vmax.f32 %v2677_v46, %v2678_v6  ;;  %v6573_v12 = vadd.f32 %v8682_v21, %v2254_v22  ;;  %v3261_v44 = vand.u32 2147483648, %v6549_v43  ;;  %v8688_v37 = vld [vmem:[#allocation37_spill] sm:$0xff] }
 0x2c4   : > { %v2670_v3 = vsel %vm8669_vm2, %v6562_v33, -inf  ;;  %4305 = vpow2.f32 %v2860_v10  ;;  %vm3255_vm14 = vweird.f32 %v6549_v43  ;;  %v1256_v29 = vmul.f32 %v1194_v14, %v8685_v49 }
 0x2c5   : > { %v2671_v39 = vrot.slane %v2670_v3, 4  ;;  %v6567_v53 = vpop.eup %4299  ;;  %v2680_v59 = vrot.slane %v2679_v1, 2  ;;  %4307 = vpow2.f32 %v2864_v52  ;;  %v3262_v48 = vor.u32 1.1754944e-38, %v3261_v44 }
 0x2c6   : > { %v4302_v26 = vpop.eup %4301  ;;  %v2976_v27 = vsel %vm8683_vm15, %v6567_v53, 0.0  ;;  %vm3260_vm1 = vcmp.eq.f32.partialorder %v3259_v9, 8.507059e+37  ;;  %v2260_v6 = vand.u32 2147483647, %v8688_v37  ;;  %v2262_v10 = vand.u32 2147483648, %v8688_v37 }
 0x2c7   : > { %v2672_v42 = vmax.f32 %v2670_v3, %v2671_v39  ;;  %v3251_v50 = vmul.f32 %v4302_v26, %v6549_v43  ;;  %v2977_v18 = vrot.slane %v2976_v27, 4  ;;  %v2681_v61 = vmax.f32 %v2679_v1, %v2680_v59  ;;  %v4304_v45 = vpop.eup %4303 }
 0x2c8   : > { %v6575_v51 = vadd.f32 1.0, %v4304_v45  ;;  %vm3256_vm3 = vweird.f32 %v4302_v26  ;;  %vm2256_vm13 = vweird.f32 %v8688_v37  ;;  %vm2261_vm10 = vcmp.eq.f32.partialorder %v2260_v6, 8.507059e+37 }
 0x2c9   : > { %v2673_v4 = vrot.slane %v2672_v42, 2  ;;  %v3252_v58 = vsub.f32 1.0, %v3251_v50  ;;  %v2978_v28 = vadd.f32 %v2977_v18, %v2976_v27  ;;  %v2682_v60 = vrot.slane %v2681_v61, 1  ;;  %vm3257_vm9 = vmor %vm3255_vm14, %vm3256_vm3 }
 0x2ca   : > { %v6580_v31 = vpop.eup %4305  ;;  %4309 = vrcp.f32 %v6575_v51  ;;  %vm6611_vm6 = vmor %vm2256_vm13, %vm2257_vm11  ;;  %v2263_v18 = vor.u32 1.1754944e-38, %v2262_v10  ;;  %v1652_v45 = vand.u32 2147483647, %v6575_v51  ;;  %v1654_v14 = vand.u32 2147483648, %v6575_v51 }
 0x2cb   : > { %v2674_v47 = vmax.f32 %v2672_v42, %v2673_v4  ;;  %v3253_v5 = vmul.f32 %v4302_v26, %v3252_v58  ;;  %v2979_v36 = vrot.slane %v2978_v28, 2  ;;  %v2683_v30 = vmax.f32 %v2681_v61, %v2682_v60  ;;  %v6583_v55 = vpop.eup %4307 }
 0x2cc   : > { %v2969_v35 = vsel %vm8684_vm8, %v6580_v31, 0.0  ;;  %v2983_v57 = vsel %vm8686_vm7, %v6583_v55, 0.0  ;;  %vm1648_vm2 = vweird.f32 %v6575_v51  ;;  %vm6641_vm11 = vcmp.eq.f32.partialorder %v1652_v45, 8.507059e+37  ;;  %vm8699_vm7 = vmmov %vm8693_vm0 }
 0x2cd   : > { %v2675_v16 = vrot.slane %v2674_v47, 1  ;;  %v3254_v13 = vadd.f32 %v4302_v26, %v3253_v5  ;;  %v2980_v40 = vadd.f32 %v2979_v36, %v2978_v28  ;;  %v2970_v20 = vrot.slane %v2969_v35, 4 }
 0x2ce   : > { %v2984_v63 = vrot.slane %v2983_v57, 4  ;;  %v2823_v23 = vsub.f32 %v6547_v34, %v2683_v30  ;;  %v1289_v34 = vadd.f32 %v8687_v11, %v1256_v29 }
 0x2cf   : > { %v2676_v56 = vmax.f32 %v2674_v47, %v2675_v16  ;;  %v3258_v15 = vsel %vm3257_vm9, %v4302_v26, %v3254_v13  ;;  %v2981_v62 = vrot.slane %v2980_v40, 1  ;;  %v2971_v24 = vadd.f32 %v2970_v20, %v2969_v35 }
 0x2d0   : > { %v3263_v32 = vsel %vm3260_vm1, %v3262_v48, %v3258_v15  ;;  %v2985_v54 = vadd.f32 %v2984_v63, %v2983_v57  ;;  %v2868_v43 = vmul.f32 1.442695, %v2823_v23  ;;  %v6594_v0 = vpop.eup %4309  ;;  %v4105_v59 = vmul.f32 -1.442695, %v1289_v34 }
 0x2d1   : > { %v2822_v7 = vsub.f32 %v6562_v33, %v2676_v56  ;;  %v3264_v19 = vmul.f32 %v6513_v25, %v3263_v32  ;;  %v6597_v8 = vadd.f32 %v2981_v62, %v2980_v40  ;;  %v2972_v46 = vrot.slane %v2971_v24, 2  ;;  %v8690_v33 = vld [vmem:[#allocation9_spill] sm:$0xff] }
 0x2d2   : > { %v2986_v41 = vrot.slane %v2985_v54, 2  ;;  %4311 = vpow2.f32 %v2868_v43  ;;  %v1644_v38 = vmul.f32 %v6594_v0, %v6575_v51  ;;  %v2259_v26 = vsel %vm6611_vm6, %v8682_v21, %v6573_v12 }
 0x2d3   : > { %v2866_v17 = vmul.f32 1.442695, %v2822_v7  ;;  %3618 = vst.msk [vmem:[%s6117_s12 + $0x40] sm:$0xff] %vm8689_vm5, %v3264_v19  ;;  %v3650_v52 = vmul.f32 %v3264_v19, %v8690_v33  ;;  %4313 = vrcp.f32 %v6597_v8  ;;  %v2973_v25 = vadd.f32 %v2972_v46, %v2971_v24 }
 0x2d4   : > { %v2987_v1 = vadd.f32 %v2986_v41, %v2985_v54  ;;  %v1645_v39 = vsub.f32 1.0, %v1644_v38  ;;  %v3289_v21 = vand.u32 2147483647, %v6597_v8  ;;  %v3291_v12 = vand.u32 2147483648, %v6597_v8 }
 0x2d5   : > { %v3730_v22 = vsel %vm8693_vm0, %v3650_v52, 0.0  ;;  %4315 = vpow2.f32 %v2866_v17  ;;  %v2974_v42 = vrot.slane %v2973_v25, 1  ;;  %v2264_v44 = vsel %vm2261_vm10, %v2263_v18, %v2259_v26 }
 0x2d6   : > { %v3731_v27 = vrot.slane %v3730_v22, 4  ;;  %v2988_v50 = vrot.slane %v2987_v1, 1  ;;  %v1646_v61 = vmul.f32 %v6594_v0, %v1645_v39  ;;  %4317 = vpow2.f32 %v4105_v59 }
 0x2d7   : > { %v6624_v28 = vadd.f32 %v2974_v42, %v2973_v25  ;;  %vm1649_vm15 = vweird.f32 %v6594_v0  ;;  %v1655_v40 = vor.u32 1.1754944e-38, %v1654_v14  ;;  %vm3285_vm3 = vweird.f32 %v6597_v8  ;;  %v8700_v42 = vld [vmem:[#allocation10_spill] sm:$0xff]  ;;  %v1191_v14 = vpop.xlane.xlu2 %1190 }
 0x2d8   : > { %v6622_v4 = vpop.eup %4311  ;;  %v3732_v58 = vadd.f32 %v3731_v27, %v3730_v22  ;;  %v6626_v60 = vadd.f32 %v2988_v50, %v2987_v1  ;;  %v1647_v35 = vadd.f32 %v6594_v0, %v1646_v61  ;;  %vm6646_vm14 = vcmp.eq.f32.partialorder %v3289_v21, 8.507059e+37  ;;  %vm1650_vm9 = vmor %vm1648_vm2, %vm1649_vm15 }
 0x2d9   : > { %v4314_v9 = vpop.eup %4313  ;;  %4319 = vrcp.f32 %v6624_v28  ;;  %v2997_v36 = vsel %vm8694_vm12, %v6622_v4, 0.0  ;;  %v3292_v57 = vor.u32 1.1754944e-38, %v3291_v12  ;;  %vm3270_vm1 = vweird.f32 %v6624_v28  ;;  %vm8701_vm12 = vmmov %vm8693_vm0 }
 0x2da   : > { %v3733_v47 = vrot.slane %v3732_v58, 2  ;;  %v3281_v5 = vmul.f32 %v4314_v9, %v6597_v8  ;;  %4321 = vrcp.f32 %v6626_v60  ;;  %v2998_v48 = vrot.slane %v2997_v36, 4  ;;  %vm8702_vm15 = vmmov %vm8693_vm0 }
 0x2db   : > { %v6635_v30 = vpop.eup %4315  ;;  %vm3286_vm8 = vweird.f32 %v4314_v9  ;;  %v3274_v15 = vand.u32 2147483647, %v6624_v28  ;;  %v1651_v32 = vsel %vm1650_vm9, %v6594_v0, %v1647_v35  ;;  %v3276_v19 = vand.u32 2147483648, %v6624_v28  ;;  %vm8708_vm9 = vmmov %vm8693_vm0 }
 0x2dc   : > { %v3734_v16 = vadd.f32 %v3733_v47, %v3732_v58  ;;  %v3282_v29 = vsub.f32 1.0, %v3281_v5  ;;  %v2990_v51 = vsel %vm8699_vm7, %v6635_v30, 0.0  ;;  %v6652_v56 = vpop.eup %4317  ;;  %v2999_v62 = vadd.f32 %v2998_v48, %v2997_v36  ;;  %vm3287_vm5 = vmor %vm3285_vm3, %vm3286_vm8 }
 0x2dd   : > { %v2991_v24 = vrot.slane %v2990_v51, 4  ;;  %v1656_v46 = vsel %vm6641_vm11, %v1655_v40, %v1651_v32  ;;  %vm3300_vm13 = vweird.f32 %v6626_v60  ;;  %v3304_v6 = vand.u32 2147483647, %v6626_v60  ;;  %vm8704_vm8 = vmmov %vm8693_vm0 }
 0x2de   : > { %v3735_v63 = vrot.slane %v3734_v16, 1  ;;  %v3283_v23 = vmul.f32 %v4314_v9, %v3282_v29  ;;  %v3000_v17 = vrot.slane %v2999_v62, 2  ;;  %v2535_v10 = vadd.f32 %v2264_v44, %v1656_v46  ;;  %v8703_v29 = vld [vmem:[#allocation14_spill] sm:$0xff]  ;;  %vm8706_vm7 = vmmov %vm8693_vm0 }
 0x2df   : > { %v4320_v54 = vpop.eup %4319  ;;  %v2992_v38 = vadd.f32 %v2991_v24, %v2990_v51  ;;  %v3306_v22 = vand.u32 2147483648, %v6626_v60  ;;  %vm3275_vm2 = vcmp.eq.f32.partialorder %v3274_v15, 8.507059e+37  ;;  %v3277_v21 = vor.u32 1.1754944e-38, %v3276_v19  ;;  %v8707_v15 = vld [vmem:[#allocation12_spill] sm:$0xff] }
 0x2e0   : > { %v3736_v43 = vadd.f32 %v3735_v63, %v3734_v16  ;;  %v3284_v7 = vadd.f32 %v4314_v9, %v3283_v23  ;;  %v4322_v34 = vpop.eup %4321  ;;  %v3266_v41 = vmul.f32 %v4320_v54, %v6624_v28  ;;  %v3001_v52 = vadd.f32 %v3000_v17, %v2999_v62  ;;  %v8705_v23 = vld [vmem:[#allocation8_spill] sm:$0xff] }
 0x2e1   : > { %v3296_v37 = vmul.f32 %v4322_v34, %v6626_v60  ;;  %v2993_v25 = vrot.slane %v2992_v38, 2  ;;  %v6673_v39 = vmul.f32 0.5, %v2535_v10  ;;  %vm3271_vm6 = vweird.f32 %v4320_v54 }
 0x2e2   : > { %3907 = vst.msk [vmem:[%s6175_s16 + $0x8] sm:$0x1] %vm8455_vm4, %v3736_v43  ;;  %v3288_v0 = vsel %vm3287_vm5, %v4314_v9, %v3284_v7  ;;  %v3267_v8 = vsub.f32 1.0, %v3266_v41  ;;  %v3002_v26 = vrot.slane %v3001_v52, 1  ;;  %vm3301_vm10 = vweird.f32 %v4322_v34  ;;  %vm3272_vm11 = vmor %vm3270_vm1, %vm3271_vm6 }
 0x2e3   : > { %v3293_v33 = vsel %vm6646_vm14, %v3292_v57, %v3288_v0  ;;  %v3297_v3 = vsub.f32 1.0, %v3296_v37  ;;  %v2994_v27 = vadd.f32 %v2993_v25, %v2992_v38  ;;  %v2684_v61 = vsel %vm8701_vm12, %v6673_v39, -inf  ;;  %vm3302_vm3 = vmor %vm3300_vm13, %vm3301_vm10  ;;  %v1197_v25 = vpop.xlane.xlu1 %1196 }
 0x2e4   : > { %v3294_v1 = vmul.f32 %v6567_v53, %v3293_v33  ;;  %v3268_v59 = vmul.f32 %v4320_v54, %v3267_v8  ;;  %v6680_v53 = vadd.f32 %v3002_v26, %v3001_v52  ;;  %v2685_v44 = vrot.slane %v2684_v61, 4  ;;  %vm8709_vm1 = vmmov %vm8693_vm0 }
 0x2e5   : > { %v3298_v18 = vmul.f32 %v4322_v34, %v3297_v3  ;;  %v2995_v58 = vrot.slane %v2994_v27, 1  ;;  %v3307_v36 = vor.u32 1.1754944e-38, %v3306_v22  ;;  %vm3305_vm14 = vcmp.eq.f32.partialorder %v3304_v6, 8.507059e+37 }
 0x2e6   : > { %3620 = vst.msk [vmem:[%s6117_s12 + $0x50] sm:$0xff] %vm8693_vm0, %v3294_v1  ;;  %v3652_v50 = vmul.f32 %v3294_v1, %v8700_v42  ;;  %v3269_v45 = vadd.f32 %v4320_v54, %v3268_v59  ;;  %4323 = vrcp.f32 %v6680_v53  ;;  %v1255_v13 = vmul.f32 %v1191_v14, %v8703_v29 }
 0x2e7   : > { %v3299_v12 = vadd.f32 %v4322_v34, %v3298_v18  ;;  %v6690_v57 = vadd.f32 %v2995_v58, %v2994_v27  ;;  %v2686_v63 = vmax.f32 %v2684_v61, %v2685_v44  ;;  %v3334_v41 = vand.u32 2147483647, %v6680_v53 }
 0x2e8   : > { %v3744_v9 = vsel %vm8702_vm15, %v3652_v50, 0.0  ;;  %v3273_v5 = vsel %vm3272_vm11, %v4320_v54, %v3269_v45  ;;  %v1288_v43 = vadd.f32 %v8687_v11, %v1255_v13  ;;  %v3336_v0 = vand.u32 2147483648, %v6680_v53  ;;  %vm8715_vm11 = vmmov %vm8709_vm1 }
 0x2e9   : > { %v3745_v47 = vrot.slane %v3744_v9, 4  ;;  %v3278_v35 = vsel %vm3275_vm2, %v3277_v21, %v3273_v5  ;;  %v3303_v16 = vsel %vm3302_vm3, %v4322_v34, %v3299_v12  ;;  %4325 = vrcp.f32 %v6690_v57  ;;  %v8712_v5 = vld [vmem:[#allocation18_spill] sm:$0xff]  ;;  %vm8716_vm3 = vmmov %vm8709_vm1 }
 0x2ea   : > { %v3279_v40 = vmul.f32 %v6580_v31, %v3278_v35  ;;  %v3308_v20 = vsel %vm3305_vm14, %v3307_v36, %v3303_v16  ;;  %v2687_v24 = vrot.slane %v2686_v63, 2  ;;  %v6707_v8 = vadd.f32 1.0, %v6652_v56  ;;  %vm8717_vm14 = vmmov %vm8709_vm1 }
 0x2eb   : > { %v3746_v28 = vadd.f32 %v3745_v47, %v3744_v9  ;;  %v3309_v48 = vmul.f32 %v6583_v55, %v3308_v20  ;;  %v4104_v52 = vmul.f32 -1.442695, %v1288_v43  ;;  %vm3330_vm13 = vweird.f32 %v6680_v53 }
 0x2ec   : > { %3619 = vst.msk [vmem:[%s6117_s12 + $0x48] sm:$0xff] %vm8704_vm8, %v3279_v40  ;;  %v3651_v51 = vmul.f32 %v3279_v40, %v8705_v23  ;;  %v4324_v32 = vpop.eup %4323  ;;  %v2688_v37 = vmax.f32 %v2686_v63, %v2687_v24  ;;  %vm6713_vm6 = vcmp.eq.f32.partialorder %v3334_v41, 8.507059e+37  ;;  %v3337_v50 = vor.u32 1.1754944e-38, %v3336_v0  ;;  %v8713_v63 = vld [vmem:[#allocation13_spill] sm:$0xff]  ;;  %vm8721_vm8 = vmmov %vm8709_vm1 }
 0x2ed   : > { %v3747_v60 = vrot.slane %v3746_v28, 2  ;;  %3621 = vst.msk [vmem:[%s6117_s12 + $0x58] sm:$0xff] %vm8706_vm7, %v3309_v48  ;;  %v3653_v62 = vmul.f32 %v3309_v48, %v8707_v15  ;;  %v3326_v19 = vmul.f32 %v4324_v32, %v6680_v53  ;;  %vm3331_vm5 = vweird.f32 %v4324_v32  ;;  %v1206_v15 = vpop.xlane.xlu1 %1205  ;;  %vm8722_vm7 = vmmov %vm8709_vm1 }
 0x2ee   : > { %v3737_v54 = vsel %vm8708_vm9, %v3651_v51, 0.0  ;;  %v2689_v27 = vrot.slane %v2688_v37, 1  ;;  %vm3332_vm0 = vmor %vm3330_vm13, %vm3331_vm5  ;;  %v3319_v45 = vand.u32 2147483647, %v6690_v57  ;;  %v3321_v58 = vand.u32 2147483648, %v6690_v57  ;;  %v1200_v51 = vpop.xlane.xlu2 %1199 }
 0x2ef   : > { %v3748_v31 = vadd.f32 %v3747_v60, %v3746_v28  ;;  %v3738_v55 = vrot.slane %v3737_v54, 4  ;;  %v3751_v7 = vsel %vm8709_vm1, %v3653_v62, 0.0  ;;  %v3327_v38 = vsub.f32 1.0, %v3326_v19  ;;  %v4326_v6 = vpop.eup %4325  ;;  %v1203_v28 = vpop.xlane.xlu0 %1202  ;;  %v8720_v19 = vld [vmem:[#allocation21_spill] sm:$0xff] }
 0x2f0   : > { %v3752_v34 = vrot.slane %v3751_v7, 4  ;;  %v3311_v22 = vmul.f32 %v4326_v6, %v6690_v57  ;;  %v2690_v14 = vmax.f32 %v2688_v37, %v2689_v27  ;;  %vm3316_vm10 = vweird.f32 %v4326_v6 }
 0x2f1   : > { %v3749_v46 = vrot.slane %v3748_v31, 1  ;;  %v3739_v17 = vadd.f32 %v3738_v55, %v3737_v54  ;;  %v3328_v3 = vmul.f32 %v4324_v32, %v3327_v38  ;;  %v1257_v36 = vmul.f32 %v1197_v25, %v8712_v5  ;;  %v8718_v54 = vld [vmem:[#allocation11_spill] sm:$0xff]  ;;  %v8719_v55 = vld [vmem:[#allocation17_spill] sm:$0xff] }
 0x2f2   : > { %v3753_v33 = vadd.f32 %v3752_v34, %v3751_v7  ;;  %v3312_v18 = vsub.f32 1.0, %v3311_v22  ;;  %v2824_v47 = vsub.f32 %v6673_v39, %v2690_v14  ;;  %vm3315_vm12 = vweird.f32 %v6690_v57  ;;  %v8714_v57 = vld [vmem:[#allocation19_spill] sm:$0xff] }
 0x2f3   : > { %v3750_v10 = vadd.f32 %v3749_v46, %v3748_v31  ;;  %v3740_v1 = vrot.slane %v3739_v17, 2  ;;  %v3329_v56 = vadd.f32 %v4324_v32, %v3328_v3  ;;  %vm3317_vm2 = vmor %vm3315_vm12, %vm3316_vm10  ;;  %v3322_v20 = vor.u32 1.1754944e-38, %v3321_v58 }
 0x2f4   : > { %v3754_v59 = vrot.slane %v3753_v33, 2  ;;  %v3313_v53 = vmul.f32 %v4326_v6, %v3312_v18  ;;  %v2870_v48 = vmul.f32 1.442695, %v2824_v47  ;;  %vm3320_vm15 = vcmp.eq.f32.partialorder %v3319_v45, 8.507059e+37 }
 0x2f5   : > { %3909 = vst.msk [vmem:[%s6175_s16 + $0xa] sm:$0x1] %vm8455_vm4, %v3750_v10  ;;  %v3741_v42 = vadd.f32 %v3740_v1, %v3739_v17  ;;  %v3333_v21 = vsel %vm3332_vm0, %v4324_v32, %v3329_v56  ;;  %4327 = vrcp.f32 %v6707_v8  ;;  %v1259_v23 = vmul.f32 %v1203_v28, %v8714_v57 }
 0x2f6   : > { %v3755_v61 = vadd.f32 %v3754_v59, %v3753_v33  ;;  %v3338_v44 = vsel %vm6713_vm6, %v3337_v50, %v3333_v21  ;;  %v3314_v13 = vadd.f32 %v4326_v6, %v3313_v53  ;;  %4329 = vpow2.f32 %v2870_v48  ;;  %v8723_v21 = vld [vmem:[#allocation22_spill] sm:$0xff] }
 0x2f7   : > { %v3742_v9 = vrot.slane %v3741_v42, 1  ;;  %v3339_v16 = vmul.f32 %v6622_v4, %v3338_v44  ;;  %4331 = vpow2.f32 %v4104_v52  ;;  %v1290_v32 = vadd.f32 %v8687_v11, %v1257_v36  ;;  %v1212_v27 = vpop.xlane.xlu0 %1211 }
 0x2f8   : > { %v3756_v12 = vrot.slane %v3755_v61, 1  ;;  %v3318_v39 = vsel %vm3317_vm2, %v4326_v6, %v3314_v13  ;;  %v1258_v7 = vmul.f32 %v1200_v51, %v8719_v55  ;;  %v1260_v46 = vmul.f32 %v1206_v15, %v8720_v19 }
 0x2f9   : > { %v3743_v35 = vadd.f32 %v3742_v9, %v3741_v42  ;;  %v3655_v60 = vmul.f32 %v3339_v16, %v8713_v63  ;;  %v3323_v4 = vsel %vm3320_vm15, %v3322_v20, %v3318_v39  ;;  %3623 = vst.msk [vmem:[%s6117_s12 + $0x68] sm:$0xff] %vm8715_vm11, %v3339_v16  ;;  %v4106_v38 = vmul.f32 -1.442695, %v1290_v32  ;;  %vm8735_vm15 = vmmov %vm8716_vm3 }
 0x2fa   : > { %v3757_v40 = vadd.f32 %v3756_v12, %v3755_v61  ;;  %v3324_v24 = vmul.f32 %v6635_v30, %v3323_v4  ;;  %v1292_v30 = vadd.f32 %v8687_v11, %v1259_v23  ;;  %v1291_v52 = vadd.f32 %v8687_v11, %v1258_v7  ;;  %v1209_v12 = vpop.xlane.xlu2 %1208 }
 0x2fb   : > { %3908 = vst.msk [vmem:[%s6175_s16 + $0x9] sm:$0x1] %vm8455_vm4, %v3743_v35  ;;  %v3765_v62 = vsel %vm8716_vm3, %v3655_v60, 0.0  ;;  %v6742_v41 = vpop.eup %4327  ;;  %v1293_v25 = vadd.f32 %v8687_v11, %v1260_v46  ;;  %4333 = vpow2.f32 %v4106_v38  ;;  %v1262_v53 = vmul.f32 %v1212_v27, %v8723_v21  ;;  %v8726_v38 = vld [vmem:[#allocation25_spill] sm:$0xff] }
 0x2fc   : > { %3910 = vst.msk [vmem:[%s6175_s16 + $0xb] sm:$0x1] %vm8455_vm4, %v3757_v40  ;;  %v3766_v31 = vrot.slane %v3765_v62, 4  ;;  %v3654_v43 = vmul.f32 %v3324_v24, %v8718_v54  ;;  %v6746_v0 = vpop.eup %4329  ;;  %v2282_v59 = vmul.f32 %v6742_v41, %v6707_v8  ;;  %v4108_v26 = vmul.f32 -1.442695, %v1292_v30  ;;  %v1215_v40 = vpop.xlane.xlu1 %1214  ;;  %v8756_v21 = vld [vmem:[#allocation29_spill] sm:$0xff] }
 0x2fd   : > { %3622 = vst.msk [vmem:[%s6117_s12 + $0x60] sm:$0xff] %vm8717_vm14, %v3324_v24  ;;  %v4332_v10 = vpop.eup %4331  ;;  %v3004_v33 = vsel %vm8722_vm7, %v6746_v0, 0.0  ;;  %v4107_v61 = vmul.f32 -1.442695, %v1291_v52  ;;  %v4109_v45 = vmul.f32 -1.442695, %v1293_v25  ;;  %v1295_v28 = vadd.f32 %v8687_v11, %v1262_v53  ;;  %vm8740_vm14 = vmmov %vm8722_vm7 }
 0x2fe   : > { %v3767_v34 = vadd.f32 %v3766_v31, %v3765_v62  ;;  %v3758_v17 = vsel %vm8721_vm8, %v3654_v43, 0.0  ;;  %v3005_v22 = vrot.slane %v3004_v33, 4  ;;  %v6754_v18 = vadd.f32 1.0, %v4332_v10  ;;  %v8724_v31 = vld [vmem:[#allocation20_spill] sm:$0xff] }
 0x2ff   : > { %v3759_v6 = vrot.slane %v3758_v17, 4  ;;  %4335 = vpow2.f32 %v4108_v26  ;;  %v2283_v36 = vsub.f32 1.0, %v2282_v59  ;;  %v1221_v39 = vpop.xlane.xlu0 %1220  ;;  %v4111_v23 = vmul.f32 -1.442695, %v1295_v28  ;;  %v8725_v43 = vld [vmem:[#allocation24_spill] sm:$0xff] }
 0x300   : > { %v3768_v37 = vrot.slane %v3767_v34, 2  ;;  %v3006_v50 = vadd.f32 %v3005_v22, %v3004_v33  ;;  %4337 = vrcp.f32 %v6754_v18  ;;  %vm2286_vm9 = vweird.f32 %v6707_v8  ;;  %v8729_v22 = vld [vmem:[#allocation23_spill] sm:$0xff] }
 0x301   : > { %v3760_v3 = vadd.f32 %v3759_v6, %v3758_v17  ;;  %v4334_v35 = vpop.eup %4333  ;;  %4339 = vpow2.f32 %v4107_v61  ;;  %v2284_v48 = vmul.f32 %v6742_v41, %v2283_v36  ;;  %vm2287_vm1 = vweird.f32 %v6742_v41 }
 0x302   : > { %v3769_v1 = vadd.f32 %v3768_v37, %v3767_v34  ;;  %v3007_v9 = vrot.slane %v3006_v50, 2  ;;  %4341 = vpow2.f32 %v4109_v45  ;;  %v6766_v60 = vadd.f32 1.0, %v4334_v35  ;;  %v1218_v46 = vpop.xlane.xlu2 %1217  ;;  %vm6787_vm5 = vmor %vm2286_vm9, %vm2287_vm1  ;;  %v8730_v35 = vld [vmem:[#allocation27_spill] sm:$0xff] }
 0x303   : > { %v3761_v56 = vrot.slane %v3760_v3, 2  ;;  %v6772_v62 = vadd.f32 %v6742_v41, %v2284_v48  ;;  %v2292_v24 = vand.u32 2147483648, %v6707_v8  ;;  %v1261_v54 = vmul.f32 %v1209_v12, %v8724_v31 }
 0x304   : > { %v3770_v42 = vrot.slane %v3769_v1, 1  ;;  %v3008_v47 = vadd.f32 %v3007_v9, %v3006_v50  ;;  %v1263_v7 = vmul.f32 %v1215_v40, %v8725_v43  ;;  %v1265_v30 = vmul.f32 %v1221_v39, %v8726_v38 }
 0x305   : > { %v3762_v14 = vadd.f32 %v3761_v56, %v3760_v3  ;;  %v4336_v63 = vpop.eup %4335  ;;  %v2277_v6 = vand.u32 2147483648, %v6754_v18  ;;  %v1294_v33 = vadd.f32 %v8687_v11, %v1261_v54  ;;  %v1264_v59 = vmul.f32 %v1218_v46, %v8729_v22  ;;  %v1224_v56 = vpop.xlane.xlu1 %1223 }
 0x306   : > { %v3771_v58 = vadd.f32 %v3770_v42, %v3769_v1  ;;  %v3009_v13 = vrot.slane %v3008_v47, 1  ;;  %v6768_v4 = vpop.eup %4337  ;;  %v6778_v32 = vadd.f32 1.0, %v4336_v63  ;;  %v1296_v3 = vadd.f32 %v8687_v11, %v1263_v7 }
 0x307   : > { %v3763_v44 = vrot.slane %v3762_v14, 1  ;;  %v4340_v51 = vpop.eup %4339  ;;  %v2267_v34 = vmul.f32 %v6768_v4, %v6754_v18  ;;  %v6803_v27 = vor.u32 1.1754944e-38, %v2292_v24  ;;  %v4110_v61 = vmul.f32 -1.442695, %v1294_v33  ;;  %v1230_v12 = vpop.xlane.xlu0 %1229 }
 0x308   : > { %3912 = vst.msk [vmem:[%s6175_s16 + $0xd] sm:$0x1] %vm8455_vm4, %v3771_v58  ;;  %v6763_v20 = vadd.f32 %v3009_v13, %v3008_v47  ;;  %v4342_v15 = vpop.eup %4341  ;;  %v6784_v17 = vadd.f32 1.0, %v4340_v51  ;;  %v1298_v45 = vadd.f32 %v8687_v11, %v1265_v30  ;;  %v6812_v53 = vor.u32 1.1754944e-38, %v2277_v6 }
 0x309   : > { %v3764_v16 = vadd.f32 %v3763_v44, %v3762_v14  ;;  %v6792_v10 = vadd.f32 1.0, %v4342_v15  ;;  %v2268_v50 = vsub.f32 1.0, %v2267_v34  ;;  %v4112_v47 = vmul.f32 -1.442695, %v1296_v3 }
 0x30a   : > { %4343 = vrcp.f32 %v6763_v20  ;;  %v3351_v9 = vand.u32 2147483648, %v6763_v20  ;;  %v1297_v36 = vadd.f32 %v8687_v11, %v1264_v59  ;;  %v3349_v28 = vand.u32 2147483647, %v6763_v20  ;;  %v1227_v59 = vpop.xlane.xlu2 %1226 }
 0x30b   : > { %3911 = vst.msk [vmem:[%s6175_s16 + $0xc] sm:$0x1] %vm8455_vm4, %v3764_v16  ;;  %4345 = vrcp.f32 %v6766_v60  ;;  %v1266_v16 = vmul.f32 %v1224_v56, %v8730_v35  ;;  %vm2271_vm6 = vweird.f32 %v6754_v18  ;;  %v2269_v48 = vmul.f32 %v6768_v4, %v2268_v50 }
 0x30c   : > { %4347 = vpow2.f32 %v4111_v23  ;;  %v2307_v63 = vand.u32 2147483648, %v6766_v60  ;;  %v4114_v39 = vmul.f32 -1.442695, %v1298_v45  ;;  %v8731_v23 = vld [vmem:[#allocation28_spill] sm:$0xff]  ;;  %vm3345_vm0 = vweird.f32 %v6763_v20 }
 0x30d   : > { %4349 = vrcp.f32 %v6778_v32  ;;  %v1268_v51 = vmul.f32 %v1230_v12, %v8731_v23  ;;  %v3352_v34 = vor.u32 1.1754944e-38, %v3351_v9  ;;  %v4113_v30 = vmul.f32 -1.442695, %v1297_v36  ;;  %v8736_v36 = vld [vmem:[#allocation15_spill] sm:$0xff] }
 0x30e   : > { %4351 = vrcp.f32 %v6784_v17  ;;  %v1299_v6 = vadd.f32 %v8687_v11, %v1266_v16  ;;  %vm3350_vm12 = vcmp.eq.f32.partialorder %v3349_v28, 8.507059e+37  ;;  %vm2272_vm2 = vweird.f32 %v6768_v4 }
 0x30f   : > { %4353 = vrcp.f32 %v6792_v10  ;;  %v6838_v50 = vadd.f32 %v6768_v4, %v2269_v48  ;;  %vm6861_vm11 = vmor %vm2271_vm6, %vm2272_vm2  ;;  %vm2301_vm7 = vweird.f32 %v6766_v60  ;;  %vm2331_vm9 = vweird.f32 %v6778_v32 }
 0x310   : > { %v4344_v52 = vpop.eup %4343  ;;  %4355 = vpow2.f32 %v4110_v61  ;;  %v1301_v61 = vadd.f32 %v8687_v11, %v1268_v51  ;;  %v4115_v12 = vmul.f32 -1.442695, %v1299_v6  ;;  %vm2316_vm1 = vweird.f32 %v6784_v17 }
 0x311   : > { %v3341_v26 = vmul.f32 %v4344_v52, %v6763_v20  ;;  %v6809_v58 = vpop.eup %4345  ;;  %vm3346_vm13 = vweird.f32 %v4344_v52  ;;  %4357 = vpow2.f32 %v4112_v47  ;;  %v2337_v20 = vand.u32 2147483648, %v6778_v32 }
 0x312   : > { %v4348_v44 = vpop.eup %4347  ;;  %v2297_v54 = vmul.f32 %v6809_v58, %v6766_v60  ;;  %vm3347_vm10 = vmor %vm3345_vm0, %vm3346_vm13  ;;  %4359 = vpow2.f32 %v4114_v39  ;;  %vm2302_vm3 = vweird.f32 %v6809_v58  ;;  %vm2346_vm13 = vweird.f32 %v6792_v10  ;;  %v1236_v23 = vpop.xlane.xlu2 %1235 }
 0x313   : > { %v3342_v14 = vsub.f32 1.0, %v3341_v26  ;;  %v6823_v15 = vpop.eup %4349  ;;  %v6828_v7 = vadd.f32 1.0, %v4348_v44  ;;  %v8734_v44 = vld [vmem:[#allocation26_spill] sm:$0xff]  ;;  %vm6921_vm0 = vmor %vm2301_vm7, %vm2302_vm3  ;;  %v1270_v43 = vmul.f32 %v1236_v23, %v8756_v21 }
 0x314   : > { %8732 = vst [vmem:[#allocation2_spill] sm:$0xff] %v6823_v15  ;;  %v6830_v46 = vpop.eup %4351  ;;  %v1267_v47 = vmul.f32 %v1227_v59, %v8734_v44  ;;  %vm2332_vm8 = vweird.f32 %v6823_v15 }
 0x315   : > { %v3343_v13 = vmul.f32 %v4344_v52, %v3342_v14  ;;  %8733 = vst [vmem:[#allocation4_spill] sm:$0xff] %v6828_v7  ;;  %v6833_v33 = vpop.eup %4353  ;;  %v2298_v14 = vsub.f32 1.0, %v2297_v54  ;;  %4361 = vrcp.f32 %v6828_v7  ;;  %v2312_v9 = vmul.f32 %v6830_v46, %v6784_v17  ;;  %v1233_v54 = vpop.xlane.xlu1 %1232 }
 0x316   : > { %v4356_v26 = vpop.eup %4355  ;;  %4363 = vpow2.f32 %v4113_v30  ;;  %vm2317_vm6 = vweird.f32 %v6830_v46  ;;  %vm2376_vm3 = vweird.f32 %v6828_v7  ;;  %v7013_v55 = vadd.f32 %v8687_v11, %v1270_v43 }
 0x317   : > { %v3344_v24 = vadd.f32 %v4344_v52, %v3343_v13  ;;  %v6851_v13 = vor.u32 1.1754944e-38, %v2307_v63  ;;  %v6855_v28 = vadd.f32 1.0, %v4356_v26  ;;  %v4358_v48 = vpop.eup %4357  ;;  %v6867_v63 = vor.u32 1.1754944e-38, %v2337_v20  ;;  %vm6957_vm2 = vmor %vm2316_vm1, %vm2317_vm6 }
 0x318   : > { %v2299_v6 = vmul.f32 %v6809_v58, %v2298_v14  ;;  %v4360_v59 = vpop.eup %4359  ;;  %v2313_v20 = vsub.f32 1.0, %v2312_v9  ;;  %4365 = vpow2.f32 %v4115_v12  ;;  %v8742_v14 = vld [vmem:[#allocation30_spill] sm:$0xff]  ;;  %v2322_v9 = vand.u32 2147483648, %v6784_v17 }
 0x319   : > { %v3348_v3 = vsel %vm3347_vm10, %v4344_v52, %v3344_v24  ;;  %v2327_v52 = vmul.f32 %v6823_v15, %v6778_v32  ;;  %8739 = vst [vmem:[#allocation3_spill] sm:$0xff] %v6867_v63  ;;  %v4117_v24 = vmul.f32 -1.442695, %v1301_v61  ;;  %4367 = vrcp.f32 %v6855_v28 }
 0x31a   : > { %v3353_v56 = vsel %vm3350_vm12, %v3352_v34, %v3348_v3  ;;  %v6888_v12 = vadd.f32 %v6809_v58, %v2299_v6  ;;  %v6892_v25 = vadd.f32 1.0, %v4360_v59  ;;  %v2314_v30 = vmul.f32 %v6830_v46, %v2313_v20  ;;  %v1239_v20 = vpop.xlane.xlu0 %1238  ;;  %vm6934_vm12 = vmor %vm2331_vm9, %vm2332_vm8 }
 0x31b   : > { %v3354_v45 = vmul.f32 %v6746_v0, %v3353_v56  ;;  %v2342_v0 = vmul.f32 %v6833_v33, %v6792_v10  ;;  %v2328_v3 = vsub.f32 1.0, %v2327_v52  ;;  %v1300_v56 = vadd.f32 %v8687_v11, %v1267_v47  ;;  %v6878_v61 = vpop.eup %4361 }
 0x31c   : > { %8741 = vst [vmem:[#allocation33_spill] sm:$0xff] %v6878_v61  ;;  %v1269_v52 = vmul.f32 %v1233_v54, %v8742_v14  ;;  %4369 = vpow2.f32 %v4117_v24  ;;  %v2372_v54 = vmul.f32 %v6878_v61, %v6828_v7  ;;  %vm2347_vm10 = vweird.f32 %v6833_v33 }
 0x31d   : > { %3624 = vst.msk [vmem:[%s6117_s12 + $0x70] sm:$0xff] %vm8735_vm15, %v3354_v45  ;;  %v3656_v16 = vmul.f32 %v3354_v45, %v8736_v36  ;;  %v2343_v45 = vsub.f32 1.0, %v2342_v0  ;;  %v6882_v36 = vadd.f32 1.0, %v4358_v48  ;;  %v2329_v47 = vmul.f32 %v6823_v15, %v2328_v3  ;;  %vm6975_vm15 = vmor %vm2346_vm13, %vm2347_vm10 }
 0x31e   : > { %8743 = vst [vmem:[#allocation6_spill] sm:$0xff] %v6892_v25  ;;  %v1302_v6 = vadd.f32 %v8687_v11, %v1269_v52  ;;  %v6902_v0 = vor.u32 1.1754944e-38, %v2322_v9  ;;  %v2373_v9 = vsub.f32 1.0, %v2372_v54  ;;  %v8747_v54 = vmov 0 }
 0x31f   : > { %v3772_v34 = vsel %vm8740_vm14, %v3656_v16, 0.0  ;;  %v4364_v16 = vpop.eup %4363  ;;  %4371 = vrcp.f32 %v6882_v36  ;;  %v8748_v54 = vsel %vm6934_vm12, 4294967295, %v8747_v54  ;;  %vm2377_vm14 = vweird.f32 %v6878_v61 }
 0x320   : > { %v3773_v26 = vrot.slane %v3772_v34, 4  ;;  %v6899_v24 = vadd.f32 1.0, %v4364_v16  ;;  %v4366_v3 = vpop.eup %4365  ;;  %4373 = vrcp.f32 %v6892_v25  ;;  %v6915_v16 = vadd.f32 %v6830_v46, %v2314_v30  ;;  %8749 = vst [vmem:[#allocation7_spill] sm:$0xff] %v8748_v54  ;;  %vm7023_vm7 = vmor %vm2376_vm3, %vm2377_vm14 }
 0x321   : > { %v6906_v40 = vpop.eup %4367  ;;  %v4118_v30 = vmul.f32 -1.442695, %v1302_v6  ;;  %v6941_v42 = vadd.f32 1.0, %v4366_v3  ;;  %vm2361_vm8 = vweird.f32 %v6855_v28  ;;  %vm2391_vm1 = vweird.f32 %v6882_v36 }
 0x322   : > { %v3774_v51 = vadd.f32 %v3773_v26, %v3772_v34  ;;  %v4116_v34 = vmul.f32 -1.442695, %v1300_v56  ;;  %v2344_v26 = vmul.f32 %v6833_v33, %v2343_v45  ;;  %v6909_v56 = vadd.f32 %v6823_v15, %v2329_v47  ;;  %v4370_v52 = vpop.eup %4369  ;;  %v1035_v21 = vpop.xlane.xlu0 %1034 }
 0x323   : > { %v2352_v45 = vand.u32 2147483648, %v6792_v10  ;;  %v6963_v44 = vadd.f32 1.0, %v4370_v52  ;;  %v8754_v52 = vld [vmem:[#allocation31_spill] sm:$0xff]  ;;  %vm2362_vm9 = vweird.f32 %v6906_v40  ;;  %v8771_v54 = vand.u32 2147483647, %v6754_v18 }
 0x324   : > { %v3775_v48 = vrot.slane %v3774_v51, 2  ;;  %8744 = vst [vmem:[#allocation34_spill] sm:$0xff] %v6909_v56  ;;  %4375 = vpow2.f32 %v4116_v34  ;;  %v2382_v34 = vand.u32 2147483648, %v6828_v7  ;;  %v1271_v38 = vmul.f32 %v1239_v20, %v8754_v52  ;;  %vm7069_vm14 = vmor %vm2361_vm8, %vm2362_vm9 }
 0x325   : > { %4377 = vrcp.f32 %v6899_v24  ;;  %v6943_v14 = vpop.eup %4371  ;;  %vm7092_vm8 = vcmp.eq.f32.partialorder %v8771_v54, 8.507059e+37  ;;  %v8776_v54 = vand.u32 2147483647, %v6766_v60  ;;  %v8815_v37 = vsel %vm6957_vm2, %v6830_v46, %v6915_v16 }
 0x326   : > { %v3776_v1 = vadd.f32 %v3775_v48, %v3774_v51  ;;  %v6926_v48 = vadd.f32 %v6833_v33, %v2344_v26  ;;  %v2357_v26 = vmul.f32 %v6906_v40, %v6855_v28  ;;  %v6982_v35 = vpop.eup %4373  ;;  %4379 = vpow2.f32 %v4118_v30 }
 0x327   : > { %8755 = vst [vmem:[#allocation40_spill] sm:$0xff] %v6982_v35  ;;  %v6990_v57 = vor.u32 1.1754944e-38, %v2382_v34  ;;  %v2387_v20 = vmul.f32 %v6943_v14, %v6882_v36  ;;  %4381 = vrcp.f32 %v6941_v42  ;;  %v2397_v34 = vand.u32 2147483648, %v6882_v36 }
 0x328   : > { %v3777_v51 = vrot.slane %v3776_v1, 1  ;;  %4383 = vrcp.f32 %v6963_v44  ;;  %v1304_v22 = vadd.f32 %v8687_v11, %v1271_v38  ;;  %v8759_v38 = vmov 0 }
 0x329   : > { %8757 = vst [vmem:[#allocation35_spill] sm:$0xff] %v6990_v57  ;;  %v2427_v57 = vand.u32 2147483648, %v6892_v25  ;;  %v2388_v49 = vsub.f32 1.0, %v2387_v20  ;;  %v8760_v38 = vsel %vm7023_vm7, 4294967295, %v8759_v38  ;;  %v7039_v7 = vor.u32 1.1754944e-38, %v2397_v34 }
 0x32a   : > { %v3778_v59 = vadd.f32 %v3777_v51, %v3776_v1  ;;  %v6961_v51 = vor.u32 1.1754944e-38, %v2352_v45  ;;  %v2374_v45 = vmul.f32 %v6878_v61, %v2373_v9  ;;  %v4376_v31 = vpop.eup %4375  ;;  %v2358_v9 = vsub.f32 1.0, %v2357_v26  ;;  %8761 = vst [vmem:[#allocation36_spill] sm:$0xff] %v8760_v38 }
 0x32b   : > { %v6995_v52 = vpop.eup %4377  ;;  %v2367_v1 = vand.u32 2147483648, %v6855_v28  ;;  %v2417_v26 = vmul.f32 %v6982_v35, %v6892_v25  ;;  %v7010_v19 = vadd.f32 1.0, %v4376_v31  ;;  %8763 = vst [vmem:[#allocation39_spill] sm:$0xff] %v7039_v7  ;;  %vm2392_vm13 = vweird.f32 %v6943_v14 }
 0x32c   : > { %3913 = vst.msk [vmem:[%s6175_s16 + $0xe] sm:$0x1] %vm8455_vm4, %v3778_v59  ;;  %v1029_v59 = vpop.xlane.xlu1 %1028  ;;  %v7002_v23 = vadd.f32 %v6878_v61, %v2374_v45  ;;  %v2359_v45 = vmul.f32 %v6906_v40, %v2358_v9  ;;  %v2402_v5 = vmul.f32 %v6995_v52, %v6899_v24  ;;  %v4380_v29 = vpop.eup %4379  ;;  %v2412_v9 = vand.u32 2147483648, %v6899_v24  ;;  %vm7114_vm4 = vmor %vm2391_vm1, %vm2392_vm13 }
 0x32d   : > { %v1094_v30 = vadd.f32 %v5463_v2, %v1029_v59  ;;  %v7027_v31 = vor.u32 1.1754944e-38, %v2367_v1  ;;  %v7032_v20 = vpop.eup %4381  ;;  %v2418_v63 = vsub.f32 1.0, %v2417_v26  ;;  %v7045_v43 = vor.u32 1.1754944e-38, %v2427_v57 }
 0x32e   : > { %8758 = vst [vmem:[#allocation38_spill] sm:$0xff] %v7002_v23  ;;  %v7041_v1 = vpop.eup %4383  ;;  %4385 = vrcp.f32 %v7010_v19  ;;  %v7050_v38 = vadd.f32 %v6906_v40, %v2359_v45  ;;  %v2389_v59 = vmul.f32 %v6943_v14, %v2388_v49  ;;  %v2403_v34 = vsub.f32 1.0, %v2402_v5  ;;  %v1032_v23 = vpop.xlane.xlu2 %1031 }
 0x32f   : > { %8762 = vst [vmem:[#allocation42_spill] sm:$0xff] %v7027_v31  ;;  %v4072_v26 = vmul.f32 -1.442695, %v1094_v30  ;;  %vm2422_vm10 = vweird.f32 %v6982_v35  ;;  %v7055_v61 = vor.u32 1.1754944e-38, %v2412_v9  ;;  %v2432_v57 = vmul.f32 %v7032_v20, %v6941_v42  ;;  %v1044_v31 = vpop.xlane.xlu0 %1043 }
 0x330   : > { %8764 = vst [vmem:[#allocation43_spill] sm:$0xff] %v7041_v1  ;;  %v7059_v11 = vadd.f32 1.0, %v4380_v29  ;;  %v2462_v49 = vmul.f32 %v7041_v1, %v6963_v44  ;;  %v4120_v45 = vmul.f32 -1.442695, %v1304_v22  ;;  %v2442_v29 = vand.u32 2147483648, %v6941_v42 }
 0x331   : > { %8765 = vst [vmem:[#allocation45_spill] sm:$0xff] %v7045_v43  ;;  %v2419_v43 = vmul.f32 %v6982_v35, %v2418_v63  ;;  %4387 = vpow2.f32 %v4072_v26  ;;  %v1096_v63 = vadd.f32 %v5463_v2, %v1035_v21  ;;  %v1095_v9 = vadd.f32 %v5463_v2, %v1032_v23 }
 0x332   : > { %8766 = vst [vmem:[#allocation41_spill] sm:$0xff] %v7050_v38  ;;  %v7082_v26 = vadd.f32 %v6943_v14, %v2389_v59  ;;  %v2433_v15 = vsub.f32 1.0, %v2432_v57  ;;  %4389 = vrcp.f32 %v7059_v11  ;;  %v7100_v57 = vor.u32 1.1754944e-38, %v2442_v29 }
 0x333   : > { %8767 = vst [vmem:[#allocation46_spill] sm:$0xff] %v7055_v61  ;;  %v2404_v61 = vmul.f32 %v6995_v52, %v2403_v34  ;;  %v4074_v21 = vmul.f32 -1.442695, %v1096_v63  ;;  %v7097_v59 = vadd.f32 %v6982_v35, %v2419_v43  ;;  %v2463_v34 = vsub.f32 1.0, %v2462_v49 }
 0x334   : > { %v1038_v5 = vpop.xlane.xlu1 %1037  ;;  %8770 = vst [vmem:[#allocation5_spill] sm:$0xff] %v7082_v26  ;;  %v7086_v56 = vpop.eup %4385  ;;  %4391 = vpow2.f32 %v4120_v45  ;;  %v4073_v7 = vmul.f32 -1.442695, %v1095_v9  ;;  %v2472_v63 = vand.u32 2147483648, %v6963_v44  ;;  %vm7106_vm3 = vcmp.eq.f32.partialorder %v8776_v54, 8.507059e+37 }
 0x335   : > { %v1097_v23 = vadd.f32 %v5463_v2, %v1038_v5  ;;  %8774 = vst [vmem:[#allocation47_spill] sm:$0xff] %v7097_v59  ;;  %4393 = vpow2.f32 %v4074_v21  ;;  %v1099_v5 = vadd.f32 %v5463_v2, %v1044_v31  ;;  %v8779_v43 = vmov 0 }
 0x336   : > { %8775 = vst [vmem:[#allocation44_spill] sm:$0xff] %v7100_v57  ;;  %v8780_v43 = vsel %vm7114_vm4, 4294967295, %v8779_v43  ;;  %v7119_v49 = vadd.f32 %v6995_v52, %v2404_v61  ;;  %v2447_v60 = vmul.f32 %v7086_v56, %v7010_v19  ;;  %v8782_v45 = vand.u32 2147483647, %v6707_v8 }
 0x337   : > { %v4388_v18 = vpop.eup %4387  ;;  %vm8785_vm1 = vweird.f32 %v6892_v25  ;;  %v8786_v61 = vmov 0  ;;  %v2434_v21 = vmul.f32 %v7032_v20, %v2433_v15  ;;  %v4075_v54 = vmul.f32 -1.442695, %v1097_v23 }
 0x338   : > { %8781 = vst [vmem:[#allocation32_spill] sm:$0xff] %v7119_v49  ;;  %vm7127_vm6 = vcmp.eq.f32.partialorder %v8782_v45, 8.507059e+37  ;;  %vm7139_vm13 = vmor %vm8785_vm1, %vm2422_vm10  ;;  %v7144_v8 = vadd.f32 1.0, %v4388_v18  ;;  %v8789_v45 = vand.u32 2147483647, %v6784_v17  ;;  %v2464_v57 = vmul.f32 %v7041_v1, %v2463_v34  ;;  %v7157_v26 = vpop.eup %4389 }
 0x339   : > { %v8787_v61 = vsel %vm7139_vm13, 4294967295, %v8786_v61  ;;  %4395 = vpow2.f32 %v4073_v7  ;;  %v4077_v25 = vmul.f32 -1.442695, %v1099_v5  ;;  %v8792_v15 = vand.u32 2147483647, %v6792_v10  ;;  %v1041_v5 = vpop.xlane.xlu2 %1040 }
 0x33a   : > { %8788 = vst [vmem:[#allocation37_spill] sm:$0xff] %v8787_v61  ;;  %vm7148_vm9 = vcmp.eq.f32.partialorder %v8789_v45, 8.507059e+37  ;;  %vm8795_vm1 = vweird.f32 %v6995_v52  ;;  %vm8796_vm7 = vweird.f32 %v6899_v24  ;;  %vm2437_vm13 = vweird.f32 %v7032_v20  ;;  %v4392_v18 = vpop.eup %4391 }
 0x33b   : > { %vm7161_vm10 = vcmp.eq.f32.partialorder %v8792_v15, 8.507059e+37  ;;  %vm7169_vm4 = vmor %vm8796_vm7, %vm8795_vm1  ;;  %v7174_v7 = vor.u32 1.1754944e-38, %v2472_v63  ;;  %v2457_v34 = vand.u32 2147483648, %v7010_v19  ;;  %v2487_v10 = vand.u32 2147483648, %v7059_v11  ;;  %v4394_v59 = vpop.eup %4393 }
 0x33c   : > { %v2448_v15 = vsub.f32 1.0, %v2447_v60  ;;  %4397 = vrcp.f32 %v7144_v8  ;;  %v7185_v63 = vadd.f32 %v7032_v20, %v2434_v21  ;;  %v7190_v35 = vadd.f32 %v7041_v1, %v2464_v57 }
 0x33d   : > { %8799 = vst [vmem:[#allocation9_spill] sm:$0xff] %v7174_v7  ;;  %v4119_v7 = vmul.f32 -1.442695, %v7013_v55  ;;  %4399 = vpow2.f32 %v4075_v54  ;;  %v7192_v61 = vadd.f32 1.0, %v4394_v59  ;;  %v1098_v60 = vadd.f32 %v5463_v2, %v1041_v5  ;;  %v8945_v17 = vld [vmem:[#allocation44_spill] sm:$0xff] }
 0x33e   : > { %8800 = vst [vmem:[#allocation10_spill] sm:$0xff] %v7190_v35  ;;  %4401 = vpow2.f32 %v4077_v25  ;;  %v7195_v45 = vor.u32 1.1754944e-38, %v2457_v34  ;;  %v7198_v49 = vor.u32 1.1754944e-38, %v2487_v10  ;;  %v8803_v55 = vsel %vm6861_vm11, %v6768_v4, %v6838_v50 }
 0x33f   : > { %v7208_v57 = vsel %vm7092_vm8, %v6812_v53, %v8803_v55  ;;  %v4396_v59 = vpop.eup %4395  ;;  %vm8804_vm1 = vweird.f32 %v6941_v42  ;;  %v2449_v21 = vmul.f32 %v7086_v56, %v2448_v15  ;;  %v7221_v39 = vmul.f32 %v7157_v26, %v7059_v11 }
 0x340   : > { %8801 = vst [vmem:[#allocation8_spill] sm:$0xff] %v7195_v45  ;;  %vm7214_vm7 = vmor %vm8804_vm1, %vm2437_vm13  ;;  %v7223_v4 = vadd.f32 1.0, %v4392_v18  ;;  %4403 = vrcp.f32 %v7192_v61  ;;  %vm8808_vm11 = vweird.f32 %v7041_v1  ;;  %vm8809_vm8 = vweird.f32 %v6963_v44 }
 0x341   : > { %8802 = vst [vmem:[#allocation12_spill] sm:$0xff] %v7198_v49  ;;  %vm7234_vm13 = vmor %vm8809_vm8, %vm8808_vm11  ;;  %v8810_v50 = vmov 0  ;;  %4405 = vpow2.f32 %v4119_v7  ;;  %v8813_v22 = vsel %vm6921_vm0, %v6809_v58, %v6888_v12  ;;  %v7248_v34 = vadd.f32 1.0, %v4396_v59 }
 0x342   : > { %8807 = vst [vmem:[#allocation13_spill] sm:$0xff] %v7223_v4  ;;  %v8811_v50 = vsel %vm7234_vm13, 4294967295, %v8810_v50  ;;  %v7246_v54 = vsel %vm7106_vm3, %v6851_v13, %v8813_v22  ;;  %v4398_v10 = vpop.eup %4397  ;;  %v1667_v7 = vand.u32 2147483647, %v7144_v8  ;;  %v8814_v58 = vsel %vm6787_vm5, %v6742_v41, %v6772_v62 }
 0x343   : > { %8812 = vst [vmem:[#allocation11_spill] sm:$0xff] %v8811_v50  ;;  %v7263_v13 = vsel %vm7127_vm6, %v6803_v27, %v8814_v58  ;;  %v4076_v12 = vmul.f32 -1.442695, %v1098_v60  ;;  %v4400_v47 = vpop.eup %4399  ;;  %v1659_v38 = vmul.f32 %v4398_v10, %v7144_v8  ;;  %v1669_v18 = vand.u32 2147483648, %v7144_v8 }
 0x344   : > { %4407 = vrcp.f32 %v7248_v34  ;;  %v7276_v41 = vsel %vm7148_vm9, %v6902_v0, %v8815_v37  ;;  %v4402_v62 = vpop.eup %4401  ;;  %v7279_v27 = vadd.f32 %v7086_v56, %v2449_v21  ;;  %v8817_v3 = vsel %vm6975_vm15, %v6833_v33, %v6926_v48 }
 0x345   : > { %4409 = vrcp.f32 %v7223_v4  ;;  %v7291_v46 = vsel %vm7161_vm10, %v6961_v51, %v8817_v3  ;;  %v1660_v0 = vsub.f32 1.0, %v1659_v38  ;;  %v1697_v16 = vand.u32 2147483647, %v7192_v61 }
 0x346   : > { %8816 = vst [vmem:[#allocation15_spill] sm:$0xff] %v7279_v27  ;;  %v7294_v31 = vadd.f32 1.0, %v4400_v47  ;;  %v7296_v15 = vadd.f32 1.0, %v4402_v62  ;;  %v4404_v60 = vpop.eup %4403  ;;  %vm1663_vm5 = vweird.f32 %v7144_v8  ;;  %vm7299_vm0 = vcmp.eq.f32.partialorder %v1667_v7, 8.507059e+37 }
 0x347   : > { %v1699_v33 = vand.u32 2147483648, %v7192_v61  ;;  %4411 = vpow2.f32 %v4076_v12  ;;  %v7304_v48 = vpop.eup %4405  ;;  %v1661_v51 = vmul.f32 %v4398_v10, %v1660_v0  ;;  %vm1664_vm2 = vweird.f32 %v4398_v10 }
 0x348   : > { %v1670_v23 = vor.u32 1.1754944e-38, %v1669_v18  ;;  %v1689_v55 = vmul.f32 %v4404_v60, %v7192_v61  ;;  %vm1693_vm15 = vweird.f32 %v7192_v61  ;;  %v1682_v59 = vand.u32 2147483647, %v7248_v34  ;;  %vm1665_vm3 = vmor %vm1663_vm5, %vm1664_vm2 }
 0x349   : > { %v1684_v21 = vand.u32 2147483648, %v7248_v34  ;;  %4413 = vrcp.f32 %v7294_v31  ;;  %v1662_v7 = vadd.f32 %v4398_v10, %v1661_v51  ;;  %vm7311_vm6 = vcmp.eq.f32.partialorder %v1697_v16, 8.507059e+37 }
 0x34a   : > { %v4408_v22 = vpop.eup %4407  ;;  %v1690_v58 = vsub.f32 1.0, %v1689_v55  ;;  %4415 = vrcp.f32 %v7296_v15  ;;  %v1700_v38 = vor.u32 1.1754944e-38, %v1699_v33  ;;  %vm1678_vm9 = vweird.f32 %v7248_v34 }
 0x34b   : > { %v7316_v47 = vpop.eup %4409  ;;  %v1674_v18 = vmul.f32 %v4408_v22, %v7248_v34  ;;  %v1714_v37 = vand.u32 2147483648, %v7294_v31  ;;  %v1666_v62 = vsel %vm1665_vm3, %v4398_v10, %v1662_v7  ;;  %vm1694_vm10 = vweird.f32 %v4404_v60 }
 0x34c   : > { %v1691_v3 = vmul.f32 %v4404_v60, %v1690_v58  ;;  %v1712_v0 = vand.u32 2147483647, %v7294_v31  ;;  %v1671_v51 = vsel %vm7299_vm0, %v1670_v23, %v1666_v62  ;;  %vm7326_vm1 = vcmp.eq.f32.partialorder %v1682_v59, 8.507059e+37  ;;  %v1047_v58 = vpop.xlane.xlu1 %1046  ;;  %vm1695_vm8 = vmor %vm1693_vm15, %vm1694_vm10 }
 0x34d   : > { %v4412_v16 = vpop.eup %4411  ;;  %v1675_v55 = vsub.f32 1.0, %v1674_v18  ;;  %v1685_v33 = vor.u32 1.1754944e-38, %v1684_v21  ;;  %v2536_v5 = vadd.f32 %v7208_v57, %v1671_v51  ;;  %vm1708_vm11 = vweird.f32 %v7294_v31 }
 0x34e   : > { %v1692_v53 = vadd.f32 %v4404_v60, %v1691_v3  ;;  %v1742_v10 = vand.u32 2147483647, %v7296_v15  ;;  %v7333_v7 = vadd.f32 1.0, %v4412_v16  ;;  %vm1679_vm5 = vweird.f32 %v4408_v22 }
 0x34f   : > { %v4414_v9 = vpop.eup %4413  ;;  %v1676_v6 = vmul.f32 %v4408_v22, %v1675_v55  ;;  %v1715_v23 = vor.u32 1.1754944e-38, %v1714_v37  ;;  %v1744_v59 = vand.u32 2147483648, %v7296_v15  ;;  %v7338_v18 = vmul.f32 0.5, %v2536_v5  ;;  %vm1680_vm3 = vmor %vm1678_vm9, %vm1679_vm5 }
 0x350   : > { %v4416_v21 = vpop.eup %4415  ;;  %v1696_v57 = vsel %vm1695_vm8, %v4404_v60, %v1692_v53  ;;  %v1704_v62 = vmul.f32 %v4414_v9, %v7294_v31  ;;  %vm7341_vm0 = vcmp.eq.f32.partialorder %v1712_v0, 8.507059e+37  ;;  %vm1738_vm2 = vweird.f32 %v7296_v15 }
 0x351   : > { %v1701_v61 = vsel %vm7311_vm6, %v1700_v38, %v1696_v57  ;;  %v1677_v16 = vadd.f32 %v4408_v22, %v1676_v6  ;;  %v1734_v37 = vmul.f32 %v4416_v21, %v7296_v15  ;;  %v1100_v51 = vadd.f32 %v5463_v2, %v1047_v58 }
 0x352   : > { %vm8826_vm15 = vcmask 7168   ;;  %v2538_v53 = vadd.f32 %v7246_v54, %v1701_v61  ;;  %v1705_v60 = vsub.f32 1.0, %v1704_v62  ;;  %vm7356_vm10 = vcmp.eq.f32.partialorder %v1742_v10, 8.507059e+37 }
 0x353   : > { %v2691_v5 = vsel %vm8826_vm15, %v7338_v18, -inf  ;;  %4417 = vrcp.f32 %v7333_v7  ;;  %v1681_v38 = vsel %vm1680_vm3, %v4408_v22, %v1677_v16  ;;  %v1735_v55 = vsub.f32 1.0, %v1734_v37  ;;  %vm8829_vm8 = vmmov %vm8826_vm15 }
 0x354   : > { %v2692_v12 = vrot.slane %v2691_v5, 4  ;;  %v1745_v58 = vor.u32 1.1754944e-38, %v1744_v59  ;;  %v7361_v6 = vmul.f32 0.5, %v2538_v53  ;;  %v1686_v54 = vsel %vm7326_vm1, %v1685_v33, %v1681_v38  ;;  %vm8830_vm15 = vmmov %vm8829_vm8 }
 0x355   : > { %v1706_v57 = vmul.f32 %v4414_v9, %v1705_v60  ;;  %vm1709_vm6 = vweird.f32 %v4414_v9  ;;  %v2537_v62 = vadd.f32 %v7263_v13, %v1686_v54  ;;  %v1736_v10 = vmul.f32 %v4416_v21, %v1735_v55  ;;  %v1053_v54 = vpop.xlane.xlu0 %1052 }
 0x356   : > { %v2693_v34 = vmax.f32 %v2691_v5, %v2692_v12  ;;  %vm1739_vm9 = vweird.f32 %v4416_v21  ;;  %v2705_v61 = vsel %vm8829_vm8, %v7361_v6, -inf  ;;  %v1727_v22 = vand.u32 2147483647, %v7333_v7  ;;  %vm1710_vm1 = vmor %vm1708_vm11, %vm1709_vm6 }
 0x357   : > { %v1707_v29 = vadd.f32 %v4414_v9, %v1706_v57  ;;  %v4078_v16 = vmul.f32 -1.442695, %v1100_v51  ;;  %v2706_v37 = vrot.slane %v2705_v61, 4  ;;  %v7369_v53 = vmul.f32 0.5, %v2537_v62  ;;  %vm1740_vm11 = vmor %vm1738_vm2, %vm1739_vm9 }
 0x358   : > { %v2694_v59 = vrot.slane %v2693_v34, 2  ;;  %v1737_v8 = vadd.f32 %v4416_v21, %v1736_v10  ;;  %vm1723_vm5 = vweird.f32 %v7333_v7  ;;  %v1729_v13 = vand.u32 2147483648, %v7333_v7  ;;  %vm8836_vm6 = vmmov %vm8829_vm8 }
 0x359   : > { %v4418_v33 = vpop.eup %4417  ;;  %v1711_v5 = vsel %vm1710_vm1, %v4414_v9, %v1707_v29  ;;  %4419 = vpow2.f32 %v4078_v16  ;;  %v2707_v12 = vmax.f32 %v2705_v61, %v2706_v37  ;;  %v2698_v51 = vsel %vm8830_vm15, %v7369_v53, -inf  ;;  %vm8840_vm9 = vmmov %vm8836_vm6 }
 0x35a   : > { %v2695_v60 = vmax.f32 %v2693_v34, %v2694_v59  ;;  %v1716_v38 = vsel %vm7341_vm0, %v1715_v23, %v1711_v5  ;;  %v2699_v31 = vrot.slane %v2698_v51, 4  ;;  %v1741_v29 = vsel %vm1740_vm11, %v4416_v21, %v1737_v8  ;;  %v1050_v34 = vpop.xlane.xlu2 %1049  ;;  %vm8850_vm1 = vmmov %vm8836_vm6 }
 0x35b   : > { %v2539_v9 = vadd.f32 %v7276_v41, %v1716_v38  ;;  %v1719_v55 = vmul.f32 %v4418_v33, %v7333_v7  ;;  %v8831_v57 = vand.u32 2147483647, %v6778_v32  ;;  %v2708_v3 = vrot.slane %v2707_v12, 2  ;;  %v8842_v7 = vld [vmem:[#allocation2_spill] sm:$0xff]  ;;  %vm8851_vm15 = vmmov %vm8850_vm1 }
 0x35c   : > { %v2696_v62 = vrot.slane %v2695_v60, 1  ;;  %v1746_v23 = vsel %vm7356_vm10, %v1745_v58, %v1741_v29  ;;  %vm7392_vm0 = vcmp.eq.f32.partialorder %v1727_v22, 8.507059e+37  ;;  %v2700_v41 = vmax.f32 %v2698_v51, %v2699_v31  ;;  %vm8852_vm11 = vmmov %vm8850_vm1 }
 0x35d   : > { %vm7386_vm3 = vcmp.eq.f32.partialorder %v8831_v57, 8.507059e+37  ;;  %v7396_v21 = vmul.f32 0.5, %v2539_v9  ;;  %v2541_v10 = vadd.f32 %v7291_v46, %v1746_v23  ;;  %v1720_v61 = vsub.f32 1.0, %v1719_v55 }
 0x35e   : > { %v2697_v32 = vmax.f32 %v2695_v60, %v2696_v62  ;;  %v2709_v16 = vmax.f32 %v2707_v12, %v2708_v3  ;;  %vm1724_vm2 = vweird.f32 %v4418_v33  ;;  %v1102_v59 = vadd.f32 %v5463_v2, %v1053_v54 }
 0x35f   : > { %v4420_v37 = vpop.eup %4419  ;;  %v2701_v8 = vrot.slane %v2700_v41, 2  ;;  %v2712_v0 = vsel %vm8836_vm6, %v7396_v21, -inf  ;;  %v7402_v58 = vmul.f32 0.5, %v2541_v10  ;;  %v1721_v22 = vmul.f32 %v4418_v33, %v1720_v61  ;;  %vm1725_vm8 = vmor %vm1723_vm5, %vm1724_vm2 }
 0x360   : > { %v8837_v5 = vand.u32 2147483647, %v6855_v28  ;;  %v2825_v46 = vsub.f32 %v7338_v18, %v2697_v32  ;;  %v2710_v60 = vrot.slane %v2709_v16, 1  ;;  %v2713_v12 = vrot.slane %v2712_v0, 4 }
 0x361   : > { %v7411_v38 = vadd.f32 1.0, %v4420_v37  ;;  %v2702_v31 = vmax.f32 %v2700_v41, %v2701_v8  ;;  %v2726_v9 = vsel %vm8840_vm9, %v7402_v58, -inf  ;;  %v1722_v29 = vadd.f32 %v4418_v33, %v1721_v22  ;;  %v8843_v8 = vld [vmem:[#allocation34_spill] sm:$0xff] }
 0x362   : > { %vm7406_vm10 = vcmp.eq.f32.partialorder %v8837_v5, 8.507059e+37  ;;  %v1730_v55 = vor.u32 1.1754944e-38, %v1729_v13  ;;  %v2872_v54 = vmul.f32 1.442695, %v2825_v46  ;;  %v2711_v57 = vmax.f32 %v2709_v16, %v2710_v60 }
 0x363   : > { %v2714_v62 = vmax.f32 %v2712_v0, %v2713_v12  ;;  %v2727_v28 = vrot.slane %v2726_v9, 4  ;;  %v2703_v3 = vrot.slane %v2702_v31, 1  ;;  %v1726_v18 = vsel %vm1725_vm8, %v4418_v33, %v1722_v29  ;;  %v8845_v0 = vld [vmem:[#allocation3_spill] sm:$0xff] }
 0x364   : > { %4421 = vrcp.f32 %v7411_v38  ;;  %v4080_v23 = vmul.f32 -1.442695, %v1102_v59  ;;  %v2827_v41 = vsub.f32 %v7361_v6, %v2711_v57  ;;  %v7421_v13 = vadd.f32 1.0, %v7304_v48  ;;  %v8847_v57 = vld [vmem:[#allocation41_spill] sm:$0xff] }
 0x365   : > { %4423 = vpow2.f32 %v2872_v54  ;;  %v2715_v10 = vrot.slane %v2714_v62, 2  ;;  %v2728_v61 = vmax.f32 %v2726_v9, %v2727_v28  ;;  %v2704_v32 = vmax.f32 %v2702_v31, %v2703_v3 }
 0x366   : > { %v1731_v16 = vsel %vm7392_vm0, %v1730_v55, %v1726_v18  ;;  %v8844_v33 = vsel %vm6934_vm12, %v8842_v7, %v8843_v8  ;;  %v2876_v22 = vmul.f32 1.442695, %v2827_v41  ;;  %v8846_v48 = vsub.f32 1.0, %v7221_v39  ;;  %vm8853_vm0 = vmmov %vm8850_vm1 }
 0x367   : > { %v2339_v59 = vsel %vm7386_vm3, %v8845_v0, %v8844_v33  ;;  %v2716_v6 = vmax.f32 %v2714_v62, %v2715_v10  ;;  %v2729_v5 = vrot.slane %v2728_v61, 2  ;;  %v2826_v12 = vsub.f32 %v7369_v53, %v2704_v32  ;;  %v8849_v62 = vld [vmem:[#allocation42_spill] sm:$0xff]  ;;  %vm8859_vm8 = vmmov %vm8853_vm0 }
 0x368   : > { %v2540_v46 = vadd.f32 %v2339_v59, %v1731_v16  ;;  %v7436_v60 = vmul.f32 %v7157_v26, %v8846_v48  ;;  %4425 = vpow2.f32 %v4080_v23  ;;  %vm2452_vm12 = vweird.f32 %v7086_v56 }
 0x369   : > { %4427 = vpow2.f32 %v2876_v22  ;;  %v2717_v31 = vrot.slane %v2716_v6, 1  ;;  %v2730_v9 = vmax.f32 %v2728_v61, %v2729_v5  ;;  %v2874_v39 = vmul.f32 1.442695, %v2826_v12 }
 0x36a   : > { %v7440_v29 = vmul.f32 0.5, %v2540_v46  ;;  %v4422_v55 = vpop.eup %4421  ;;  %4429 = vrcp.f32 %v7421_v13  ;;  %v8848_v53 = vsel %vm7069_vm14, %v6906_v40, %v8847_v57  ;;  %vm2451_vm5 = vweird.f32 %v7010_v19 }
 0x36b   : > { %v2369_v28 = vsel %vm7406_vm10, %v8849_v62, %v8848_v53  ;;  %v7453_v3 = vpop.eup %4423  ;;  %v2718_v18 = vmax.f32 %v2716_v6, %v2717_v31  ;;  %v2731_v23 = vrot.slane %v2730_v9, 1  ;;  %v1749_v10 = vmul.f32 %v4422_v55, %v7411_v38  ;;  %vm7492_vm9 = vmor %vm2451_vm5, %vm2452_vm12 }
 0x36c   : > { %v2719_v41 = vsel %vm8850_vm1, %v7440_v29, -inf  ;;  %v3011_v30 = vsel %vm8851_vm15, %v7453_v3, 0.0  ;;  %4431 = vpow2.f32 %v2874_v39  ;;  %v1101_v61 = vadd.f32 %v5463_v2, %v1050_v34  ;;  %vm8860_vm12 = vmmov %vm8853_vm0 }
 0x36d   : > { %v2720_v40 = vrot.slane %v2719_v41, 4  ;;  %v3012_v51 = vrot.slane %v3011_v30, 4  ;;  %v2828_v32 = vsub.f32 %v7396_v21, %v2718_v18  ;;  %v2732_v16 = vmax.f32 %v2730_v9, %v2731_v23  ;;  %vm8861_vm1 = vmmov %vm8853_vm0 }
 0x36e   : > { %v1750_v37 = vsub.f32 1.0, %v1749_v10  ;;  %v4426_v7 = vpop.eup %4425  ;;  %vm1753_vm14 = vweird.f32 %v7411_v38  ;;  %v1757_v33 = vand.u32 2147483647, %v7411_v38  ;;  %v1759_v0 = vand.u32 2147483648, %v7411_v38 }
 0x36f   : > { %v2721_v8 = vmax.f32 %v2719_v41, %v2720_v40  ;;  %v7466_v59 = vpop.eup %4427  ;;  %v3013_v22 = vadd.f32 %v3012_v51, %v3011_v30  ;;  %v2878_v6 = vmul.f32 1.442695, %v2828_v32  ;;  %v2830_v5 = vsub.f32 %v7402_v58, %v2732_v16 }
 0x370   : > { %v1751_v46 = vmul.f32 %v4422_v55, %v1750_v37  ;;  %v7469_v48 = vpop.eup %4429  ;;  %v3025_v21 = vsel %vm8852_vm11, %v7466_v59, 0.0  ;;  %vm1754_vm3 = vweird.f32 %v4422_v55  ;;  %v4079_v31 = vmul.f32 -1.442695, %v1101_v61 }
 0x371   : > { %v2722_v12 = vrot.slane %v2721_v8, 2  ;;  %v3014_v9 = vrot.slane %v3013_v22, 2  ;;  %v3026_v34 = vrot.slane %v3025_v21, 4  ;;  %4433 = vpow2.f32 %v2878_v6  ;;  %vm1755_vm2 = vmor %vm1753_vm14, %vm1754_vm3 }
 0x372   : > { %v2882_v39 = vmul.f32 1.442695, %v2830_v5  ;;  %v7473_v57 = vpop.eup %4431  ;;  %v1752_v62 = vadd.f32 %v4422_v55, %v1751_v46  ;;  %v1760_v18 = vor.u32 1.1754944e-38, %v1759_v0  ;;  %v7475_v23 = vadd.f32 1.0, %v4426_v7 }
 0x373   : > { %v2723_v53 = vmax.f32 %v2721_v8, %v2722_v12  ;;  %v3015_v58 = vadd.f32 %v3014_v9, %v3013_v22  ;;  %v3027_v41 = vadd.f32 %v3026_v34, %v3025_v21  ;;  %v3018_v10 = vsel %vm8853_vm0, %v7473_v57, 0.0 }
 0x374   : > { %4435 = vpow2.f32 %v2882_v39  ;;  %v8854_v30 = vand.u32 2147483647, %v6882_v36  ;;  %v3019_v61 = vrot.slane %v3018_v10, 4  ;;  %v1756_v32 = vsel %vm1755_vm2, %v4422_v55, %v1752_v62 }
 0x375   : > { %v2724_v51 = vrot.slane %v2723_v53, 1  ;;  %vm1758_vm10 = vcmp.eq.f32.partialorder %v1757_v33, 8.507059e+37  ;;  %v3016_v38 = vrot.slane %v3015_v58, 1  ;;  %v3028_v37 = vrot.slane %v3027_v41, 2 }
 0x376   : > { %vm7484_vm6 = vcmp.eq.f32.partialorder %v8854_v30, 8.507059e+37  ;;  %v1761_v7 = vsel %vm1758_vm10, %v1760_v18, %v1756_v32  ;;  %4437 = vpow2.f32 %v4079_v31  ;;  %v3020_v8 = vadd.f32 %v3019_v61, %v3018_v10 }
 0x377   : > { %v2725_v55 = vmax.f32 %v2723_v53, %v2724_v51  ;;  %v2542_v33 = vadd.f32 %v2369_v28, %v1761_v7  ;;  %v7500_v0 = vpop.eup %4433  ;;  %v7504_v22 = vadd.f32 %v7157_v26, %v7436_v60  ;;  %v7506_v6 = vadd.f32 %v3016_v38, %v3015_v58 }
 0x378   : > { %v3029_v5 = vadd.f32 %v3028_v37, %v3027_v41  ;;  %4439 = vrcp.f32 %v7475_v23  ;;  %v3021_v46 = vrot.slane %v3020_v8, 2  ;;  %v3032_v21 = vsel %vm8859_vm8, %v7500_v0, 0.0 }
 0x379   : > { %v2829_v12 = vsub.f32 %v7440_v29, %v2725_v55  ;;  %v7512_v31 = vmul.f32 0.5, %v2542_v33  ;;  %v7518_v9 = vmul.f32 %v7316_v47, %v7223_v4  ;;  %v7522_v60 = vmul.f32 %v7469_v48, %v7421_v13  ;;  %v8863_v55 = vld [vmem:[#allocation5_spill] sm:$0xff] }
 0x37a   : > { %v7514_v28 = vpop.eup %4435  ;;  %4441 = vrcp.f32 %v7506_v6  ;;  %v1789_v34 = vand.u32 2147483648, %v7475_v23  ;;  %v3030_v39 = vrot.slane %v3029_v5, 1  ;;  %v3022_v53 = vadd.f32 %v3021_v46, %v3020_v8  ;;  %v8865_v46 = vld [vmem:[#allocation39_spill] sm:$0xff] }
 0x37b   : > { %v3033_v62 = vrot.slane %v3032_v21, 4  ;;  %v3046_v29 = vsel %vm8860_vm12, %v7514_v28, 0.0  ;;  %v3364_v58 = vand.u32 2147483647, %v7506_v6  ;;  %v3366_v41 = vand.u32 2147483648, %v7506_v6 }
 0x37c   : > { %v4438_v18 = vpop.eup %4437  ;;  %v3047_v10 = vrot.slane %v3046_v29, 4  ;;  %v2880_v30 = vmul.f32 1.442695, %v2829_v12  ;;  %v7530_v61 = vadd.f32 %v3030_v39, %v3029_v5  ;;  %v3023_v51 = vrot.slane %v3022_v53, 1 }
 0x37d   : > { %v3034_v32 = vadd.f32 %v3033_v62, %v3032_v21  ;;  %v2733_v38 = vsel %vm8861_vm1, %v7512_v31, -inf  ;;  %vm8862_vm5 = vnez %v8780_v43  ;;  %v7548_v12 = vor.u32 1.1754944e-38, %v1789_v34 }
 0x37e   : > { %v7534_v37 = vpop.eup %4439  ;;  %v3048_v7 = vadd.f32 %v3047_v10, %v3046_v29  ;;  %4443 = vpow2.f32 %v2880_v30  ;;  %v2734_v8 = vrot.slane %v2733_v38, 4  ;;  %v8864_v33 = vsel %vm8862_vm5, %v6943_v14, %v8863_v55  ;;  %vm8872_vm5 = vmmov %vm8853_vm0 }
 0x37f   : > { %v7544_v5 = vsel %vm7484_vm6, %v8865_v46, %v8864_v33  ;;  %4445 = vrcp.f32 %v7530_v61  ;;  %v7550_v39 = vadd.f32 1.0, %v4438_v18  ;;  %v7552_v29 = vadd.f32 %v3023_v51, %v3022_v53 }
 0x380   : > { %v4442_v62 = vpop.eup %4441  ;;  %v3035_v43 = vrot.slane %v3034_v32, 2  ;;  %v3049_v10 = vrot.slane %v3048_v7, 2  ;;  %v2735_v30 = vmax.f32 %v2733_v38, %v2734_v8  ;;  %vm3360_vm15 = vweird.f32 %v7506_v6 }
 0x381   : > { %v3356_v14 = vmul.f32 %v4442_v62, %v7506_v6  ;;  %vm7556_vm14 = vcmp.eq.f32.partialorder %v3364_v58, 8.507059e+37  ;;  %v3367_v55 = vor.u32 1.1754944e-38, %v3366_v41  ;;  %v3394_v34 = vand.u32 2147483647, %v7530_v61 }
 0x382   : > { %v3396_v18 = vand.u32 2147483648, %v7530_v61  ;;  %4447 = vrcp.f32 %v7552_v29  ;;  %v1779_v53 = vmul.f32 %v7534_v37, %v7475_v23  ;;  %v3036_v38 = vadd.f32 %v3035_v43, %v3034_v32 }
 0x383   : > { %v3357_v51 = vsub.f32 1.0, %v3356_v14  ;;  %v3050_v8 = vadd.f32 %v3049_v10, %v3048_v7  ;;  %v2736_v33 = vrot.slane %v2735_v30, 2  ;;  %vm3361_vm11 = vweird.f32 %v4442_v62 }
 0x384   : > { %v7565_v46 = vpop.eup %4443  ;;  %vm3390_vm3 = vweird.f32 %v7530_v61  ;;  %v3379_v58 = vand.u32 2147483647, %v7552_v29  ;;  %v3381_v41 = vand.u32 2147483648, %v7552_v29  ;;  %v3037_v36 = vrot.slane %v3036_v38, 1  ;;  %vm3362_vm6 = vmor %vm3360_vm15, %vm3361_vm11 }
 0x385   : > { %v4446_v15 = vpop.eup %4445  ;;  %v3358_v54 = vmul.f32 %v4442_v62, %v3357_v51  ;;  %v3051_v21 = vrot.slane %v3050_v8, 1  ;;  %v3039_v4 = vsel %vm8853_vm0, %v7565_v46, 0.0  ;;  %vm7573_vm2 = vcmp.eq.f32.partialorder %v3394_v34, 8.507059e+37 }
 0x386   : > { %v3386_v32 = vmul.f32 %v4446_v15, %v7530_v61  ;;  %v3040_v43 = vrot.slane %v3039_v4, 4  ;;  %v2737_v10 = vmax.f32 %v2735_v30, %v2736_v33  ;;  %v3397_v35 = vor.u32 1.1754944e-38, %v3396_v18 }
 0x387   : > { %v3359_v14 = vadd.f32 %v4442_v62, %v3358_v54  ;;  %v7577_v1 = vadd.f32 %v3037_v36, %v3036_v38  ;;  %v7579_v50 = vadd.f32 %v3051_v21, %v3050_v8  ;;  %vm3375_vm10 = vweird.f32 %v7552_v29 }
 0x388   : > { %v4448_v51 = vpop.eup %4447  ;;  %v3387_v49 = vsub.f32 1.0, %v3386_v32  ;;  %v3382_v34 = vor.u32 1.1754944e-38, %v3381_v41  ;;  %v1780_v45 = vsub.f32 1.0, %v1779_v53  ;;  %vm3391_vm8 = vweird.f32 %v4446_v15 }
 0x389   : > { %v3363_v27 = vsel %vm3362_vm6, %v4442_v62, %v3359_v14  ;;  %v3371_v54 = vmul.f32 %v4448_v51, %v7552_v29  ;;  %vm7586_vm12 = vcmp.eq.f32.partialorder %v3379_v58, 8.507059e+37  ;;  %4449 = vrcp.f32 %v7577_v1  ;;  %vm3392_vm15 = vmor %vm3390_vm3, %vm3391_vm8  ;;  %v8878_v29 = vld [vmem:[#allocation18_spill] sm:$0xff] }
 0x38a   : > { %v3368_v6 = vsel %vm7556_vm14, %v3367_v55, %v3363_v27  ;;  %v3388_v21 = vmul.f32 %v4446_v15, %v3387_v49  ;;  %v3041_v30 = vadd.f32 %v3040_v43, %v3039_v4  ;;  %v2738_v18 = vrot.slane %v2737_v10, 1  ;;  %v8873_v27 = vld [vmem:[#allocation14_spill] sm:$0xff]  ;;  %vm8874_vm6 = vmmov %vm8872_vm5 }
 0x38b   : > { %v3369_v38 = vmul.f32 %v7453_v3, %v3368_v6  ;;  %v3372_v53 = vsub.f32 1.0, %v3371_v54  ;;  %v3411_v62 = vand.u32 2147483648, %v7577_v1  ;;  %4451 = vrcp.f32 %v7579_v50 }
 0x38c   : > { %v3389_v8 = vadd.f32 %v4446_v15, %v3388_v21  ;;  %v3409_v33 = vand.u32 2147483647, %v7577_v1  ;;  %v1781_v58 = vmul.f32 %v7534_v37, %v1780_v45  ;;  %vm1784_vm1 = vweird.f32 %v7534_v37 }
 0x38d   : > { %3625 = vst.msk [vmem:[%s6117_s12 + $0x78] sm:$0xff] %vm8872_vm5, %v3369_v38  ;;  %v3657_v49 = vmul.f32 %v3369_v38, %v8873_v27  ;;  %v3373_v4 = vmul.f32 %v4448_v51, %v3372_v53  ;;  %vm3376_vm14 = vweird.f32 %v4448_v51  ;;  %vm1783_vm11 = vweird.f32 %v7475_v23 }
 0x38e   : > { %4453 = vrcp.f32 %v7550_v39  ;;  %v3393_v3 = vsel %vm3392_vm15, %v4446_v15, %v3389_v8  ;;  %vm3405_vm0 = vweird.f32 %v7577_v1  ;;  %v3439_v45 = vand.u32 2147483647, %v7579_v50  ;;  %vm3377_vm3 = vmor %vm3375_vm10, %vm3376_vm14 }
 0x38f   : > { %v3042_v40 = vrot.slane %v3041_v30, 2  ;;  %v2739_v55 = vmax.f32 %v2737_v10, %v2738_v18  ;;  %v4450_v41 = vpop.eup %4449  ;;  %v3779_v32 = vsel %vm8874_vm6, %v3657_v49, 0.0  ;;  %v3398_v61 = vsel %vm7573_vm2, %v3397_v35, %v3393_v3  ;;  %vm8877_vm15 = vmmov %vm8874_vm6  ;;  %v8889_v10 = vld [vmem:[#allocation17_spill] sm:$0xff] }
 0x390   : > { %v3374_v43 = vadd.f32 %v4448_v51, %v3373_v4  ;;  %v3412_v14 = vor.u32 1.1754944e-38, %v3411_v62  ;;  %v3780_v54 = vrot.slane %v3779_v32, 4  ;;  %v3399_v6 = vmul.f32 %v7466_v59, %v3398_v61  ;;  %vm8882_vm14 = vmmov %vm8874_vm6 }
 0x391   : > { %v3401_v15 = vmul.f32 %v4450_v41, %v7577_v1  ;;  %vm7617_vm8 = vcmp.eq.f32.partialorder %v3409_v33, 8.507059e+37  ;;  %v3441_v21 = vand.u32 2147483648, %v7579_v50  ;;  %v4452_v7 = vpop.eup %4451  ;;  %vm3406_vm2 = vweird.f32 %v4450_v41 }
 0x392   : > { %v3378_v35 = vsel %vm3377_vm3, %v4448_v51, %v3374_v43  ;;  %vm3435_vm5 = vweird.f32 %v7579_v50  ;;  %v3043_v18 = vadd.f32 %v3042_v40, %v3041_v30  ;;  %v2831_v59 = vsub.f32 %v7512_v31, %v2739_v55  ;;  %3627 = vst.msk [vmem:[%s6117_s12 + $0x88] sm:$0xff] %vm8877_vm15, %v3399_v6  ;;  %vm7650_vm3 = vmor %vm1783_vm11, %vm1784_vm1 }
 0x393   : > { %v3781_v38 = vadd.f32 %v3780_v54, %v3779_v32  ;;  %v3659_v53 = vmul.f32 %v3399_v6, %v8878_v29  ;;  %v3383_v62 = vsel %vm7586_vm12, %v3382_v34, %v3378_v35  ;;  %v3402_v8 = vsub.f32 1.0, %v3401_v15  ;;  %vm8883_vm12 = vmmov %vm8874_vm6  ;;  %v8884_v32 = vld [vmem:[#allocation16_spill] sm:$0xff] }
 0x394   : > { %v8879_v33 = vand.u32 2147483647, %v7475_v23  ;;  %v7635_v27 = vpop.eup %4453  ;;  %v3384_v31 = vmul.f32 %v7473_v57, %v3383_v62  ;;  %v3431_v30 = vmul.f32 %v4452_v7, %v7579_v50  ;;  %v3044_v49 = vrot.slane %v3043_v18, 1  ;;  %vm8887_vm15 = vmmov %vm8883_vm12 }
 0x395   : > { %v1782_v4 = vadd.f32 %v7534_v37, %v1781_v58  ;;  %v3782_v3 = vrot.slane %v3781_v38, 2  ;;  %v3793_v36 = vsel %vm8882_vm14, %v3659_v53, 0.0  ;;  %v3403_v34 = vmul.f32 %v4450_v41, %v3402_v8  ;;  %vm3407_vm14 = vmor %vm3405_vm0, %vm3406_vm2 }
 0x396   : > { %vm7631_vm10 = vcmp.eq.f32.partialorder %v8879_v33, 8.507059e+37  ;;  %v2884_v40 = vmul.f32 1.442695, %v2831_v59  ;;  %v3794_v55 = vrot.slane %v3793_v36, 4  ;;  %3626 = vst.msk [vmem:[%s6117_s12 + $0x80] sm:$0xff] %vm8883_vm12, %v3384_v31  ;;  %v3658_v61 = vmul.f32 %v3384_v31, %v8884_v32  ;;  %vm8890_vm2 = vmmov %vm8883_vm12 }
 0x397   : > { %v3432_v43 = vsub.f32 1.0, %v3431_v30  ;;  %v7644_v54 = vadd.f32 %v3044_v49, %v3043_v18  ;;  %v3783_v6 = vadd.f32 %v3782_v3, %v3781_v38  ;;  %v3404_v57 = vadd.f32 %v4450_v41, %v3403_v34 }
 0x398   : > { %vm3436_vm6 = vweird.f32 %v4452_v7  ;;  %4455 = vpow2.f32 %v2884_v40  ;;  %v3795_v15 = vadd.f32 %v3794_v55, %v3793_v36  ;;  %v3786_v35 = vsel %vm8887_vm15, %v3658_v61, 0.0 }
 0x399   : > { %v3433_v18 = vmul.f32 %v4452_v7, %v3432_v43  ;;  %4457 = vrcp.f32 %v7644_v54  ;;  %v3784_v59 = vrot.slane %v3783_v6, 1  ;;  %v3787_v38 = vrot.slane %v3786_v35, 4  ;;  %vm3437_vm1 = vmor %vm3435_vm5, %vm3436_vm6 }
 0x39a   : > { %v3408_v29 = vsel %vm3407_vm14, %v4450_v41, %v3404_v57  ;;  %v1786_v23 = vsel %vm7650_vm3, %v7534_v37, %v1782_v4  ;;  %v3796_v53 = vrot.slane %v3795_v15, 2  ;;  %v3442_v33 = vor.u32 1.1754944e-38, %v3441_v21  ;;  %vm8891_vm5 = vmmov %vm8890_vm2 }
 0x39b   : > { %v3413_v62 = vsel %vm7617_vm8, %v3412_v14, %v3408_v29  ;;  %v3434_v8 = vadd.f32 %v4452_v7, %v3433_v18  ;;  %v3785_v31 = vadd.f32 %v3784_v59, %v3783_v6  ;;  %v3788_v1 = vadd.f32 %v3787_v38, %v3786_v35  ;;  %vm8895_vm3 = vmmov %vm8890_vm2  ;;  %v8899_v29 = vld [vmem:[#allocation4_spill] sm:$0xff] }
 0x39c   : > { %v3414_v30 = vmul.f32 %v7500_v0, %v3413_v62  ;;  %v3424_v41 = vand.u32 2147483647, %v7644_v54  ;;  %v3797_v49 = vadd.f32 %v3796_v53, %v3795_v15  ;;  %vm3440_vm11 = vcmp.eq.f32.partialorder %v3439_v45, 8.507059e+37 }
 0x39d   : > { %v3438_v3 = vsel %vm3437_vm1, %v4452_v7, %v3434_v8  ;;  %v1791_v37 = vsel %vm7631_vm10, %v7548_v12, %v1786_v23  ;;  %vm8888_vm0 = vcmask 0   ;;  %v3789_v0 = vrot.slane %v3788_v1, 2  ;;  %vm8892_vm10 = vmmov %vm8890_vm2 }
 0x39e   : > { %v7674_v14 = vpop.eup %4455  ;;  %3914 = vst.msk [vmem:[%s6175_s16 + $0xf] sm:$0x1] %vm8888_vm0, %v3785_v31  ;;  %v3660_v21 = vmul.f32 %v3414_v30, %v8889_v10  ;;  %v3443_v4 = vsel %vm3440_vm11, %v3442_v33, %v3438_v3  ;;  %vm3420_vm8 = vweird.f32 %v7644_v54  ;;  %v3426_v7 = vand.u32 2147483648, %v7644_v54  ;;  %vm8897_vm14 = vmmov %vm8888_vm0  ;;  %v1056_v3 = vpop.xlane.xlu1 %1055 }
 0x39f   : > { %v4458_v36 = vpop.eup %4457  ;;  %v3798_v50 = vrot.slane %v3797_v49, 1  ;;  %3628 = vst.msk [vmem:[%s6117_s12 + $0x90] sm:$0xff] %vm8890_vm2, %v3414_v30  ;;  %v3444_v45 = vmul.f32 %v7514_v28, %v3443_v4  ;;  %v3053_v12 = vsel %vm8891_vm5, %v7674_v14, 0.0  ;;  %v2544_v51 = vadd.f32 %v7544_v5, %v1791_v37  ;;  %v8896_v28 = vld [vmem:[#allocation21_spill] sm:$0xff]  ;;  %vm8898_vm1 = vmmov %vm8890_vm2 }
 0x3a0   : > { %v3790_v34 = vadd.f32 %v3789_v0, %v3788_v1  ;;  %v3800_v40 = vsel %vm8892_vm10, %v3660_v21, 0.0  ;;  %v3416_v55 = vmul.f32 %v4458_v36, %v7644_v54  ;;  %vm7689_vm12 = vcmp.eq.f32.partialorder %v3424_v41, 8.507059e+37  ;;  %vm8903_vm2 = vmmov %vm8898_vm1 }
 0x3a1   : > { %vm2482_vm6 = vweird.f32 %v7157_v26  ;;  %v3799_v61 = vadd.f32 %v3798_v50, %v3797_v49  ;;  %v3801_v43 = vrot.slane %v3800_v40, 4  ;;  %3630 = vst.msk [vmem:[%s6117_s12 + $0xa0] sm:$0xff] %vm8895_vm3, %v3444_v45  ;;  %v3662_v6 = vmul.f32 %v3444_v45, %v8896_v28  ;;  %vm8904_vm5 = vmmov %vm8897_vm14 }
 0x3a2   : > { %v3054_v57 = vrot.slane %v3053_v12, 4  ;;  %v3791_v5 = vrot.slane %v3790_v34, 1  ;;  %v3417_v58 = vsub.f32 1.0, %v3416_v55  ;;  %v7697_v15 = vmul.f32 0.5, %v2544_v51 }
 0x3a3   : > { %v1764_v35 = vmul.f32 %v7635_v27, %v7550_v39  ;;  %vm2481_vm15 = vweird.f32 %v7059_v11  ;;  %3916 = vst.msk [vmem:[%s6175_s16 + $0x11] sm:$0x1] %vm8897_vm14, %v3799_v61  ;;  %v3802_v18 = vadd.f32 %v3801_v43, %v3800_v40  ;;  %v3814_v59 = vsel %vm8898_vm1, %v3662_v6, 0.0 }
 0x3a4   : > { %vm3421_vm11 = vweird.f32 %v4458_v36  ;;  %v3055_v38 = vadd.f32 %v3054_v57, %v3053_v12  ;;  %v8900_v23 = vand.u32 2147483647, %v8899_v29  ;;  %v3792_v62 = vadd.f32 %v3791_v5, %v3790_v34 }
 0x3a5   : > { %v3815_v8 = vrot.slane %v3814_v59, 4  ;;  %v3418_v33 = vmul.f32 %v4458_v36, %v3417_v58  ;;  %v2747_v31 = vsel %vm8903_vm2, %v7697_v15, -inf  ;;  %v3803_v1 = vrot.slane %v3802_v18, 2  ;;  %vm3422_vm3 = vmor %vm3420_vm8, %vm3421_vm11 }
 0x3a6   : > { %vm7707_vm0 = vcmp.eq.f32.partialorder %v8900_v23, 8.507059e+37  ;;  %v3056_v30 = vrot.slane %v3055_v38, 2  ;;  %v2748_v41 = vrot.slane %v2747_v31, 4  ;;  %v1765_v49 = vsub.f32 1.0, %v1764_v35  ;;  %3915 = vst.msk [vmem:[%s6175_s16 + $0x10] sm:$0x1] %vm8904_vm5, %v3792_v62  ;;  %v1062_v35 = vpop.xlane.xlu0 %1061  ;;  %vm8917_vm2 = vmmov %vm8898_vm1 }
 0x3a7   : > { %v3816_v37 = vadd.f32 %v3815_v8, %v3814_v59  ;;  %v3419_v0 = vadd.f32 %v4458_v36, %v3418_v33  ;;  %v3427_v10 = vor.u32 1.1754944e-38, %v3426_v7  ;;  %vm1769_vm10 = vweird.f32 %v7635_v27  ;;  %v8911_v62 = vld [vmem:[#allocation36_spill] sm:$0xff]  ;;  %v8913_v8 = vld [vmem:[#allocation33_spill] sm:$0xff]  ;;  %v8914_v33 = vld [vmem:[#allocation38_spill] sm:$0xff] }
 0x3a8   : > { %v3804_v21 = vadd.f32 %v3803_v1, %v3802_v18  ;;  %v3057_v4 = vadd.f32 %v3056_v30, %v3055_v38  ;;  %v2749_v50 = vmax.f32 %v2747_v31, %v2748_v41  ;;  %v1766_v45 = vmul.f32 %v7635_v27, %v1765_v49  ;;  %v8909_v18 = vld [vmem:[#allocation19_spill] sm:$0xff] }
 0x3a9   : > { %v3817_v12 = vrot.slane %v3816_v37, 2  ;;  %v3423_v51 = vsel %vm3422_vm3, %v4458_v36, %v3419_v0  ;;  %v1772_v34 = vand.u32 2147483647, %v7550_v39  ;;  %v1774_v40 = vand.u32 2147483648, %v7550_v39  ;;  %v8916_v1 = vld [vmem:[#allocation35_spill] sm:$0xff] }
 0x3aa   : > { %v3805_v55 = vrot.slane %v3804_v21, 1  ;;  %v3428_v7 = vsel %vm7689_vm12, %v3427_v10, %v3423_v51  ;;  %v3058_v61 = vrot.slane %v3057_v4, 1  ;;  %v2750_v43 = vrot.slane %v2749_v50, 2  ;;  %vm7739_vm12 = vmor %vm2481_vm15, %vm2482_vm6 }
 0x3ab   : > { %v3818_v28 = vadd.f32 %v3817_v12, %v3816_v37  ;;  %v3429_v54 = vmul.f32 %v7565_v46, %v3428_v7  ;;  %v1767_v6 = vadd.f32 %v7635_v27, %v1766_v45  ;;  %vm1768_vm8 = vweird.f32 %v7550_v39  ;;  %vm8910_vm6 = vmmov %vm8904_vm5  ;;  %v1059_v37 = vpop.xlane.xlu2 %1058 }
 0x3ac   : > { %v3806_v36 = vadd.f32 %v3805_v55, %v3804_v21  ;;  %v7727_v57 = vadd.f32 %v3058_v61, %v3057_v4  ;;  %v2751_v5 = vmax.f32 %v2749_v50, %v2750_v43  ;;  %vm7731_vm14 = vmor %vm1768_vm8, %vm1769_vm10  ;;  %v1775_v58 = vor.u32 1.1754944e-38, %v1774_v40  ;;  %v1065_v50 = vpop.xlane.xlu1 %1064 }
 0x3ad   : > { %v3819_v39 = vrot.slane %v3818_v28, 1  ;;  %3629 = vst.msk [vmem:[%s6117_s12 + $0x98] sm:$0xff] %vm8898_vm1, %v3429_v54  ;;  %v3661_v59 = vmul.f32 %v3429_v54, %v8909_v18  ;;  %v1771_v38 = vsel %vm7731_vm14, %v7635_v27, %v1767_v6  ;;  %v1103_v29 = vadd.f32 %v5463_v2, %v1056_v3  ;;  %vm8929_vm8 = vmmov %vm8898_vm1 }
 0x3ae   : > { %v2484_v23 = vsel %vm7739_vm12, %v7157_v26, %v7504_v22  ;;  %3917 = vst.msk [vmem:[%s6175_s16 + $0x12] sm:$0x1] %vm8910_vm6, %v3806_v36  ;;  %4459 = vrcp.f32 %v7727_v57  ;;  %vm1773_vm15 = vcmp.eq.f32.partialorder %v1772_v34, 8.507059e+37  ;;  %vm8912_vm11 = vnez %v8911_v62  ;;  %v8958_v26 = vld [vmem:[#allocation43_spill] sm:$0xff]  ;;  %v8959_v22 = vld [vmem:[#allocation10_spill] sm:$0xff] }
 0x3af   : > { %v8915_v31 = vsel %vm8912_vm11, %v8913_v8, %v8914_v33  ;;  %v3820_v30 = vadd.f32 %v3819_v39, %v3818_v28  ;;  %v3807_v41 = vsel %vm8917_vm2, %v3661_v59, 0.0  ;;  %v2752_v49 = vrot.slane %v2751_v5, 1  ;;  %v8953_v28 = vld [vmem:[#allocation15_spill] sm:$0xff] }
 0x3b0   : > { %v2384_v27 = vsel %vm7707_vm0, %v8916_v1, %v8915_v31  ;;  %v1776_v3 = vsel %vm1773_vm15, %v1775_v58, %v1771_v38  ;;  %v2493_v0 = vsub.f32 1.0, %v7522_v60  ;;  %v2500_v10 = vand.u32 2147483647, %v7421_v13  ;;  %vm8921_vm0 = vmmov %vm8910_vm6  ;;  %v8961_v38 = vld [vmem:[#allocation9_spill] sm:$0xff] }
 0x3b1   : > { %v3808_v21 = vrot.slane %v3807_v41, 4  ;;  %v2543_v4 = vadd.f32 %v2384_v27, %v1776_v3  ;;  %v8918_v45 = vand.u32 2147483647, %v6899_v24  ;;  %v2508_v53 = vsub.f32 1.0, %v7518_v9  ;;  %3919 = vst.msk [vmem:[%s6175_s16 + $0x14] sm:$0x1] %vm8921_vm0, %v3820_v30  ;;  %v1071_v27 = vpop.xlane.xlu0 %1070 }
 0x3b2   : > { %v2753_v51 = vmax.f32 %v2751_v5, %v2752_v49  ;;  %v4081_v34 = vmul.f32 -1.442695, %v1103_v29  ;;  %v1105_v40 = vadd.f32 %v5463_v2, %v1062_v35  ;;  %v2502_v60 = vand.u32 2147483648, %v7421_v13  ;;  %v8922_v24 = vld [vmem:[#allocation6_spill] sm:$0xff] }
 0x3b3   : > { %vm7770_vm5 = vcmp.eq.f32.partialorder %v8918_v45, 8.507059e+37  ;;  %v3809_v55 = vadd.f32 %v3808_v21, %v3807_v41  ;;  %v7779_v7 = vmul.f32 0.5, %v2543_v4  ;;  %v1104_v61 = vadd.f32 %v5463_v2, %v1059_v37  ;;  %v1068_v45 = vpop.xlane.xlu2 %1067 }
 0x3b4   : > { %v8923_v43 = vand.u32 2147483647, %v8922_v24  ;;  %v8926_v9 = vand.u32 2147483647, %v6941_v42  ;;  %v2833_v6 = vsub.f32 %v7697_v15, %v2753_v51  ;;  %4461 = vpow2.f32 %v4081_v34  ;;  %v4460_v32 = vpop.eup %4459  ;;  %v8939_v34 = vld [vmem:[#allocation32_spill] sm:$0xff] }
 0x3b5   : > { %v4083_v36 = vmul.f32 -1.442695, %v1105_v40  ;;  %v1106_v5 = vadd.f32 %v5463_v2, %v1065_v50  ;;  %v2494_v58 = vmul.f32 %v7469_v48, %v2493_v0  ;;  %v3810_v35 = vrot.slane %v3809_v55, 2 }
 0x3b6   : > { %vm7784_vm10 = vcmp.eq.f32.partialorder %v8923_v43, 8.507059e+37  ;;  %vm7790_vm3 = vcmp.eq.f32.partialorder %v8926_v9, 8.507059e+37  ;;  %v2740_v39 = vsel %vm8929_vm8, %v7779_v7, -inf  ;;  %v4082_v18 = vmul.f32 -1.442695, %v1104_v61 }
 0x3b7   : > { %v8930_v42 = vand.u32 2147483647, %v7010_v19  ;;  %v8933_v15 = vand.u32 2147483647, %v7059_v11  ;;  %v7812_v29 = vmul.f32 %v7316_v47, %v2508_v53  ;;  %v3446_v62 = vmul.f32 %v4460_v32, %v7727_v57 }
 0x3b8   : > { %v2888_v8 = vmul.f32 1.442695, %v2833_v6  ;;  %v2741_v33 = vrot.slane %v2740_v39, 4  ;;  %v3811_v31 = vadd.f32 %v3810_v35, %v3809_v55  ;;  %v3454_v19 = vand.u32 2147483647, %v7727_v57  ;;  %v8941_v55 = vld [vmem:[#allocation46_spill] sm:$0xff] }
 0x3b9   : > { %vm7801_vm14 = vcmp.eq.f32.partialorder %v8930_v42, 8.507059e+37  ;;  %vm7807_vm1 = vcmp.eq.f32.partialorder %v8933_v15, 8.507059e+37  ;;  %4463 = vpow2.f32 %v4083_v36  ;;  %v4084_v1 = vmul.f32 -1.442695, %v1106_v5  ;;  %v8946_v36 = vld [vmem:[#allocation37_spill] sm:$0xff]  ;;  %v8948_v5 = vld [vmem:[#allocation40_spill] sm:$0xff] }
 0x3ba   : > { %v8936_v30 = vand.u32 2147483647, %v6963_v44  ;;  %v3447_v41 = vsub.f32 1.0, %v3446_v62  ;;  %v3456_v49 = vand.u32 2147483648, %v7727_v57  ;;  %4465 = vpow2.f32 %v2888_v8  ;;  %v4462_v21 = vpop.eup %4461 }
 0x3bb   : > { %v2742_v3 = vmax.f32 %v2740_v39, %v2741_v33  ;;  %v7824_v37 = vadd.f32 %v7469_v48, %v2494_v58  ;;  %v3812_v0 = vrot.slane %v3811_v31, 1  ;;  %vm3451_vm15 = vweird.f32 %v4460_v32  ;;  %v8949_v58 = vld [vmem:[#allocation47_spill] sm:$0xff]  ;;  %v8951_v39 = vld [vmem:[#allocation45_spill] sm:$0xff] }
 0x3bc   : > { %vm7818_vm6 = vcmp.eq.f32.partialorder %v8936_v30, 8.507059e+37  ;;  %4467 = vpow2.f32 %v4082_v18  ;;  %v3448_v4 = vmul.f32 %v4460_v32, %v3447_v41  ;;  %v1108_v44 = vadd.f32 %v5463_v2, %v1071_v27 }
 0x3bd   : > { %v2743_v50 = vrot.slane %v2742_v3, 2  ;;  %4469 = vpow2.f32 %v4084_v1  ;;  %v3813_v53 = vadd.f32 %v3812_v0, %v3811_v31  ;;  %vm3450_vm11 = vweird.f32 %v7727_v57  ;;  %v8956_v1 = vld [vmem:[#allocation12_spill] sm:$0xff] }
 0x3be   : > { %v7828_v51 = vadd.f32 1.0, %v4462_v21  ;;  %v8940_v40 = vsel %vm7169_vm4, %v6995_v52, %v8939_v34  ;;  %v3449_v24 = vadd.f32 %v4460_v32, %v3448_v4  ;;  %vm7840_vm2 = vcmp.eq.f32.partialorder %v3454_v19, 8.507059e+37  ;;  %vm3452_vm8 = vmor %vm3450_vm11, %vm3451_vm15  ;;  %v8955_v19 = vld [vmem:[#allocation8_spill] sm:$0xff] }
 0x3bf   : > { %v7838_v61 = vsel %vm7770_vm5, %v8941_v55, %v8940_v40  ;;  %v3457_v9 = vor.u32 1.1754944e-38, %v3456_v49  ;;  %v2744_v6 = vmax.f32 %v2742_v3, %v2743_v50  ;;  %v4464_v57 = vpop.eup %4463  ;;  %3918 = vst.msk [vmem:[%s6175_s16 + $0x13] sm:$0x1] %vm8921_vm0, %v3813_v53  ;;  %v8944_v52 = vsel %vm7214_vm7, %v7032_v20, %v7185_v63 }
 0x3c0   : > { %4471 = vrcp.f32 %v7828_v51  ;;  %v7856_v12 = vsel %vm7790_vm3, %v8945_v17, %v8944_v52  ;;  %vm8947_vm4 = vnez %v8946_v36  ;;  %v1107_v25 = vadd.f32 %v5463_v2, %v1068_v45  ;;  %v7869_v42 = vpop.eup %4465 }
 0x3c1   : > { %v8950_v35 = vsel %vm8947_vm4, %v8948_v5, %v8949_v58  ;;  %v3453_v20 = vsel %vm3452_vm8, %v4460_v32, %v3449_v24  ;;  %v2745_v63 = vrot.slane %v2744_v6, 1  ;;  %v7871_v15 = vadd.f32 1.0, %v4464_v57 }
 0x3c2   : > { %v7866_v18 = vsel %vm7784_vm10, %v8951_v39, %v8950_v35  ;;  %v4086_v54 = vmul.f32 -1.442695, %v1108_v44  ;;  %v4468_v62 = vpop.eup %4467  ;;  %v3458_v8 = vsel %vm7840_vm2, %v3457_v9, %v3453_v20  ;;  %vm8952_vm7 = vcmask 7168  }
 0x3c3   : > { %v3067_v33 = vsel %vm8952_vm7, %v7869_v42, 0.0  ;;  %v8954_v31 = vsel %vm7492_vm9, %v7086_v56, %v8953_v28  ;;  %v7895_v27 = vsel %vm7807_vm1, %v8956_v1, %v2484_v23  ;;  %v4470_v30 = vpop.eup %4469  ;;  %v3459_v16 = vmul.f32 %v7674_v14, %v3458_v8  ;;  %vm8962_vm9 = vmmov %vm8952_vm7  ;;  %v8963_v14 = vld [vmem:[#allocation20_spill] sm:$0xff] }
 0x3c4   : > { %v7885_v32 = vsel %vm7801_vm14, %v8955_v19, %v8954_v31  ;;  %v3068_v41 = vrot.slane %v3067_v33, 4  ;;  %v2746_v56 = vmax.f32 %v2744_v6, %v2745_v63  ;;  %4473 = vrcp.f32 %v7871_v15  ;;  %vm8969_vm11 = vmmov %vm8952_vm7 }
 0x3c5   : > { %v1802_v59 = vand.u32 2147483647, %v7828_v51  ;;  %v7900_v49 = vadd.f32 1.0, %v4468_v62  ;;  %v4085_v46 = vmul.f32 -1.442695, %v1107_v25  ;;  %v8960_v0 = vsel %vm7234_vm13, %v8958_v26, %v8959_v22  ;;  %3631 = vst.msk [vmem:[%s6117_s12 + $0xa8] sm:$0xff] %vm8962_vm9, %v3459_v16  ;;  %vm8964_vm13 = vmmov %vm8952_vm7 }
 0x3c6   : > { %v7910_v23 = vsel %vm7818_vm6, %v8961_v38, %v8960_v0  ;;  %v3663_v21 = vmul.f32 %v3459_v16, %v8963_v14  ;;  %v3069_v4 = vadd.f32 %v3068_v41, %v3067_v33  ;;  %v2832_v50 = vsub.f32 %v7779_v7, %v2746_v56  ;;  %v4472_v44 = vpop.eup %4471 }
 0x3c7   : > { %4475 = vpow2.f32 %v4086_v54  ;;  %vm1798_vm12 = vweird.f32 %v7828_v51  ;;  %v1804_v45 = vand.u32 2147483648, %v7828_v51  ;;  %v7919_v53 = vadd.f32 1.0, %v4470_v30 }
 0x3c8   : > { %4477 = vrcp.f32 %v7900_v49  ;;  %v3821_v11 = vsel %vm8964_vm13, %v3663_v21, 0.0  ;;  %v3070_v34 = vrot.slane %v3069_v4, 2  ;;  %v2886_v40 = vmul.f32 1.442695, %v2832_v50  ;;  %vm8975_vm13 = vmmov %vm8969_vm11 }
 0x3c9   : > { %v1794_v55 = vmul.f32 %v4472_v44, %v7828_v51  ;;  %v3822_v24 = vrot.slane %v3821_v11, 4  ;;  %vm7923_vm5 = vcmp.eq.f32.partialorder %v1802_v59, 8.507059e+37  ;;  %v1832_v7 = vand.u32 2147483647, %v7871_v15 }
 0x3ca   : > { %4479 = vpow2.f32 %v4085_v46  ;;  %v4474_v9 = vpop.eup %4473  ;;  %v3071_v6 = vadd.f32 %v3070_v34, %v3069_v4  ;;  %v1834_v52 = vand.u32 2147483648, %v7871_v15  ;;  %v1805_v36 = vor.u32 1.1754944e-38, %v1804_v45 }
 0x3cb   : > { %4481 = vpow2.f32 %v2886_v40  ;;  %v1795_v57 = vsub.f32 1.0, %v1794_v55  ;;  %v3823_v17 = vadd.f32 %v3822_v24, %v3821_v11  ;;  %v1824_v5 = vmul.f32 %v4474_v9, %v7871_v15 }
 0x3cc   : > { %vm1828_vm10 = vweird.f32 %v7871_v15  ;;  %v3072_v35 = vrot.slane %v3071_v6, 1  ;;  %v1819_v25 = vand.u32 2147483648, %v7900_v49  ;;  %4483 = vrcp.f32 %v7919_v53 }
 0x3cd   : > { %v4476_v58 = vpop.eup %4475  ;;  %v1796_v39 = vmul.f32 %v4472_v44, %v1795_v57  ;;  %v3824_v63 = vrot.slane %v3823_v17, 2  ;;  %vm1799_vm3 = vweird.f32 %v4472_v44  ;;  %v1825_v54 = vsub.f32 1.0, %v1824_v5 }
 0x3ce   : > { %v7933_v20 = vpop.eup %4477  ;;  %vm7935_vm14 = vcmp.eq.f32.partialorder %v1832_v7, 8.507059e+37  ;;  %v7939_v8 = vadd.f32 %v3072_v35, %v3071_v6  ;;  %v1835_v28 = vor.u32 1.1754944e-38, %v1834_v52  ;;  %v1817_v31 = vand.u32 2147483647, %v7900_v49  ;;  %vm1800_vm6 = vmor %vm1798_vm12, %vm1799_vm3 }
 0x3cf   : > { %v1797_v33 = vadd.f32 %v4472_v44, %v1796_v39  ;;  %v3825_v1 = vadd.f32 %v3824_v63, %v3823_v17  ;;  %v1826_v30 = vmul.f32 %v4474_v9, %v1825_v54  ;;  %vm1829_vm1 = vweird.f32 %v4474_v9 }
 0x3d0   : > { %v7942_v19 = vpop.eup %4479  ;;  %v1809_v16 = vmul.f32 %v7933_v20, %v7900_v49  ;;  %4485 = vrcp.f32 %v7939_v8  ;;  %vm1813_vm15 = vweird.f32 %v7900_v49  ;;  %v1820_v56 = vor.u32 1.1754944e-38, %v1819_v25  ;;  %vm1830_vm2 = vmor %vm1828_vm10, %vm1829_vm1 }
 0x3d1   : > { %v7946_v41 = vpop.eup %4481  ;;  %v1847_v59 = vand.u32 2147483647, %v7919_v53  ;;  %v1849_v46 = vand.u32 2147483648, %v7919_v53  ;;  %v3826_v3 = vrot.slane %v3825_v1, 1  ;;  %v1801_v22 = vsel %vm1800_vm6, %v4472_v44, %v1797_v33  ;;  %vm8978_vm10 = vmmov %vm8969_vm11 }
 0x3d2   : > { %v3060_v26 = vsel %vm8969_vm11, %v7946_v41, 0.0  ;;  %v1827_v0 = vadd.f32 %v4474_v9, %v1826_v30  ;;  %v7956_v38 = vpop.eup %4483  ;;  %v3484_v14 = vand.u32 2147483647, %v7939_v8  ;;  %v1806_v21 = vsel %vm7923_vm5, %v1805_v36, %v1801_v22  ;;  %vm8981_vm11 = vmmov %vm8978_vm10 }
 0x3d3   : > { %v3061_v51 = vrot.slane %v3060_v26, 4  ;;  %vm1814_vm0 = vweird.f32 %v7933_v20  ;;  %vm7965_vm8 = vcmp.eq.f32.partialorder %v1817_v31, 8.507059e+37  ;;  %v3827_v50 = vadd.f32 %v3826_v3, %v3825_v1 }
 0x3d4   : > { %v2545_v44 = vadd.f32 %v7838_v61, %v1806_v21  ;;  %v1831_v45 = vsel %vm1830_vm2, %v4474_v9, %v1827_v0  ;;  %v1810_v11 = vsub.f32 1.0, %v1809_v16  ;;  %vm1843_vm4 = vweird.f32 %v7919_v53  ;;  %vm1815_vm3 = vmor %vm1813_vm15, %vm1814_vm0 }
 0x3d5   : > { %v3062_v34 = vadd.f32 %v3061_v51, %v3060_v26  ;;  %v1836_v40 = vsel %vm7935_vm14, %v1835_v28, %v1831_v45  ;;  %v1839_v15 = vmul.f32 %v7956_v38, %v7919_v53  ;;  %v1850_v55 = vor.u32 1.1754944e-38, %v1849_v46  ;;  %v1074_v46 = vpop.xlane.xlu1 %1073  ;;  %vm8982_vm0 = vmmov %vm8978_vm10 }
 0x3d6   : > { %vm8972_vm7 = vcmask 0   ;;  %v7977_v24 = vmul.f32 0.5, %v2545_v44  ;;  %v2547_v43 = vadd.f32 %v7856_v12, %v1836_v40  ;;  %v1811_v61 = vmul.f32 %v7933_v20, %v1810_v11  ;;  %v4486_v9 = vpop.eup %4485 }
 0x3d7   : > { %3920 = vst.msk [vmem:[%s6175_s16 + $0x15] sm:$0x1] %vm8972_vm7, %v3827_v50  ;;  %v7981_v7 = vadd.f32 1.0, %v4476_v58  ;;  %vm3480_vm9 = vweird.f32 %v7939_v8  ;;  %v3486_v6 = vand.u32 2147483648, %v7939_v8  ;;  %v3063_v57 = vrot.slane %v3062_v34, 2 }
 0x3d8   : > { %v1840_v52 = vsub.f32 1.0, %v1839_v15  ;;  %v3476_v17 = vmul.f32 %v4486_v9, %v7939_v8  ;;  %vm7986_vm12 = vcmp.eq.f32.partialorder %v3484_v14, 8.507059e+37  ;;  %v2754_v12 = vsel %vm8975_vm13, %v7977_v24, -inf  ;;  %vm8989_vm13 = vmmov %vm8982_vm0 }
 0x3d9   : > { %v7992_v5 = vmul.f32 0.5, %v2547_v43  ;;  %vm7994_vm5 = vcmp.eq.f32.partialorder %v1847_v59, 8.507059e+37  ;;  %v3064_v35 = vadd.f32 %v3063_v57, %v3062_v34  ;;  %v2755_v39 = vrot.slane %v2754_v12, 4 }
 0x3da   : > { %v1812_v25 = vadd.f32 %v7933_v20, %v1811_v61  ;;  %v1841_v63 = vmul.f32 %v7956_v38, %v1840_v52  ;;  %v3477_v54 = vsub.f32 1.0, %v3476_v17  ;;  %vm1844_vm14 = vweird.f32 %v7956_v38 }
 0x3db   : > { %v2768_v62 = vsel %vm8978_vm10, %v7992_v5, -inf  ;;  %4487 = vrcp.f32 %v7981_v7  ;;  %v3065_v33 = vrot.slane %v3064_v35, 1  ;;  %v2756_v28 = vmax.f32 %v2754_v12, %v2755_v39  ;;  %vm8019_vm6 = vmor %vm1843_vm4, %vm1844_vm14 }
 0x3dc   : > { %v2769_v31 = vrot.slane %v2768_v62, 4  ;;  %v1816_v1 = vsel %vm1815_vm3, %v7933_v20, %v1812_v25  ;;  %v3478_v30 = vmul.f32 %v4486_v9, %v3477_v54  ;;  %vm3481_vm1 = vweird.f32 %v4486_v9 }
 0x3dd   : > { %v1821_v16 = vsel %vm7965_vm8, %v1820_v56, %v1816_v1  ;;  %v1842_v59 = vadd.f32 %v7956_v38, %v1841_v63  ;;  %v8012_v3 = vadd.f32 %v3065_v33, %v3064_v35  ;;  %v2757_v49 = vrot.slane %v2756_v28, 2  ;;  %vm3482_vm15 = vmor %vm3480_vm9, %vm3481_vm1 }
 0x3de   : > { %v2770_v26 = vmax.f32 %v2768_v62, %v2769_v31  ;;  %v2546_v22 = vadd.f32 %v7866_v18, %v1821_v16  ;;  %v3479_v0 = vadd.f32 %v4486_v9, %v3478_v30  ;;  %v3487_v14 = vor.u32 1.1754944e-38, %v3486_v6  ;;  %vm8986_vm9 = vmmov %vm8982_vm0 }
 0x3df   : > { %v1846_v56 = vsel %vm8019_vm6, %v7956_v38, %v1842_v59  ;;  %v8027_v51 = vadd.f32 1.0, %v7942_v19  ;;  %4489 = vrcp.f32 %v8012_v3  ;;  %v3471_v18 = vand.u32 2147483648, %v8012_v3  ;;  %vm8990_vm1 = vmmov %vm8982_vm0 }
 0x3e0   : > { %v1877_v53 = vand.u32 2147483647, %v7981_v7  ;;  %v8035_v21 = vadd.f32 %v5463_v2, %v1074_v46  ;;  %v3483_v50 = vsel %vm3482_vm15, %v4486_v9, %v3479_v0  ;;  %v2758_v44 = vmax.f32 %v2756_v28, %v2757_v49 }
 0x3e1   : > { %v8037_v4 = vpop.eup %4487  ;;  %v2771_v38 = vrot.slane %v2770_v26, 2  ;;  %v8039_v19 = vmul.f32 0.5, %v2546_v22  ;;  %v3488_v8 = vsel %vm7986_vm12, %v3487_v14, %v3483_v50  ;;  %v3469_v45 = vand.u32 2147483647, %v8012_v3 }
 0x3e2   : > { %v1851_v11 = vsel %vm7994_vm5, %v1850_v55, %v1846_v56  ;;  %v1879_v34 = vand.u32 2147483648, %v7981_v7  ;;  %v3489_v40 = vmul.f32 %v7869_v42, %v3488_v8  ;;  %v2759_v15 = vrot.slane %v2758_v44, 1  ;;  %v8983_v55 = vld [vmem:[#allocation24_spill] sm:$0xff] }
 0x3e3   : > { %v2772_v43 = vmax.f32 %v2770_v26, %v2771_v38  ;;  %v2761_v61 = vsel %vm8981_vm11, %v8039_v19, -inf  ;;  %vm1873_vm2 = vweird.f32 %v7981_v7  ;;  %v3472_v9 = vor.u32 1.1754944e-38, %v3471_v18  ;;  %vm8991_vm11 = vmmov %vm8982_vm0 }
 0x3e4   : > { %v2762_v6 = vrot.slane %v2761_v61, 4  ;;  %v2548_v57 = vadd.f32 %v7885_v32, %v1851_v11  ;;  %v1869_v52 = vmul.f32 %v8037_v4, %v7981_v7  ;;  %3633 = vst.msk [vmem:[%s6117_s12 + $0xb8] sm:$0xff] %vm8982_vm0, %v3489_v40  ;;  %v3665_v17 = vmul.f32 %v3489_v40, %v8983_v55 }
 0x3e5   : > { %vm3465_vm8 = vweird.f32 %v8012_v3  ;;  %v2760_v42 = vmax.f32 %v2758_v44, %v2759_v15  ;;  %v2773_v36 = vrot.slane %v2772_v43, 1  ;;  %vm1874_vm4 = vweird.f32 %v8037_v4  ;;  %v4490_v58 = vpop.eup %4489 }
 0x3e6   : > { %vm8059_vm7 = vcmp.eq.f32.partialorder %v1877_v53, 8.507059e+37  ;;  %v2763_v35 = vmax.f32 %v2761_v61, %v2762_v6  ;;  %v8063_v32 = vmul.f32 0.5, %v2548_v57  ;;  %v1870_v39 = vsub.f32 1.0, %v1869_v52  ;;  %vm1875_vm10 = vmor %vm1873_vm2, %vm1874_vm4 }
 0x3e7   : > { %4491 = vrcp.f32 %v8027_v51  ;;  %v3835_v25 = vsel %vm8986_vm9, %v3665_v17, 0.0  ;;  %v3461_v63 = vmul.f32 %v4490_v58, %v8012_v3  ;;  %vm8068_vm12 = vcmp.eq.f32.partialorder %v3469_v45, 8.507059e+37  ;;  %vm8993_vm2 = vmmov %vm8982_vm0 }
 0x3e8   : > { %v2834_v62 = vsub.f32 %v7977_v24, %v2760_v42  ;;  %v1880_v33 = vor.u32 1.1754944e-38, %v1879_v34  ;;  %v3836_v28 = vrot.slane %v3835_v25, 4  ;;  %v2774_v31 = vmax.f32 %v2772_v43, %v2773_v36  ;;  %vm8995_vm4 = vmmov %vm8990_vm1 }
 0x3e9   : > { %v2764_v1 = vrot.slane %v2763_v35, 2  ;;  %v2775_v30 = vsel %vm8989_vm13, %v8063_v32, -inf  ;;  %v3462_v16 = vsub.f32 1.0, %v3461_v63  ;;  %v1871_v49 = vmul.f32 %v8037_v4, %v1870_v39 }
 0x3ea   : > { %v2890_v59 = vmul.f32 1.442695, %v2834_v62  ;;  %v2776_v46 = vrot.slane %v2775_v30, 4  ;;  %v3837_v26 = vadd.f32 %v3836_v28, %v3835_v25  ;;  %vm3466_vm5 = vweird.f32 %v4490_v58 }
 0x3eb   : > { %v2836_v22 = vsub.f32 %v7992_v5, %v2774_v31  ;;  %v2765_v20 = vmax.f32 %v2763_v35, %v2764_v1  ;;  %v3463_v0 = vmul.f32 %v4490_v58, %v3462_v16  ;;  %v1872_v14 = vadd.f32 %v8037_v4, %v1871_v49  ;;  %vm3467_vm14 = vmor %vm3465_vm8, %vm3466_vm5  ;;  %v1077_v49 = vpop.xlane.xlu2 %1076 }
 0x3ec   : > { %4493 = vpow2.f32 %v2890_v59  ;;  %v2777_v24 = vmax.f32 %v2775_v30, %v2776_v46  ;;  %v3838_v18 = vrot.slane %v3837_v26, 2  ;;  %vm1858_vm3 = vweird.f32 %v8027_v51  ;;  %vm9000_vm5 = vmmov %vm8990_vm1 }
 0x3ed   : > { %v8078_v56 = vpop.eup %4491  ;;  %v2894_v53 = vmul.f32 1.442695, %v2836_v22  ;;  %v2766_v50 = vrot.slane %v2765_v20, 1  ;;  %v3464_v44 = vadd.f32 %v4490_v58, %v3463_v0  ;;  %v1876_v38 = vsel %vm1875_vm10, %v8037_v4, %v1872_v14  ;;  %v8999_v0 = vld [vmem:[#allocation13_spill] sm:$0xff] }
 0x3ee   : > { %v2778_v5 = vrot.slane %v2777_v24, 2  ;;  %v1854_v8 = vmul.f32 %v8078_v56, %v8027_v51  ;;  %v3839_v45 = vadd.f32 %v3838_v18, %v3837_v26  ;;  %v1881_v7 = vsel %vm8059_vm7, %v1880_v33, %v1876_v38  ;;  %vm8996_vm7 = vmmov %vm8990_vm1 }
 0x3ef   : > { %4495 = vpow2.f32 %v2894_v53  ;;  %v2767_v11 = vmax.f32 %v2765_v20, %v2766_v50  ;;  %v3468_v34 = vsel %vm3467_vm14, %v4490_v58, %v3464_v44  ;;  %v2550_v15 = vadd.f32 %v7895_v27, %v1881_v7  ;;  %vm9003_vm14 = vmmov %vm8990_vm1 }
 0x3f0   : > { %v2779_v40 = vmax.f32 %v2777_v24, %v2778_v5  ;;  %v1855_v43 = vsub.f32 1.0, %v1854_v8  ;;  %v3840_v4 = vrot.slane %v3839_v45, 1  ;;  %v3473_v61 = vsel %vm8068_vm12, %v3472_v9, %v3468_v34 }
 0x3f1   : > { %v2835_v6 = vsub.f32 %v8039_v19, %v2767_v11  ;;  %v1862_v3 = vand.u32 2147483647, %v8027_v51  ;;  %v3474_v52 = vmul.f32 %v7946_v41, %v3473_v61  ;;  %v8101_v17 = vmul.f32 0.5, %v2550_v15  ;;  %v8992_v19 = vld [vmem:[#allocation22_spill] sm:$0xff] }
 0x3f2   : > { %v8098_v57 = vpop.eup %4493  ;;  %v2780_v55 = vrot.slane %v2779_v40, 1  ;;  %v1856_v27 = vmul.f32 %v8078_v56, %v1855_v43  ;;  %v3841_v42 = vadd.f32 %v3840_v4, %v3839_v45  ;;  %vm1859_vm6 = vweird.f32 %v8078_v56 }
 0x3f3   : > { %v3074_v36 = vsel %vm8990_vm1, %v8098_v57, 0.0  ;;  %v2892_v12 = vmul.f32 1.442695, %v2835_v6  ;;  %vm2497_vm15 = vweird.f32 %v7469_v48  ;;  %3632 = vst.msk [vmem:[%s6117_s12 + $0xb0] sm:$0xff] %vm8991_vm11, %v3474_v52  ;;  %v3664_v9 = vmul.f32 %v3474_v52, %v8992_v19  ;;  %vm8128_vm9 = vmor %vm1858_vm3, %vm1859_vm6 }
 0x3f4   : > { %v3075_v58 = vrot.slane %v3074_v36, 4  ;;  %v2781_v41 = vmax.f32 %v2779_v40, %v2780_v55  ;;  %v2789_v35 = vsel %vm8993_vm2, %v8101_v17, -inf  ;;  %vm8994_vm0 = vcmask 0   ;;  %vm9008_vm11 = vmmov %vm8993_vm2 }
 0x3f5   : > { %v8113_v39 = vpop.eup %4495  ;;  %3922 = vst.msk [vmem:[%s6175_s16 + $0x17] sm:$0x1] %vm8994_vm0, %v3841_v42  ;;  %4497 = vpow2.f32 %v2892_v12  ;;  %v2790_v25 = vrot.slane %v2789_v35, 4  ;;  %v1857_v63 = vadd.f32 %v8078_v56, %v1856_v27  ;;  %v1864_v54 = vand.u32 2147483648, %v8027_v51 }
 0x3f6   : > { %vm2496_vm8 = vweird.f32 %v7421_v13  ;;  %v3828_v62 = vsel %vm8995_vm4, %v3664_v9, 0.0  ;;  %v3076_v33 = vadd.f32 %v3075_v58, %v3074_v36  ;;  %v3088_v28 = vsel %vm8996_vm7, %v8113_v39, 0.0 }
 0x3f7   : > { %v2837_v31 = vsub.f32 %v8063_v32, %v2781_v41  ;;  %v3829_v30 = vrot.slane %v3828_v62, 4  ;;  %v3089_v16 = vrot.slane %v3088_v28, 4  ;;  %v2791_v59 = vmax.f32 %v2789_v35, %v2790_v25  ;;  %vm8154_vm3 = vmor %vm2496_vm8, %vm2497_vm15 }
 0x3f8   : > { %v1861_v46 = vsel %vm8128_vm9, %v8078_v56, %v1857_v63  ;;  %v3077_v26 = vrot.slane %v3076_v33, 2  ;;  %v1865_v20 = vor.u32 1.1754944e-38, %v1864_v54  ;;  %v4087_v32 = vmul.f32 -1.442695, %v8035_v21  ;;  %vm9007_vm15 = vmmov %vm8994_vm0 }
 0x3f9   : > { %v2896_v22 = vmul.f32 1.442695, %v2837_v31  ;;  %vm2511_vm12 = vweird.f32 %v8999_v0  ;;  %v3830_v51 = vadd.f32 %v3829_v30, %v3828_v62  ;;  %v3090_v24 = vadd.f32 %v3089_v16, %v3088_v28 }
 0x3fa   : > { %v2792_v14 = vrot.slane %v2791_v59, 2  ;;  %vm1863_vm13 = vcmp.eq.f32.partialorder %v1862_v3, 8.507059e+37  ;;  %v3078_v18 = vadd.f32 %v3077_v26, %v3076_v33  ;;  %v1110_v50 = vadd.f32 %v5463_v2, %v1077_v49 }
 0x3fb   : > { %4499 = vpow2.f32 %v2896_v22  ;;  %v1866_v53 = vsel %vm1863_vm13, %v1865_v20, %v1861_v46  ;;  %v8138_v44 = vpop.eup %4497  ;;  %v3831_v56 = vrot.slane %v3830_v51, 2  ;;  %v3091_v5 = vrot.slane %v3090_v24, 2  ;;  %vm9013_vm13 = vmmov %vm9000_vm5 }
 0x3fc   : > { %v2793_v38 = vmax.f32 %v2791_v59, %v2792_v14  ;;  %v2549_v8 = vadd.f32 %v7910_v23, %v1866_v53  ;;  %v3079_v45 = vrot.slane %v3078_v18, 1  ;;  %v3081_v21 = vsel %vm9000_vm5, %v8138_v44, 0.0 }
 0x3fd   : > { %4501 = vpow2.f32 %v4087_v32  ;;  %v4088_v11 = vmul.f32 -1.442695, %v1110_v50  ;;  %v3832_v7 = vadd.f32 %v3831_v56, %v3830_v51  ;;  %v3092_v34 = vadd.f32 %v3091_v5, %v3090_v24 }
 0x3fe   : > { %v3082_v40 = vrot.slane %v3081_v21, 4  ;;  %v2794_v15 = vrot.slane %v2793_v38, 1  ;;  %v8145_v2 = vadd.f32 %v7316_v47, %v7812_v29  ;;  %vm2512_vm10 = vweird.f32 %v7316_v47 }
 0x3ff   : > { %v8148_v43 = vadd.f32 %v3079_v45, %v3078_v18  ;;  %4503 = vpow2.f32 %v4088_v11  ;;  %v3833_v4 = vrot.slane %v3832_v7, 1  ;;  %v3093_v61 = vrot.slane %v3092_v34, 1  ;;  %vm8177_vm1 = vmor %vm2511_vm12, %vm2512_vm10 }
 0x400   : > { %v3083_v6 = vadd.f32 %v3082_v40, %v3081_v21  ;;  %v2795_v3 = vmax.f32 %v2793_v38, %v2794_v15  ;;  %v2499_v29 = vsel %vm8154_vm3, %v7469_v48, %v7824_v37  ;;  %v2503_v55 = vor.u32 1.1754944e-38, %v2502_v60 }
 0x401   : > { %v8158_v52 = vpop.eup %4499  ;;  %4505 = vrcp.f32 %v8148_v43  ;;  %v8167_v27 = vmul.f32 0.5, %v2549_v8  ;;  %v3834_v42 = vadd.f32 %v3833_v4, %v3832_v7  ;;  %v8169_v36 = vadd.f32 %v3093_v61, %v3092_v34 }
 0x402   : > { %v3084_v12 = vrot.slane %v3083_v6, 2  ;;  %v3095_v19 = vsel %vm9003_vm14, %v8158_v52, 0.0  ;;  %v9006_v60 = vand.u32 2147483648, %v8999_v0  ;;  %vm2501_vm6 = vcmp.eq.f32.partialorder %v2500_v10, 8.507059e+37 }
 0x403   : > { %v4502_v9 = vpop.eup %4501  ;;  %v3096_v58 = vrot.slane %v3095_v19, 4  ;;  %v2839_v41 = vsub.f32 %v8101_v17, %v2795_v3  ;;  %v2514_v35 = vsel %vm8177_vm1, %v7316_v47, %v8145_v2  ;;  %3921 = vst.msk [vmem:[%s6175_s16 + $0x16] sm:$0x1] %vm9007_vm15, %v3834_v42  ;;  %v3499_v25 = vand.u32 2147483647, %v8148_v43 }
 0x404   : > { %v8183_v37 = vor.u32 1.1754944e-38, %v9006_v60  ;;  %4507 = vrcp.f32 %v8169_v36  ;;  %v8196_v63 = vsel %vm2501_vm6, %v2503_v55, %v2499_v29  ;;  %v3085_v62 = vadd.f32 %v3084_v12, %v3083_v6 }
 0x405   : > { %v4504_v54 = vpop.eup %4503  ;;  %v3097_v13 = vadd.f32 %v3096_v58, %v3095_v19  ;;  %v2900_v10 = vmul.f32 1.442695, %v2839_v41  ;;  %v2782_v17 = vsel %vm9008_vm11, %v8167_v27, -inf  ;;  %v3501_v33 = vand.u32 2147483648, %v8148_v43 }
 0x406   : > { %v3529_v28 = vand.u32 2147483647, %v8169_v36  ;;  %v2783_v31 = vrot.slane %v2782_v17, 4  ;;  %v8202_v1 = vadd.f32 1.0, %v4502_v9  ;;  %v3531_v16 = vand.u32 2147483648, %v8169_v36 }
 0x407   : > { %v4506_v30 = vpop.eup %4505  ;;  %v3086_v59 = vrot.slane %v3085_v62, 1  ;;  %v3098_v46 = vrot.slane %v3097_v13, 2  ;;  %4509 = vpow2.f32 %v2900_v10  ;;  %vm3495_vm2 = vweird.f32 %v8148_v43 }
 0x408   : > { %v3491_v49 = vmul.f32 %v4506_v30, %v8148_v43  ;;  %v2784_v26 = vmax.f32 %v2782_v17, %v2783_v31  ;;  %4511 = vrcp.f32 %v8202_v1  ;;  %vm8208_vm0 = vcmp.eq.f32.partialorder %v3499_v25, 8.507059e+37 }
 0x409   : > { %v8212_v20 = vadd.f32 %v3086_v59, %v3085_v62  ;;  %v3099_v32 = vadd.f32 %v3098_v46, %v3097_v13  ;;  %v8214_v51 = vadd.f32 1.0, %v4504_v54  ;;  %v3502_v18 = vor.u32 1.1754944e-38, %v3501_v33 }
 0x40a   : > { %v4508_v24 = vpop.eup %4507  ;;  %v3492_v14 = vsub.f32 1.0, %v3491_v49  ;;  %vm3525_vm8 = vweird.f32 %v8169_v36  ;;  %v2785_v53 = vrot.slane %v2784_v26, 2  ;;  %vm8218_vm4 = vcmp.eq.f32.partialorder %v3529_v28, 8.507059e+37 }
 0x40b   : > { %v3521_v50 = vmul.f32 %v4508_v24, %v8169_v36  ;;  %v3532_v5 = vor.u32 1.1754944e-38, %v3531_v16  ;;  %4513 = vrcp.f32 %v8212_v20  ;;  %vm3496_vm7 = vweird.f32 %v4506_v30  ;;  %v9018_v36 = vld [vmem:[#allocation23_spill] sm:$0xff] }
 0x40c   : > { %v3493_v38 = vmul.f32 %v4506_v30, %v3492_v14  ;;  %v3100_v8 = vrot.slane %v3099_v32, 1  ;;  %v1894_v45 = vand.u32 2147483648, %v8202_v1  ;;  %v3516_v7 = vand.u32 2147483648, %v8212_v20  ;;  %vm3497_vm9 = vmor %vm3495_vm2, %vm3496_vm7 }
 0x40d   : > { %v8224_v21 = vpop.eup %4509  ;;  %v3522_v11 = vsub.f32 1.0, %v3521_v50  ;;  %v2786_v34 = vmax.f32 %v2784_v26, %v2785_v53  ;;  %4515 = vrcp.f32 %v8214_v51  ;;  %v3514_v23 = vand.u32 2147483647, %v8212_v20  ;;  %v9021_v50 = vld [vmem:[#allocation27_spill] sm:$0xff] }
 0x40e   : > { %v8228_v40 = vpop.eup %4511  ;;  %v3494_v15 = vadd.f32 %v4506_v30, %v3493_v38  ;;  %v8231_v4 = vadd.f32 %v3100_v8, %v3099_v32  ;;  %v1892_v61 = vand.u32 2147483647, %v8202_v1  ;;  %vm3526_vm12 = vweird.f32 %v4508_v24 }
 0x40f   : > { %v3523_v6 = vmul.f32 %v4508_v24, %v3522_v11  ;;  %v3109_v3 = vsel %vm9013_vm13, %v8224_v21, 0.0  ;;  %v2787_v29 = vrot.slane %v2786_v34, 1  ;;  %vm3510_vm5 = vweird.f32 %v8212_v20  ;;  %vm3527_vm3 = vmor %vm3525_vm8, %vm3526_vm12 }
 0x410   : > { %v3498_v55 = vsel %vm3497_vm9, %v4506_v30, %v3494_v15  ;;  %4517 = vrcp.f32 %v8231_v4  ;;  %v1884_v42 = vmul.f32 %v8228_v40, %v8202_v1  ;;  %v1895_v12 = vor.u32 1.1754944e-38, %v1894_v45 }
 0x411   : > { %v4514_v19 = vpop.eup %4513  ;;  %v3503_v43 = vsel %vm8208_vm0, %v3502_v18, %v3498_v55  ;;  %v3524_v9 = vadd.f32 %v4508_v24, %v3523_v6  ;;  %v3517_v60 = vor.u32 1.1754944e-38, %v3516_v7  ;;  %v3110_v58 = vrot.slane %v3109_v3, 4  ;;  %vm9019_vm0 = vmmov %vm9008_vm11 }
 0x412   : > { %vm1888_vm10 = vweird.f32 %v8202_v1  ;;  %v3504_v41 = vmul.f32 %v8098_v57, %v3503_v43  ;;  %v3506_v25 = vmul.f32 %v4514_v19, %v8212_v20  ;;  %vm8250_vm14 = vcmp.eq.f32.partialorder %v3514_v23, 8.507059e+37  ;;  %vm9020_vm8 = vmmov %vm9019_vm0 }
 0x413   : > { %v3544_v62 = vand.u32 2147483647, %v8231_v4  ;;  %v3546_v13 = vand.u32 2147483648, %v8231_v4  ;;  %v8256_v10 = vpop.eup %4515  ;;  %v3528_v17 = vsel %vm3527_vm3, %v4508_v24, %v3524_v9  ;;  %vm3511_vm6 = vweird.f32 %v4514_v19  ;;  %vm9022_vm7 = vmmov %vm9019_vm0 }
 0x414   : > { %v3111_v33 = vadd.f32 %v3110_v58, %v3109_v3  ;;  %v2788_v57 = vmax.f32 %v2786_v34, %v2787_v29  ;;  %vm8258_vm15 = vcmp.eq.f32.partialorder %v1892_v61, 8.507059e+37  ;;  %3634 = vst.msk [vmem:[%s6117_s12 + $0xc0] sm:$0xff] %vm9008_vm11, %v3504_v41  ;;  %v3666_v31 = vmul.f32 %v3504_v41, %v9018_v36  ;;  %vm3512_vm9 = vmor %vm3510_vm5, %vm3511_vm6 }
 0x415   : > { %v3533_v30 = vsel %vm8218_vm4, %v3532_v5, %v3528_v17  ;;  %v3507_v16 = vsub.f32 1.0, %v3506_v25  ;;  %v1885_v59 = vsub.f32 1.0, %v1884_v42  ;;  %vm1889_vm2 = vweird.f32 %v8228_v40  ;;  %vm9023_vm5 = vmmov %vm9019_vm0 }
 0x416   : > { %v3534_v46 = vmul.f32 %v8113_v39, %v3533_v30  ;;  %v3112_v49 = vrot.slane %v3111_v33, 2  ;;  %v2838_v26 = vsub.f32 %v8167_v27, %v2788_v57  ;;  %v4518_v22 = vpop.eup %4517  ;;  %v3842_v32 = vsel %vm9019_vm0, %v3666_v31, 0.0  ;;  %vm1890_vm12 = vmor %vm1888_vm10, %vm1889_vm2 }
 0x417   : > { %v3508_v24 = vmul.f32 %v4514_v19, %v3507_v16  ;;  %v1886_v14 = vmul.f32 %v8228_v40, %v1885_v59  ;;  %v1899_v18 = vmul.f32 %v8256_v10, %v8214_v51  ;;  %v3843_v53 = vrot.slane %v3842_v32, 4  ;;  %vm9028_vm11 = vmmov %vm9019_vm0 }
 0x418   : > { %3636 = vst.msk [vmem:[%s6117_s12 + $0xd0] sm:$0xff] %vm9020_vm8, %v3534_v46  ;;  %v3668_v56 = vmul.f32 %v3534_v46, %v9021_v50  ;;  %v3536_v39 = vmul.f32 %v4518_v22, %v8231_v4  ;;  %vm3541_vm4 = vweird.f32 %v4518_v22  ;;  %v3113_v5 = vadd.f32 %v3112_v49, %v3111_v33  ;;  %v9030_v46 = vld [vmem:[#allocation26_spill] sm:$0xff]  ;;  %vm9031_vm8 = vmmov %vm9023_vm5 }
 0x419   : > { %v3509_v27 = vadd.f32 %v4514_v19, %v3508_v24  ;;  %v2898_v38 = vmul.f32 1.442695, %v2838_v26  ;;  %v1887_v8 = vadd.f32 %v8228_v40, %v1886_v14  ;;  %v3844_v45 = vadd.f32 %v3843_v53, %v3842_v32 }
 0x41a   : > { %v3856_v11 = vsel %vm9022_vm7, %v3668_v56, 0.0  ;;  %v3537_v7 = vsub.f32 1.0, %v3536_v39  ;;  %v1900_v34 = vsub.f32 1.0, %v1899_v18  ;;  %v3114_v61 = vrot.slane %v3113_v5, 1 }
 0x41b   : > { %v3857_v15 = vrot.slane %v3856_v11, 4  ;;  %v3513_v23 = vsel %vm3512_vm9, %v4514_v19, %v3509_v27  ;;  %4519 = vpow2.f32 %v2898_v38  ;;  %v3845_v6 = vrot.slane %v3844_v45, 2 }
 0x41c   : > { %v3518_v3 = vsel %vm8250_vm14, %v3517_v60, %v3513_v23  ;;  %v3538_v29 = vmul.f32 %v4518_v22, %v3537_v7  ;;  %v1891_v20 = vsel %vm1890_vm12, %v8228_v40, %v1887_v8  ;;  %v8291_v43 = vadd.f32 %v3114_v61, %v3113_v5  ;;  %v9024_v60 = vld [vmem:[#allocation25_spill] sm:$0xff]  ;;  %vm9025_vm14 = vmmov %vm9019_vm0 }
 0x41d   : > { %v3858_v55 = vadd.f32 %v3857_v15, %v3856_v11  ;;  %v3519_v42 = vmul.f32 %v8138_v44, %v3518_v3  ;;  %v1896_v19 = vsel %vm8258_vm15, %v1895_v12, %v1891_v20  ;;  %v3846_v9 = vadd.f32 %v3845_v6, %v3844_v45  ;;  %vm9027_vm15 = vmmov %vm9019_vm0 }
 0x41e   : > { %v3539_v58 = vadd.f32 %v4518_v22, %v3538_v29  ;;  %vm3540_vm13 = vweird.f32 %v8231_v4  ;;  %v2551_v1 = vadd.f32 %v8196_v63, %v1896_v19  ;;  %v3547_v40 = vor.u32 1.1754944e-38, %v3546_v13 }
 0x41f   : > { %v3859_v41 = vrot.slane %v3858_v55, 2  ;;  %3635 = vst.msk [vmem:[%s6117_s12 + $0xc8] sm:$0xff] %vm9023_vm5, %v3519_v42  ;;  %v3667_v25 = vmul.f32 %v3519_v42, %v9024_v60  ;;  %vm3542_vm10 = vmor %vm3540_vm13, %vm3541_vm4  ;;  %4521 = vrcp.f32 %v8291_v43  ;;  %v3847_v44 = vrot.slane %v3846_v9, 1 }
 0x420   : > { %v3543_v54 = vsel %vm3542_vm10, %v4518_v22, %v3539_v58  ;;  %vm3545_vm3 = vcmp.eq.f32.partialorder %v3544_v62, 8.507059e+37  ;;  %v1901_v12 = vmul.f32 %v8256_v10, %v1900_v34  ;;  %v8306_v57 = vmul.f32 0.5, %v2551_v1  ;;  %vm9032_vm4 = vmmov %vm9023_vm5 }
 0x421   : > { %v8303_v17 = vpop.eup %4519  ;;  %v3860_v4 = vadd.f32 %v3859_v41, %v3858_v55  ;;  %v3849_v63 = vsel %vm9025_vm14, %v3667_v25, 0.0  ;;  %v3548_v33 = vsel %vm3545_vm3, %v3547_v40, %v3543_v54  ;;  %v9026_v28 = vand.u32 2147483647, %v8999_v0 }
 0x422   : > { %v3848_v13 = vadd.f32 %v3847_v44, %v3846_v9  ;;  %v3850_v36 = vrot.slane %v3849_v63, 4  ;;  %v3549_v31 = vmul.f32 %v8158_v52, %v3548_v33  ;;  %v3102_v62 = vsel %vm9027_vm15, %v8303_v17, 0.0  ;;  %vm9039_vm15 = vmmov %vm9032_vm4 }
 0x423   : > { %vm2516_vm6 = vcmp.eq.f32.partialorder %v9026_v28, 8.507059e+37  ;;  %v3861_v30 = vrot.slane %v3860_v4, 1  ;;  %v2796_v16 = vsel %vm9028_vm11, %v8306_v57, -inf  ;;  %vm9029_vm2 = vcmask 0  }
 0x424   : > { %v2519_v0 = vsel %vm2516_vm6, %v8183_v37, %v2514_v35  ;;  %3923 = vst.msk [vmem:[%s6175_s16 + $0x18] sm:$0x1] %vm9029_vm2, %v3848_v13  ;;  %v3851_v59 = vadd.f32 %v3850_v36, %v3849_v63  ;;  %v3669_v52 = vmul.f32 %v3549_v31, %v9030_v46  ;;  %vm3570_vm0 = vweird.f32 %v8291_v43  ;;  %vm9033_vm7 = vmmov %vm9029_vm2 }
 0x425   : > { %v3103_v49 = vrot.slane %v3102_v62, 4  ;;  %v2797_v26 = vrot.slane %v2796_v16, 4  ;;  %v4522_v22 = vpop.eup %4521  ;;  %v3862_v32 = vadd.f32 %v3861_v30, %v3860_v4  ;;  %3637 = vst.msk [vmem:[%s6117_s12 + $0xd8] sm:$0xff] %vm9031_vm8, %v3549_v31  ;;  %v3574_v48 = vand.u32 2147483647, %v8291_v43  ;;  %vm9036_vm3 = vmmov %vm9029_vm2 }
 0x426   : > { %v1902_v47 = vadd.f32 %v8256_v10, %v1901_v12  ;;  %vm1904_vm1 = vweird.f32 %v8256_v10  ;;  %v3852_v2 = vrot.slane %v3851_v59, 2  ;;  %v3863_v37 = vsel %vm9032_vm4, %v3669_v52, 0.0  ;;  %vm9037_vm6 = vmmov %vm9032_vm4 }
 0x427   : > { %v3566_v35 = vmul.f32 %v4522_v22, %v8291_v43  ;;  %v3576_v24 = vand.u32 2147483648, %v8291_v43  ;;  %3925 = vst.msk [vmem:[%s6175_s16 + $0x1a] sm:$0x1] %vm9033_vm7, %v3862_v32  ;;  %v3864_v14 = vrot.slane %v3863_v37, 4  ;;  %v3104_v18 = vadd.f32 %v3103_v49, %v3102_v62  ;;  %v9038_v43 = vld [vmem:[#allocation30_spill] sm:$0xff]  ;;  %vm9040_vm11 = vmmov %vm9029_vm2 }
 0x428   : > { %v2798_v53 = vmax.f32 %v2796_v16, %v2797_v26  ;;  %vm1903_vm9 = vweird.f32 %v8214_v51  ;;  %v3853_v50 = vadd.f32 %v3852_v2, %v3851_v59  ;;  %v1907_v27 = vand.u32 2147483647, %v8214_v51  ;;  %vm9041_vm2 = vmmov %vm9032_vm4 }
 0x429   : > { %v3567_v56 = vsub.f32 1.0, %v3566_v35  ;;  %vm8336_vm12 = vmor %vm1903_vm9, %vm1904_vm1  ;;  %v1909_v5 = vand.u32 2147483648, %v8214_v51  ;;  %v3865_v38 = vadd.f32 %v3864_v14, %v3863_v37  ;;  %v3105_v8 = vrot.slane %v3104_v18, 2 }
 0x42a   : > { %v2799_v45 = vrot.slane %v2798_v53, 2  ;;  %v1906_v11 = vsel %vm8336_vm12, %v8256_v10, %v1902_v47  ;;  %v3854_v7 = vrot.slane %v3853_v50, 1  ;;  %vm3571_vm13 = vweird.f32 %v4522_v22  ;;  %vm9042_vm8 = vmmov %vm9041_vm2 }
 0x42b   : > { %v3568_v34 = vmul.f32 %v4522_v22, %v3567_v56  ;;  %v1910_v15 = vor.u32 1.1754944e-38, %v1909_v5  ;;  %v3866_v23 = vrot.slane %v3865_v38, 2  ;;  %v3106_v61 = vadd.f32 %v3105_v8, %v3104_v18  ;;  %vm3572_vm10 = vmor %vm3570_vm0, %vm3571_vm13  ;;  %v9045_v5 = vld [vmem:[#allocation28_spill] sm:$0xff] }
 0x42c   : > { %v2800_v6 = vmax.f32 %v2798_v53, %v2799_v45  ;;  %vm1908_vm5 = vcmp.eq.f32.partialorder %v1907_v27, 8.507059e+37  ;;  %v3855_v3 = vadd.f32 %v3854_v7, %v3853_v50  ;;  %v3577_v20 = vor.u32 1.1754944e-38, %v3576_v24  ;;  %vm9043_vm9 = vmmov %vm9036_vm3 }
 0x42d   : > { %v3569_v29 = vadd.f32 %v4522_v22, %v3568_v34  ;;  %v1911_v51 = vsel %vm1908_vm5, %v1910_v15, %v1906_v11  ;;  %v3867_v55 = vadd.f32 %v3866_v23, %v3865_v38  ;;  %v3107_v42 = vrot.slane %v3106_v61, 1  ;;  %vm9044_vm12 = vmmov %vm9041_vm2 }
 0x42e   : > { %v2801_v10 = vrot.slane %v2800_v6, 1  ;;  %v2552_v19 = vadd.f32 %v2519_v0, %v1911_v51  ;;  %3924 = vst.msk [vmem:[%s6175_s16 + $0x19] sm:$0x1] %vm9036_vm3, %v3855_v3  ;;  %vm3575_vm14 = vcmp.eq.f32.partialorder %v3574_v48, 8.507059e+37  ;;  %vm9046_vm13 = vmmov %vm9041_vm2 }
 0x42f   : > { %v3573_v9 = vsel %vm3572_vm10, %v4522_v22, %v3569_v29  ;;  %v3868_v58 = vrot.slane %v3867_v55, 1  ;;  %v3108_v41 = vadd.f32 %v3107_v42, %v3106_v61  ;;  %vm9047_vm5 = vmmov %vm9041_vm2 }
 0x430   : > { %v3578_v1 = vsel %vm3575_vm14, %v3577_v20, %v3573_v9  ;;  %v2802_v60 = vmax.f32 %v2800_v6, %v2801_v10  ;;  %v2584_v40 = vmul.f32 0.5, %v2552_v19  ;;  %vm9048_vm10 = vmmov %vm9036_vm3 }
 0x431   : > { %v3579_v25 = vmul.f32 %v8224_v21, %v3578_v1  ;;  %v3869_v44 = vadd.f32 %v3868_v58, %v3867_v55  ;;  %4523 = vrcp.f32 %v3108_v41  ;;  %v3559_v22 = vand.u32 2147483647, %v3108_v41 }
 0x432   : > { %v2840_v12 = vsub.f32 %v8306_v57, %v2802_v60  ;;  %v2803_v4 = vsel %vm9039_vm15, %v2584_v40, -inf  ;;  %v3561_v57 = vand.u32 2147483648, %v3108_v41  ;;  %vm3555_vm1 = vweird.f32 %v3108_v41 }
 0x433   : > { %3639 = vst.msk [vmem:[%s6117_s12 + $0xe8] sm:$0xff] %vm9037_vm6, %v3579_v25  ;;  %v3671_v54 = vmul.f32 %v3579_v25, %v9038_v43  ;;  %v2804_v63 = vrot.slane %v2803_v4, 4  ;;  %vm3560_vm7 = vcmp.eq.f32.partialorder %v3559_v22, 8.507059e+37 }
 0x434   : > { %3926 = vst.msk [vmem:[%s6175_s16 + $0x1b] sm:$0x1] %vm9040_vm11, %v3869_v44  ;;  %v2902_v28 = vmul.f32 1.442695, %v2840_v12  ;;  %v3562_v24 = vor.u32 1.1754944e-38, %v3561_v57  ;;  %vm9049_vm11 = vmmov %vm9041_vm2 }
 0x435   : > { %v3877_v33 = vsel %vm9041_vm2, %v3671_v54, 0.0  ;;  %v2805_v36 = vmax.f32 %v2803_v4, %v2804_v63  ;;  %v9050_v4 = vld [vmem:[#allocation29_spill] sm:$0xff] }
 0x436   : > { %v3878_v13 = vrot.slane %v3877_v33, 4  ;;  %4525 = vpow2.f32 %v2902_v28 }
 0x437   : > { %v4524_v21 = vpop.eup %4523  ;;  %v2806_v30 = vrot.slane %v2805_v36, 2 }
 0x438   : > { %v3879_v31 = vadd.f32 %v3878_v13, %v3877_v33  ;;  %v3551_v62 = vmul.f32 %v4524_v21, %v3108_v41  ;;  %vm3556_vm0 = vweird.f32 %v4524_v21 }
 0x439   : > { %v2807_v0 = vmax.f32 %v2805_v36, %v2806_v30  ;;  %vm3557_vm4 = vmor %vm3555_vm1, %vm3556_vm0 }
 0x43a   : > { %v3880_v16 = vrot.slane %v3879_v31, 2  ;;  %v3552_v59 = vsub.f32 1.0, %v3551_v62 }
 0x43b   : > { %v2808_v52 = vrot.slane %v2807_v0, 1 }
 0x43c   : > { %v3881_v46 = vadd.f32 %v3880_v16, %v3879_v31  ;;  %v4526_v49 = vpop.eup %4525  ;;  %v3553_v26 = vmul.f32 %v4524_v21, %v3552_v59 }
 0x43d   : > { %v3116_v48 = vsel %vm9042_vm8, %v4526_v49, 0.0  ;;  %v2809_v47 = vmax.f32 %v2807_v0, %v2808_v52 }
 0x43e   : > { %v3882_v32 = vrot.slane %v3881_v46, 1  ;;  %v3554_v2 = vadd.f32 %v4524_v21, %v3553_v26  ;;  %v3117_v37 = vrot.slane %v3116_v48, 4 }
 0x43f   : > { %v2841_v14 = vsub.f32 %v2584_v40, %v2809_v47 }
 0x440   : > { %v3883_v35 = vadd.f32 %v3882_v32, %v3881_v46  ;;  %v3558_v18 = vsel %vm3557_vm4, %v4524_v21, %v3554_v2  ;;  %v3118_v53 = vadd.f32 %v3117_v37, %v3116_v48  ;;  %v9052_v48 = vld [vmem:[#allocation31_spill] sm:$0xff] }
 0x441   : > { %v3563_v50 = vsel %vm3560_vm7, %v3562_v24, %v3558_v18  ;;  %v2904_v56 = vmul.f32 1.442695, %v2841_v14  ;;  %vm9051_vm7 = vmmov %vm9041_vm2 }
 0x442   : > { %3928 = vst.msk [vmem:[%s6175_s16 + $0x1d] sm:$0x1] %vm9043_vm9, %v3883_v35  ;;  %v3564_v39 = vmul.f32 %v8303_v17, %v3563_v50  ;;  %v3119_v27 = vrot.slane %v3118_v53, 2 }
 0x443   : > { %4527 = vpow2.f32 %v2904_v56 }
 0x444   : > { %3638 = vst.msk [vmem:[%s6117_s12 + $0xe0] sm:$0xff] %vm9044_vm12, %v3564_v39  ;;  %v3670_v38 = vmul.f32 %v3564_v39, %v9045_v5  ;;  %v3120_v8 = vadd.f32 %v3119_v27, %v3118_v53  ;;  %vm9053_vm12 = vmmov %vm9041_vm2 }
 0x446   : > { %v3870_v45 = vsel %vm9046_vm13, %v3670_v38, 0.0  ;;  %v3121_v11 = vrot.slane %v3120_v8, 1  ;;  %vm9054_vm13 = vmmov %vm9043_vm9 }
 0x447   : > { %v3871_v7 = vrot.slane %v3870_v45, 4 }
 0x448   : > { %v3122_v34 = vadd.f32 %v3121_v11, %v3120_v8 }
 0x449   : > { %v4528_v15 = vpop.eup %4527  ;;  %v3872_v23 = vadd.f32 %v3871_v7, %v3870_v45 }
 0x44a   : > { %4529 = vrcp.f32 %v3122_v34  ;;  %v3123_v6 = vsel %vm9047_vm5, %v4528_v15, 0.0  ;;  %v3591_v58 = vand.u32 2147483648, %v3122_v34  ;;  %v3589_v60 = vand.u32 2147483647, %v3122_v34 }
 0x44b   : > { %v3873_v61 = vrot.slane %v3872_v23, 2  ;;  %v3124_v17 = vrot.slane %v3123_v6, 4  ;;  %vm3585_vm14 = vweird.f32 %v3122_v34 }
 0x44c   : > { %v3592_v44 = vor.u32 1.1754944e-38, %v3591_v58  ;;  %vm3590_vm15 = vcmp.eq.f32.partialorder %v3589_v60, 8.507059e+37 }
 0x44d   : > { %v3874_v3 = vadd.f32 %v3873_v61, %v3872_v23  ;;  %v3125_v29 = vadd.f32 %v3124_v17, %v3123_v6 }
 0x44f   : > { %v3875_v20 = vrot.slane %v3874_v3, 1  ;;  %v3126_v55 = vrot.slane %v3125_v29, 2 }
 0x450   : > { %v4530_v51 = vpop.eup %4529 }
 0x451   : > { %v3876_v42 = vadd.f32 %v3875_v20, %v3874_v3  ;;  %v3581_v10 = vmul.f32 %v4530_v51, %v3122_v34  ;;  %v3127_v19 = vadd.f32 %v3126_v55, %v3125_v29  ;;  %vm3586_vm3 = vweird.f32 %v4530_v51 }
 0x452   : > { %vm3587_vm6 = vmor %vm3585_vm14, %vm3586_vm3 }
 0x453   : > { %3927 = vst.msk [vmem:[%s6175_s16 + $0x1c] sm:$0x1] %vm9048_vm10, %v3876_v42  ;;  %v3582_v9 = vsub.f32 1.0, %v3581_v10  ;;  %v3128_v1 = vrot.slane %v3127_v19, 1 }
 0x455   : > { %v3583_v41 = vmul.f32 %v4530_v51, %v3582_v9  ;;  %v3129_v25 = vadd.f32 %v3128_v1, %v3127_v19 }
 0x457   : > { %v3584_v40 = vadd.f32 %v4530_v51, %v3583_v41  ;;  %4531 = vrcp.f32 %v3129_v25  ;;  %v3606_v30 = vand.u32 2147483648, %v3129_v25  ;;  %v3604_v16 = vand.u32 2147483647, %v3129_v25 }
 0x458   : > { %vm3600_vm8 = vweird.f32 %v3129_v25 }
 0x459   : > { %v3588_v43 = vsel %vm3587_vm6, %v4530_v51, %v3584_v40  ;;  %v3607_v57 = vor.u32 1.1754944e-38, %v3606_v30  ;;  %vm3605_vm4 = vcmp.eq.f32.partialorder %v3604_v16, 8.507059e+37 }
 0x45a   : > { %v3593_v54 = vsel %vm3590_vm15, %v3592_v44, %v3588_v43 }
 0x45b   : > { %v3594_v12 = vmul.f32 %v4526_v49, %v3593_v54 }
 0x45d   : > { %3640 = vst.msk [vmem:[%s6117_s12 + $0xf0] sm:$0xff] %vm9049_vm11, %v3594_v12  ;;  %v3672_v63 = vmul.f32 %v3594_v12, %v9050_v4  ;;  %v4532_v33 = vpop.eup %4531 }
 0x45e   : > { %v3596_v13 = vmul.f32 %v4532_v33, %v3129_v25  ;;  %vm3601_vm0 = vweird.f32 %v4532_v33 }
 0x45f   : > { %v3884_v28 = vsel %vm9041_vm2, %v3672_v63, 0.0  ;;  %vm3602_vm1 = vmor %vm3600_vm8, %vm3601_vm0 }
 0x460   : > { %v3885_v36 = vrot.slane %v3884_v28, 4  ;;  %v3597_v21 = vsub.f32 1.0, %v3596_v13 }
 0x462   : > { %v3886_v31 = vadd.f32 %v3885_v36, %v3884_v28  ;;  %v3598_v62 = vmul.f32 %v4532_v33, %v3597_v21 }
 0x464   : > { %v3887_v0 = vrot.slane %v3886_v31, 2  ;;  %v3599_v59 = vadd.f32 %v4532_v33, %v3598_v62 }
 0x466   : > { %v3888_v46 = vadd.f32 %v3887_v0, %v3886_v31  ;;  %v3603_v52 = vsel %vm3602_vm1, %v4532_v33, %v3599_v59 }
 0x467   : > { %v3608_v26 = vsel %vm3605_vm4, %v3607_v57, %v3603_v52 }
 0x468   : > { %v3889_v49 = vrot.slane %v3888_v46, 1  ;;  %v3609_v22 = vmul.f32 %v4528_v15, %v3608_v26 }
 0x46a   : > { %v3890_v32 = vadd.f32 %v3889_v49, %v3888_v46  ;;  %3641 = vst.msk [vmem:[%s6117_s12 + $0xf8] sm:$0xff] %vm9051_vm7, %v3609_v22  ;;  %v3673_v47 = vmul.f32 %v3609_v22, %v9052_v48 }
 0x46c   : > { %3929 = vst.msk [vmem:[%s6175_s16 + $0x1e] sm:$0x1] %vm9043_vm9, %v3890_v32  ;;  %v3891_v2 = vsel %vm9053_vm12, %v3673_v47, 0.0 }
 0x46d   : > { %v3892_v37 = vrot.slane %v3891_v2, 4 }
 0x46f   : > { %v3893_v35 = vadd.f32 %v3892_v37, %v3891_v2 }
 0x471   : > { %v3894_v24 = vrot.slane %v3893_v35, 2 }
 0x473   : > { %v3895_v14 = vadd.f32 %v3894_v24, %v3893_v35 }
 0x475   : > { %v3896_v18 = vrot.slane %v3895_v14, 1 }
 0x477   : > { %v3897_v53 = vadd.f32 %v3896_v18, %v3895_v14 }
 0x479   : > { %3930 = vst.msk [vmem:[%s6175_s16 + $0x1f] sm:$0x1] %vm9054_vm13, %v3897_v53 }
 0x47a PF: > { %s15_s15 = sadd.s32 1, %s4546_s15  }
 0x47b   : > { %p12_p4 = scmp.ge.s32.totalorder %s15_s15, 4  }
 0x47d   :  { %14 = sbr.rel (!%p12_p4) target bundleno = 1 (0x1), region = 74 }

</bundles_post_ra>
